<compile_context>
chip_gen: v5e
topology: v5e:2x2
jax: 0.10.0
libtpu: 0.0.40
codegen_flags: <defaults>
</compile_context>

<pallas_src>
import jax
import jax.numpy as jnp
import numpy as np
from jax import lax
from jax.experimental import pallas as pl
from jax.experimental.pallas import tpu as pltpu

H = W = 28
HW = H * W            # 784
NPAD = 896            # 7 * 128: lane-dense padded spatial axis

# ---------------------------------------------------------------------------
# Row offsets inside the single packed parameter blob (all 8-row aligned).
# ---------------------------------------------------------------------------
_FCW = 0      # 10 rows : fc1 weight^T (10, 896), lanes 784: zero
_FCB = 16     #  1 row  : fc1 bias
_MV5 = 24     #  5 rows : vertical   masks, k=5
_MH5 = 32     #  5 rows : horizontal masks, k=5
_MV3 = 40     #  3 rows : vertical   masks, k=3
_MH3 = 48     #  3 rows : horizontal masks, k=3
_B1 = 56      # 16 rows : conv1 bias, broadcast over lanes
_B2 = 72      # 16 rows : conv2 bias
_B3 = 88      #  1 row  : conv3 bias
_W1 = 96      # 16 rows : conv1 weights, cols 0:50  (full-stack packing)
_W2 = 112     # 48 rows : conv2 weights, cols 0:48  (per-dx packing, 3x16 rows)
_W3 = 160     #  3 rows : conv3 weights, cols 0:48  (per-dx packing, 3x1 rows)
_ROWS = 168


# ---------------------------------------------------------------------------
# Host-side constants: factored 'same'-padding masks (review items 2 & 3).
# mv[dy][i] = 1 iff i<784 and row(i)+dy-p in [0,H);   zero on pad lanes.
# mh[dx][i] = 1 iff i<784 and col(i)+dx-p in [0,W);   zero on pad lanes.
# mask(dy,dx) = mv[dy] * mh[dx]  (column shift never crosses a row when valid).
# ---------------------------------------------------------------------------
def _make_factored_masks(k):
    p = k // 2
    yy = np.arange(HW) // W
    xx = np.arange(HW) % W
    mv = np.zeros((k, NPAD), np.float32)
    mh = np.zeros((k, NPAD), np.float32)
    for d in range(k):
        mv[d, :HW] = ((yy + d - p >= 0) & (yy + d - p < H)).astype(np.float32)
        mh[d, :HW] = ((xx + d - p >= 0) & (xx + d - p < W)).astype(np.float32)
    return mv, mh


# ---------------------------------------------------------------------------
# One-time parameter repack into a single blob (outside the per-call hot path).
# ---------------------------------------------------------------------------
def prepare_params(params):
    blob = np.zeros((_ROWS, NPAD), np.float32)

    fc_w = np.asarray(params["fc_w"], np.float32)      # (784, 10)
    fc_b = np.asarray(params["fc_b"], np.float32)      # (784,)
    blob[_FCW:_FCW + 10, :HW] = fc_w.T
    blob[_FCB, :HW] = fc_b

    mv5, mh5 = _make_factored_masks(5)
    mv3, mh3 = _make_factored_masks(3)
    blob[_MV5:_MV5 + 5] = mv5
    blob[_MH5:_MH5 + 5] = mh5
    blob[_MV3:_MV3 + 3] = mv3
    blob[_MH3:_MH3 + 3] = mh3

    def put_conv(w, b, w_row, b_row):
        w = np.asarray(w, np.float32)
        b = np.asarray(b, np.float32)
        cout, cin, k, _ = w.shape
        if cout >= k * cin:
            # full-stack packing: row o, col = dx*(k*cin) + dy*cin + c
            wp = np.transpose(w, (0, 3, 2, 1)).reshape(cout, k * k * cin)
        else:
            # per-dx packing: row = dx*cout + o, col = dy*cin + c
            wp = np.transpose(w, (3, 0, 2, 1)).reshape(k * cout, k * cin)
        blob[w_row:w_row + wp.shape[0], :wp.shape[1]] = wp
        blob[b_row:b_row + cout, :] = b[:, None]        # broadcast over lanes

    put_conv(params["c1_w"], params["c1_b"], _W1, _B1)
    put_conv(params["c2_w"], params["c2_b"], _W2, _B2)
    put_conv(params["c3_w"], params["c3_b"], _W3, _B3)
    return jnp.asarray(blob)


# ---------------------------------------------------------------------------
# The single fused kernel: fc1 -> concat -> conv5 -> conv3 -> conv3.
# All activations are channel-major (C, 896) f32 and stay resident in VMEM.
# ---------------------------------------------------------------------------
def _encoder_kernel(p_ref, wv_ref, img_ref, out_ref):

    def mrow(r):                                    # single mask/bias row view
        return p_ref[r:r + 1, :]

    # fc1: (1,10) @ (10,896) + bias  (pad lanes of weights/bias are zero).
    x = jnp.dot(wv_ref[...], p_ref[_FCW:_FCW + 10, :],
                preferred_element_type=jnp.float32) + mrow(_FCB)
    # torch.cat([x, image], dim=1) -> channel-major (2, 896), fc plane first.
    a = jnp.concatenate([x, img_ref[...]], axis=0)

    def conv(a, *, k, cin, cout, w_row, b_row, mv_row, mh_row):
        p = k // 2
        # (dy) row shifts applied to the input, masked by the vertical masks.
        rows = []
        for dy in range(k):
            off = (dy - p) * W
            b = a if off == 0 else pltpu.roll(a, (-off) % NPAD, axis=1)
            rows.append(b * mrow(mv_row + dy))
        sv = jnp.concatenate(rows, axis=0)          # (k*cin, 896)

        if cout >= k * cin:
            # One stacked-K matmul: also stack the (dx) column shifts and let
            # the MXU do the whole tap accumulation (conv1: K = 50).
            cols = []
            for dx in range(k):
                off = dx - p
                c = sv if off == 0 else pltpu.roll(sv, (-off) % NPAD, axis=1)
                cols.append(c * mrow(mh_row + dx))
            stk = jnp.concatenate(cols, axis=0)     # (k*k*cin, 896)
            wmat = p_ref[w_row:w_row + cout, 0:k * k * cin]
            out = jnp.dot(wmat, stk, preferred_element_type=jnp.float32)
        else:
            # cout < k*cin: cheaper to shift/mask the (cout, 896) partial sums
            # than the (k*cin, 896) stack.  One wide-K matmul per dx (K = 48).
            out = None
            for dx in range(k):
                wdx = p_ref[w_row + dx * cout:w_row + (dx + 1) * cout,
                            0:k * cin]
                part = jnp.dot(wdx, sv, preferred_element_type=jnp.float32)
                off = dx - p
                if off != 0:
                    part = pltpu.roll(part, (-off) % NPAD, axis=1)
                part = part * mrow(mh_row + dx)
                out = part if out is None else out + part
        return out + p_ref[b_row:b_row + cout, :]   # bias pre-broadcast rows

    a = conv(a, k=5, cin=2, cout=16, w_row=_W1, b_row=_B1,
             mv_row=_MV5, mh_row=_MH5)
    a = conv(a, k=3, cin=16, cout=16, w_row=_W2, b_row=_B2,
             mv_row=_MV3, mh_row=_MH3)
    a = conv(a, k=3, cin=16, cout=1, w_row=_W3, b_row=_B3,
             mv_row=_MV3, mh_row=_MH3)
    out_ref[...] = a                                # (1, 896) lane-dense store


# ---------------------------------------------------------------------------
# Forward pass: one pallas_call, 3 inputs (param blob, watermark code, image).
# ---------------------------------------------------------------------------
@jax.jit
def watermark_encoder_forward(param_blob, w_vec, image):
    wv = w_vec.reshape(1, 10).astype(jnp.float32)
    img = jnp.pad(image.reshape(1, HW).astype(jnp.float32),
                  ((0, 0), (0, NPAD - HW)))
    out = pl.pallas_call(
        _encoder_kernel,
        out_shape=jax.ShapeDtypeStruct((1, NPAD), jnp.float32),
        in_specs=[pl.BlockSpec(memory_space=pltpu.MemorySpace.VMEM)] * 3,
        out_specs=pl.BlockSpec(memory_space=pltpu.MemorySpace.VMEM),
    )(param_blob, wv, img)
    # back to NCHW: (1, 1, 28, 28)
    return out[:, :HW].reshape(1, 1, H, W)


# ---------------------------------------------------------------------------
# Pure-JAX reference (correctness sanity check).
# ---------------------------------------------------------------------------
def reference_forward(params, w_vec, image):
    x = w_vec @ params["fc_w"].T + params["fc_b"]
    x = x.reshape(1, 1, H, W)
    x = jnp.concatenate([x, image], axis=1)
    h = x
    for wt, b in [(params["c1_w"], params["c1_b"]),
                  (params["c2_w"], params["c2_b"]),
                  (params["c3_w"], params["c3_b"])]:
        h = lax.conv_general_dilated(
            h, wt, window_strides=(1, 1), padding="SAME",
            dimension_numbers=("NCHW", "OIHW", "NCHW"),
            precision=lax.Precision.HIGHEST)
        h = h + b.reshape(1, -1, 1, 1)
    return h


# ---------------------------------------------------------------------------
# Deterministic parameter init (shapes from WatermarkEncoder.__init__).
# ---------------------------------------------------------------------------
def init_params(key):
    ks = jax.random.split(key, 8)

    def lin_init(kw, kb, shape, fan_in):
        bound = 1.0 / np.sqrt(fan_in)
        w = jax.random.uniform(kw, shape, jnp.float32, -bound, bound)
        b = jax.random.uniform(kb, (shape[0],), jnp.float32, -bound, bound)
        return w, b

    fc_w, fc_b = lin_init(ks[0], ks[1], (H * W, 10), 10)
    c1_w, c1_b = lin_init(ks[2], ks[3], (16, 2, 5, 5), 2 * 5 * 5)
    c2_w, c2_b = lin_init(ks[4], ks[5], (16, 16, 3, 3), 16 * 3 * 3)
    c3_w, c3_b = lin_init(ks[6], ks[7], (1, 16, 3, 3), 16 * 3 * 3)
    return dict(fc_w=fc_w, fc_b=fc_b, c1_w=c1_w, c1_b=c1_b,
                c2_w=c2_w, c2_b=c2_b, c3_w=c3_w, c3_b=c3_b)


if __name__ == "__main__":
    key = jax.random.PRNGKey(0)
    kp, kw, ki = jax.random.split(key, 3)

    params = init_params(kp)
    param_blob = prepare_params(params)                           # one-time repack
    w_vec = jax.random.normal(kw, (1, 10), jnp.float32)           # watermark code
    image = jax.random.normal(ki, (1, 1, H, W), jnp.float32)      # NCHW grayscale

    out = jax.block_until_ready(watermark_encoder_forward(param_blob, w_vec, image))
    assert out.shape == (1, 1, H, W), out.shape

    ref = jax.block_until_ready(reference_forward(params, w_vec, image))
    np.testing.assert_allclose(np.asarray(out), np.asarray(ref),
                               rtol=1e-3, atol=1e-3)

    print("KERNEL_OK")
</pallas_src>

<mosaic_0001>
module attributes {stable_mosaic.version = 11 : i64} {
  func.func @_encoder_kernel(%arg0: memref<168x896xf32, #tpu.memory_space<vmem>>, %arg1: memref<1x10xf32, #tpu.memory_space<vmem>>, %arg2: memref<1x896xf32, #tpu.memory_space<vmem>>, %arg3: memref<1x896xf32, #tpu.memory_space<vmem>>) attributes {dimension_semantics = [], scalar_prefetch = 0 : i64, scratch_operands = 0 : i64, tpu.core_type = #tpu.core_type<tc>} {
    %c0 = arith.constant 0 : index
    %c0_0 = arith.constant 0 : index
    %0 = vector.load %arg1[%c0, %c0_0] : memref<1x10xf32, #tpu.memory_space<vmem>>, vector<1x10xf32>
    %c0_1 = arith.constant 0 : index
    %c0_2 = arith.constant 0 : index
    %1 = vector.load %arg0[%c0_1, %c0_2] : memref<168x896xf32, #tpu.memory_space<vmem>>, vector<10x896xf32>
    %cst = arith.constant dense<0.000000e+00> : vector<1x896xf32>
    %2 = tpu.matmul %0, %1, %cst {dimension_numbers = #tpu.dot_dimension_numbers<[1], [0], [0], [1], [0, 0, 1, 1], [], []>} : vector<1x10xf32>, vector<10x896xf32>, vector<1x896xf32> -> vector<1x896xf32>
    %c16 = arith.constant 16 : index
    %c0_3 = arith.constant 0 : index
    %3 = vector.load %arg0[%c16, %c0_3] : memref<168x896xf32, #tpu.memory_space<vmem>>, vector<1x896xf32>
    %4 = arith.addf %2, %3 : vector<1x896xf32>
    %c0_4 = arith.constant 0 : index
    %c0_5 = arith.constant 0 : index
    %5 = vector.load %arg2[%c0_4, %c0_5] : memref<1x896xf32, #tpu.memory_space<vmem>>, vector<1x896xf32>
    %6 = tpu.concatenate %4, %5 in 0 : vector<1x896xf32>, vector<1x896xf32> -> vector<2x896xf32>
    %c56_i32 = arith.constant 56 : i32
    %7 = tpu.dynamic_rotate %6 by %c56_i32 dim 1 : vector<2x896xf32>, i32 -> vector<2x896xf32>
    %c24 = arith.constant 24 : index
    %c0_6 = arith.constant 0 : index
    %8 = vector.load %arg0[%c24, %c0_6] : memref<168x896xf32, #tpu.memory_space<vmem>>, vector<1x896xf32>
    %9 = vector.broadcast %8 : vector<1x896xf32> to vector<2x896xf32>
    %10 = arith.mulf %7, %9 : vector<2x896xf32>
    %c28_i32 = arith.constant 28 : i32
    %11 = tpu.dynamic_rotate %6 by %c28_i32 dim 1 : vector<2x896xf32>, i32 -> vector<2x896xf32>
    %c25 = arith.constant 25 : index
    %c0_7 = arith.constant 0 : index
    %12 = vector.load %arg0[%c25, %c0_7] : memref<168x896xf32, #tpu.memory_space<vmem>>, vector<1x896xf32>
    %13 = vector.broadcast %12 : vector<1x896xf32> to vector<2x896xf32>
    %14 = arith.mulf %11, %13 : vector<2x896xf32>
    %c26 = arith.constant 26 : index
    %c0_8 = arith.constant 0 : index
    %15 = vector.load %arg0[%c26, %c0_8] : memref<168x896xf32, #tpu.memory_space<vmem>>, vector<1x896xf32>
    %16 = vector.broadcast %15 : vector<1x896xf32> to vector<2x896xf32>
    %17 = arith.mulf %6, %16 : vector<2x896xf32>
    %c868_i32 = arith.constant 868 : i32
    %18 = tpu.dynamic_rotate %6 by %c868_i32 dim 1 : vector<2x896xf32>, i32 -> vector<2x896xf32>
    %c27 = arith.constant 27 : index
    %c0_9 = arith.constant 0 : index
    %19 = vector.load %arg0[%c27, %c0_9] : memref<168x896xf32, #tpu.memory_space<vmem>>, vector<1x896xf32>
    %20 = vector.broadcast %19 : vector<1x896xf32> to vector<2x896xf32>
    %21 = arith.mulf %18, %20 : vector<2x896xf32>
    %c840_i32 = arith.constant 840 : i32
    %22 = tpu.dynamic_rotate %6 by %c840_i32 dim 1 : vector<2x896xf32>, i32 -> vector<2x896xf32>
    %c28 = arith.constant 28 : index
    %c0_10 = arith.constant 0 : index
    %23 = vector.load %arg0[%c28, %c0_10] : memref<168x896xf32, #tpu.memory_space<vmem>>, vector<1x896xf32>
    %24 = vector.broadcast %23 : vector<1x896xf32> to vector<2x896xf32>
    %25 = arith.mulf %22, %24 : vector<2x896xf32>
    %26 = tpu.concatenate %10, %14, %17, %21, %25 in 0 : vector<2x896xf32>, vector<2x896xf32>, vector<2x896xf32>, vector<2x896xf32>, vector<2x896xf32> -> vector<10x896xf32>
    %c2_i32 = arith.constant 2 : i32
    %27 = tpu.dynamic_rotate %26 by %c2_i32 dim 1 : vector<10x896xf32>, i32 -> vector<10x896xf32>
    %c32 = arith.constant 32 : index
    %c0_11 = arith.constant 0 : index
    %28 = vector.load %arg0[%c32, %c0_11] : memref<168x896xf32, #tpu.memory_space<vmem>>, vector<1x896xf32>
    %29 = vector.broadcast %28 : vector<1x896xf32> to vector<10x896xf32>
    %30 = arith.mulf %27, %29 : vector<10x896xf32>
    %c1_i32 = arith.constant 1 : i32
    %31 = tpu.dynamic_rotate %26 by %c1_i32 dim 1 : vector<10x896xf32>, i32 -> vector<10x896xf32>
    %c33 = arith.constant 33 : index
    %c0_12 = arith.constant 0 : index
    %32 = vector.load %arg0[%c33, %c0_12] : memref<168x896xf32, #tpu.memory_space<vmem>>, vector<1x896xf32>
    %33 = vector.broadcast %32 : vector<1x896xf32> to vector<10x896xf32>
    %34 = arith.mulf %31, %33 : vector<10x896xf32>
    %c34 = arith.constant 34 : index
    %c0_13 = arith.constant 0 : index
    %35 = vector.load %arg0[%c34, %c0_13] : memref<168x896xf32, #tpu.memory_space<vmem>>, vector<1x896xf32>
    %36 = vector.broadcast %35 : vector<1x896xf32> to vector<10x896xf32>
    %37 = arith.mulf %26, %36 : vector<10x896xf32>
    %c895_i32 = arith.constant 895 : i32
    %38 = tpu.dynamic_rotate %26 by %c895_i32 dim 1 : vector<10x896xf32>, i32 -> vector<10x896xf32>
    %c35 = arith.constant 35 : index
    %c0_14 = arith.constant 0 : index
    %39 = vector.load %arg0[%c35, %c0_14] : memref<168x896xf32, #tpu.memory_space<vmem>>, vector<1x896xf32>
    %40 = vector.broadcast %39 : vector<1x896xf32> to vector<10x896xf32>
    %41 = arith.mulf %38, %40 : vector<10x896xf32>
    %c894_i32 = arith.constant 894 : i32
    %42 = tpu.dynamic_rotate %26 by %c894_i32 dim 1 : vector<10x896xf32>, i32 -> vector<10x896xf32>
    %c36 = arith.constant 36 : index
    %c0_15 = arith.constant 0 : index
    %43 = vector.load %arg0[%c36, %c0_15] : memref<168x896xf32, #tpu.memory_space<vmem>>, vector<1x896xf32>
    %44 = vector.broadcast %43 : vector<1x896xf32> to vector<10x896xf32>
    %45 = arith.mulf %42, %44 : vector<10x896xf32>
    %46 = tpu.concatenate %30, %34, %37, %41, %45 in 0 : vector<10x896xf32>, vector<10x896xf32>, vector<10x896xf32>, vector<10x896xf32>, vector<10x896xf32> -> vector<50x896xf32>
    %c96 = arith.constant 96 : index
    %c0_16 = arith.constant 0 : index
    %47 = vector.load %arg0[%c96, %c0_16] : memref<168x896xf32, #tpu.memory_space<vmem>>, vector<16x50xf32>
    %cst_17 = arith.constant dense<0.000000e+00> : vector<16x896xf32>
    %48 = tpu.matmul %47, %46, %cst_17 {dimension_numbers = #tpu.dot_dimension_numbers<[1], [0], [0], [1], [0, 0, 1, 1], [], []>} : vector<16x50xf32>, vector<50x896xf32>, vector<16x896xf32> -> vector<16x896xf32>
    %c56 = arith.constant 56 : index
    %c0_18 = arith.constant 0 : index
    %49 = vector.load %arg0[%c56, %c0_18] : memref<168x896xf32, #tpu.memory_space<vmem>>, vector<16x896xf32>
    %50 = arith.addf %48, %49 : vector<16x896xf32>
    %c28_i32_19 = arith.constant 28 : i32
    %51 = tpu.dynamic_rotate %50 by %c28_i32_19 dim 1 : vector<16x896xf32>, i32 -> vector<16x896xf32>
    %c40 = arith.constant 40 : index
    %c0_20 = arith.constant 0 : index
    %52 = vector.load %arg0[%c40, %c0_20] : memref<168x896xf32, #tpu.memory_space<vmem>>, vector<1x896xf32>
    %53 = vector.broadcast %52 : vector<1x896xf32> to vector<16x896xf32>
    %54 = arith.mulf %51, %53 : vector<16x896xf32>
    %c41 = arith.constant 41 : index
    %c0_21 = arith.constant 0 : index
    %55 = vector.load %arg0[%c41, %c0_21] : memref<168x896xf32, #tpu.memory_space<vmem>>, vector<1x896xf32>
    %56 = vector.broadcast %55 : vector<1x896xf32> to vector<16x896xf32>
    %57 = arith.mulf %50, %56 : vector<16x896xf32>
    %c868_i32_22 = arith.constant 868 : i32
    %58 = tpu.dynamic_rotate %50 by %c868_i32_22 dim 1 : vector<16x896xf32>, i32 -> vector<16x896xf32>
    %c42 = arith.constant 42 : index
    %c0_23 = arith.constant 0 : index
    %59 = vector.load %arg0[%c42, %c0_23] : memref<168x896xf32, #tpu.memory_space<vmem>>, vector<1x896xf32>
    %60 = vector.broadcast %59 : vector<1x896xf32> to vector<16x896xf32>
    %61 = arith.mulf %58, %60 : vector<16x896xf32>
    %62 = tpu.concatenate %54, %57, %61 in 0 : vector<16x896xf32>, vector<16x896xf32>, vector<16x896xf32> -> vector<48x896xf32>
    %c112 = arith.constant 112 : index
    %c0_24 = arith.constant 0 : index
    %63 = vector.load %arg0[%c112, %c0_24] : memref<168x896xf32, #tpu.memory_space<vmem>>, vector<16x48xf32>
    %cst_25 = arith.constant dense<0.000000e+00> : vector<16x896xf32>
    %64 = tpu.matmul %63, %62, %cst_25 {dimension_numbers = #tpu.dot_dimension_numbers<[1], [0], [0], [1], [0, 0, 1, 1], [], []>} : vector<16x48xf32>, vector<48x896xf32>, vector<16x896xf32> -> vector<16x896xf32>
    %c1_i32_26 = arith.constant 1 : i32
    %65 = tpu.dynamic_rotate %64 by %c1_i32_26 dim 1 : vector<16x896xf32>, i32 -> vector<16x896xf32>
    %c48 = arith.constant 48 : index
    %c0_27 = arith.constant 0 : index
    %66 = vector.load %arg0[%c48, %c0_27] : memref<168x896xf32, #tpu.memory_space<vmem>>, vector<1x896xf32>
    %67 = vector.broadcast %66 : vector<1x896xf32> to vector<16x896xf32>
    %68 = arith.mulf %65, %67 : vector<16x896xf32>
    %c128 = arith.constant 128 : index
    %c0_28 = arith.constant 0 : index
    %69 = vector.load %arg0[%c128, %c0_28] : memref<168x896xf32, #tpu.memory_space<vmem>>, vector<16x48xf32>
    %cst_29 = arith.constant dense<0.000000e+00> : vector<16x896xf32>
    %70 = tpu.matmul %69, %62, %cst_29 {dimension_numbers = #tpu.dot_dimension_numbers<[1], [0], [0], [1], [0, 0, 1, 1], [], []>} : vector<16x48xf32>, vector<48x896xf32>, vector<16x896xf32> -> vector<16x896xf32>
    %c49 = arith.constant 49 : index
    %c0_30 = arith.constant 0 : index
    %71 = vector.load %arg0[%c49, %c0_30] : memref<168x896xf32, #tpu.memory_space<vmem>>, vector<1x896xf32>
    %72 = vector.broadcast %71 : vector<1x896xf32> to vector<16x896xf32>
    %73 = arith.mulf %70, %72 : vector<16x896xf32>
    %74 = arith.addf %68, %73 : vector<16x896xf32>
    %c144 = arith.constant 144 : index
    %c0_31 = arith.constant 0 : index
    %75 = vector.load %arg0[%c144, %c0_31] : memref<168x896xf32, #tpu.memory_space<vmem>>, vector<16x48xf32>
    %cst_32 = arith.constant dense<0.000000e+00> : vector<16x896xf32>
    %76 = tpu.matmul %75, %62, %cst_32 {dimension_numbers = #tpu.dot_dimension_numbers<[1], [0], [0], [1], [0, 0, 1, 1], [], []>} : vector<16x48xf32>, vector<48x896xf32>, vector<16x896xf32> -> vector<16x896xf32>
    %c895_i32_33 = arith.constant 895 : i32
    %77 = tpu.dynamic_rotate %76 by %c895_i32_33 dim 1 : vector<16x896xf32>, i32 -> vector<16x896xf32>
    %c50 = arith.constant 50 : index
    %c0_34 = arith.constant 0 : index
    %78 = vector.load %arg0[%c50, %c0_34] : memref<168x896xf32, #tpu.memory_space<vmem>>, vector<1x896xf32>
    %79 = vector.broadcast %78 : vector<1x896xf32> to vector<16x896xf32>
    %80 = arith.mulf %77, %79 : vector<16x896xf32>
    %81 = arith.addf %74, %80 : vector<16x896xf32>
    %c72 = arith.constant 72 : index
    %c0_35 = arith.constant 0 : index
    %82 = vector.load %arg0[%c72, %c0_35] : memref<168x896xf32, #tpu.memory_space<vmem>>, vector<16x896xf32>
    %83 = arith.addf %81, %82 : vector<16x896xf32>
    %c28_i32_36 = arith.constant 28 : i32
    %84 = tpu.dynamic_rotate %83 by %c28_i32_36 dim 1 : vector<16x896xf32>, i32 -> vector<16x896xf32>
    %c40_37 = arith.constant 40 : index
    %c0_38 = arith.constant 0 : index
    %85 = vector.load %arg0[%c40_37, %c0_38] : memref<168x896xf32, #tpu.memory_space<vmem>>, vector<1x896xf32>
    %86 = vector.broadcast %85 : vector<1x896xf32> to vector<16x896xf32>
    %87 = arith.mulf %84, %86 : vector<16x896xf32>
    %c41_39 = arith.constant 41 : index
    %c0_40 = arith.constant 0 : index
    %88 = vector.load %arg0[%c41_39, %c0_40] : memref<168x896xf32, #tpu.memory_space<vmem>>, vector<1x896xf32>
    %89 = vector.broadcast %88 : vector<1x896xf32> to vector<16x896xf32>
    %90 = arith.mulf %83, %89 : vector<16x896xf32>
    %c868_i32_41 = arith.constant 868 : i32
    %91 = tpu.dynamic_rotate %83 by %c868_i32_41 dim 1 : vector<16x896xf32>, i32 -> vector<16x896xf32>
    %c42_42 = arith.constant 42 : index
    %c0_43 = arith.constant 0 : index
    %92 = vector.load %arg0[%c42_42, %c0_43] : memref<168x896xf32, #tpu.memory_space<vmem>>, vector<1x896xf32>
    %93 = vector.broadcast %92 : vector<1x896xf32> to vector<16x896xf32>
    %94 = arith.mulf %91, %93 : vector<16x896xf32>
    %95 = tpu.concatenate %87, %90, %94 in 0 : vector<16x896xf32>, vector<16x896xf32>, vector<16x896xf32> -> vector<48x896xf32>
    %c160 = arith.constant 160 : index
    %c0_44 = arith.constant 0 : index
    %96 = vector.load %arg0[%c160, %c0_44] : memref<168x896xf32, #tpu.memory_space<vmem>>, vector<1x48xf32>
    %cst_45 = arith.constant dense<0.000000e+00> : vector<1x896xf32>
    %97 = tpu.matmul %96, %95, %cst_45 {dimension_numbers = #tpu.dot_dimension_numbers<[1], [0], [0], [1], [0, 0, 1, 1], [], []>} : vector<1x48xf32>, vector<48x896xf32>, vector<1x896xf32> -> vector<1x896xf32>
    %c1_i32_46 = arith.constant 1 : i32
    %98 = tpu.dynamic_rotate %97 by %c1_i32_46 dim 1 : vector<1x896xf32>, i32 -> vector<1x896xf32>
    %c48_47 = arith.constant 48 : index
    %c0_48 = arith.constant 0 : index
    %99 = vector.load %arg0[%c48_47, %c0_48] : memref<168x896xf32, #tpu.memory_space<vmem>>, vector<1x896xf32>
    %100 = arith.mulf %98, %99 : vector<1x896xf32>
    %c161 = arith.constant 161 : index
    %c0_49 = arith.constant 0 : index
    %101 = vector.load %arg0[%c161, %c0_49] : memref<168x896xf32, #tpu.memory_space<vmem>>, vector<1x48xf32>
    %cst_50 = arith.constant dense<0.000000e+00> : vector<1x896xf32>
    %102 = tpu.matmul %101, %95, %cst_50 {dimension_numbers = #tpu.dot_dimension_numbers<[1], [0], [0], [1], [0, 0, 1, 1], [], []>} : vector<1x48xf32>, vector<48x896xf32>, vector<1x896xf32> -> vector<1x896xf32>
    %c49_51 = arith.constant 49 : index
    %c0_52 = arith.constant 0 : index
    %103 = vector.load %arg0[%c49_51, %c0_52] : memref<168x896xf32, #tpu.memory_space<vmem>>, vector<1x896xf32>
    %104 = arith.mulf %102, %103 : vector<1x896xf32>
    %105 = arith.addf %100, %104 : vector<1x896xf32>
    %c162 = arith.constant 162 : index
    %c0_53 = arith.constant 0 : index
    %106 = vector.load %arg0[%c162, %c0_53] : memref<168x896xf32, #tpu.memory_space<vmem>>, vector<1x48xf32>
    %cst_54 = arith.constant dense<0.000000e+00> : vector<1x896xf32>
    %107 = tpu.matmul %106, %95, %cst_54 {dimension_numbers = #tpu.dot_dimension_numbers<[1], [0], [0], [1], [0, 0, 1, 1], [], []>} : vector<1x48xf32>, vector<48x896xf32>, vector<1x896xf32> -> vector<1x896xf32>
    %c895_i32_55 = arith.constant 895 : i32
    %108 = tpu.dynamic_rotate %107 by %c895_i32_55 dim 1 : vector<1x896xf32>, i32 -> vector<1x896xf32>
    %c50_56 = arith.constant 50 : index
    %c0_57 = arith.constant 0 : index
    %109 = vector.load %arg0[%c50_56, %c0_57] : memref<168x896xf32, #tpu.memory_space<vmem>>, vector<1x896xf32>
    %110 = arith.mulf %108, %109 : vector<1x896xf32>
    %111 = arith.addf %105, %110 : vector<1x896xf32>
    %c88 = arith.constant 88 : index
    %c0_58 = arith.constant 0 : index
    %112 = vector.load %arg0[%c88, %c0_58] : memref<168x896xf32, #tpu.memory_space<vmem>>, vector<1x896xf32>
    %113 = arith.addf %111, %112 : vector<1x896xf32>
    %c0_59 = arith.constant 0 : index
    %c0_60 = arith.constant 0 : index
    %114 = vector.load %arg3[%c0_59, %c0_60] : memref<1x896xf32, #tpu.memory_space<vmem>>, vector<1x896xf32>
    tpu.vector_store %arg3[%c0_59, %c0_60], %113 {strides = array<i32>} : memref<1x896xf32, #tpu.memory_space<vmem>>, vector<1x896xf32>,
    return
  }
}

</mosaic_0001>

<bundles_post_ra>
// kernel: watermark_encoder_forward.1
= control target key start
LH: loop header
LB: loop body
LE: loop exit
PB: predicated region body
PF: predicated region fallthrough
CT: control target
= control target key end

     0   :  { %8 = vsyncpa [#allocation3], 0  ;;  %s3028_s15 = smov [#allocation2]   ;;  %s3029_s17 = smov 896   ;;  %s5494_s0 = inlined_call_operand.hbm [shape: f32[168,896], index: 0, kind: input, shape index: {}]   ;;  %s5495_s1 = inlined_call_operand.vmem [shape: f32[1,10], index: 1, kind: input, shape index: {}]   ;;  %s5496_s2 = inlined_call_operand.vmem [shape: f32[1,896], index: 2, kind: input, shape index: {}]   ;;  %s5497_s3 = inlined_call_operand.vmem [shape: f32[1,896], index: 3, kind: output, shape index: {}]  }
   0x1   :  { %s13_s14 = sshll.u32 %s5494_s0, 4  ;;  %s15_s16 = sshll.u32 %s3028_s15, 4  ;;  %s14_s14 = int_to_ptr.hbm [resolvable:$true] %s13_s14  ;;  %s16_s16 = int_to_ptr.vmem [resolvable:$true] %s15_s16 }
   0x2   :  { %s3030_s18 = smov 56  }
   0x3   :  { %21 = dma.hbm_to_vmem [thread:$0]  %s14_s14, 18816, %s16_s16, [#allocation3], %s3029_s17, %s3029_s17, %s3030_s18  }
   0x4   :  { %3026 = dma.done.wait [#allocation3], 18816  }
   0x5   :  { %3027 = vsyncadd [#allocation3], 4294948480  ;;  %vm68_vm0 = vcmask 1041408   ;;  %v38_v0 = vld [vmem:[#allocation2 + $0x38] sm:$0x3]  ;;  %v31_v2 = vld [vmem:[#allocation2] sm:$0xff] }
   0x6   :  { %v39_v1 = vld [vmem:[#allocation2 + $0x40] sm:$0x3]  ;;  %2894 = vmatpush.msk.msra.mxu0 %vm68_vm0, %v38_v0  ;;  %v32_v3 = vld [vmem:[#allocation2 + $0x8] sm:$0xff]  ;;  %vm64_vm1 = vcmask 80896   ;;  %v33_v6 = vld [vmem:[#allocation2 + $0x10] sm:$0xff]  ;;  %vm246_vm2 = vcmask 1040384  }
   0x7   :  { %2896 = vmatpush.msk.msra.mxu1 %vm68_vm0, %v39_v1  ;;  %v30_v4 = vld [vmem:[%s5495_s1] sm:$0x1]  ;;  %v40_v5 = vld [vmem:[#allocation2 + $0x48] sm:$0x3]  ;;  %v41_v7 = vld [vmem:[#allocation2 + $0x50] sm:$0x3]  ;;  %v5498_v1 = vlaneseq }
   0x8   :  { %2898 = vmatpush.msk.msra.mxu2 %vm68_vm0, %v40_v5  ;;  %105 = vmatpush.msra.mxu0 %v31_v2  ;;  %v42_v8 = vld [vmem:[#allocation2 + $0x58] sm:$0x3]  ;;  %v43_v10 = vld [vmem:[#allocation2 + $0x60] sm:$0x3]  ;;  %v36_v12 = vld [vmem:[#allocation2 + $0x28] sm:$0xff]  ;;  %s3031_s21 = smov 28  }
   0x9   :  { %125 = vmatpush.msra.mxu1 %v32_v3  ;;  %2895 = vmatmul.msk.f32.vlgmr.msra.gmra.mxu0 %vm64_vm1, %v30_v4  ;;  %v34_v9 = vld [vmem:[#allocation2 + $0x18] sm:$0xff]  ;;  %v35_v11 = vld [vmem:[#allocation2 + $0x20] sm:$0xff]  ;;  %v44_v13 = vld [vmem:[#allocation2 + $0x68] sm:$0x3]  ;;  %s3033_s22 = smov 72   ;;  %s3034_s23 = smov 126  }
   0xa   :  { %2897 = vmatmul.msk.f32.vlgmr.msra.gmra.mxu1 %vm64_vm1, %v30_v4  ;;  %145 = vmatpush.msra.mxu2 %v33_v6  ;;  %v37_v14 = vld [vmem:[#allocation2 + $0x30] sm:$0xff]  ;;  %v230_v18 = vld [vmem:[%s5496_s2] sm:$0xff]  ;;  %s3032_s2 = smov 100   ;;  %s3035_s24 = smov 127   ;;  %vm544_vm7 = vcmask 1043456   ;;  %vm552_vm8 = vcmask 1045504  }
   0xb   :  { %2900 = vmatpush.msk.msra.mxu3 %vm68_vm0, %v41_v7  ;;  %2899 = vmatmul.msk.f32.vlgmr.msra.gmra.mxu2 %vm64_vm1, %v30_v4  ;;  %v46_v15 = vld [vmem:[#allocation2 + $0x70] ss:$8 sm:$0xf]  ;;  %v232_v21 = vperm.slane %v230_v18, 0  ;;  %v233_v22 = vperm.slane %v230_v18, 1  ;;  %v234_v32 = vperm.slane %v230_v18, 2 }
   0xc   :  { %2902 = vmatpush.msk.msrb.mxu0 %vm68_vm0, %v42_v8  ;;  %2904 = vmatpush.msk.msrb.mxu1 %vm68_vm0, %v43_v10  ;;  %v47_v16 = vld [vmem:[#allocation2 + $0x70] ss:$8 sm:$0xf0]  ;;  %v353_v33 = vld [vmem:[#allocation2 + $0xaa] ss:$8 sm:$0xf] }
   0xd   :  { %165 = vmatpush.msra.mxu3 %v34_v9  ;;  %2906 = vmatpush.msk.msrb.mxu2 %vm68_vm0, %v44_v13  ;;  %v48_v17 = vor.u32 %v47_v16, %v46_v15  ;;  %v354_v34 = vld [vmem:[#allocation2 + $0xaa] ss:$8 sm:$0xf0]  ;;  %v235_v40 = vperm.slane %v230_v18, 3  ;;  %v238_v43 = vperm.slane %v230_v18, 6  ;;  %v236_v54 = vperm.slane %v230_v18, 4 }
   0xe   :  { %2901 = vmatmul.msk.f32.vlgmr.msra.gmra.mxu3 %vm64_vm1, %v30_v4  ;;  %185 = vmatpush.msrb.mxu0 %v35_v11  ;;  %v3103_v38 = vor.u32 %v354_v34, %v353_v33  ;;  %v237_v56 = vperm.slane %v230_v18, 5  ;;  %v449_v2 = vld [vmem:[#allocation2 + $0xac] ss:$8 sm:$0xf]  ;;  %v3179_v10 = vand.u32 127, %v5498_v1  ;;  %s3036_s25 = smov 1  }
   0xf   :  { %205 = vmatpush.msrb.mxu1 %v36_v12  ;;  %225 = vmatpush.msrb.mxu2 %v37_v14  ;;  %v50_v19 = vperm.slane %v48_v17, 0  ;;  %v51_v20 = vperm.slane %v48_v17, 1  ;;  %v52_v29 = vperm.slane %v48_v17, 2  ;;  %v53_v36 = vperm.slane %v48_v17, 3  ;;  %s3037_s26 = smov 2  }
  0x10   :  { %v56_v41 = vperm.slane %v48_v17, 6  ;;  %v363_v44 = vperm.slane %v3103_v38, 6  ;;  %v54_v49 = vperm.slane %v48_v17, 4  ;;  %v55_v50 = vperm.slane %v48_v17, 5 }
  0x11   :  { %2903 = vmatmul.msk.f32.vlgmr.msrb.gmra.mxu0 %vm64_vm1, %v30_v4  ;;  %v450_v3 = vld [vmem:[#allocation2 + $0xac] ss:$8 sm:$0xf0]  ;;  %v327_v5 = vld [vmem:[#allocation2 + $0xa9] ss:$8 sm:$0xf] }
  0x12   :  { %2905 = vmatmul.msk.f32.vlgmr.msrb.gmra.mxu1 %vm64_vm1, %v30_v4  ;;  %v328_v6 = vld [vmem:[#allocation2 + $0xa9] ss:$8 sm:$0xf0]  ;;  %v3176_v9 = vor.u32 %v450_v3, %v449_v2  ;;  %v279_v12 = vld [vmem:[#allocation2 + $0xa8] ss:$8 sm:$0xf] }
  0x13   :  { %2907 = vmatmul.msk.f32.vlgmr.msrb.gmra.mxu2 %vm64_vm1, %v30_v4  ;;  %v3181_v11 = vor.u32 %v328_v6, %v327_v5  ;;  %v280_v13 = vld [vmem:[#allocation2 + $0xa8] ss:$8 sm:$0xf0]  ;;  %vm318_vm3 = vcmp.lt.s32.totalorder %v3179_v10, 28  ;;  %vm440_vm4 = vcmp.lt.s32.totalorder %v3179_v10, 72  ;;  %vm270_vm5 = vcmp.lt.s32.totalorder %v3179_v10, 56 }
  0x14   :  { %v401_v14 = vld [vmem:[#allocation2 + $0xab] ss:$8 sm:$0xf]  ;;  %v453_v16 = vperm.slane %v3176_v9, 0  ;;  %vm392_vm6 = vcmp.lt.s32.totalorder %v3179_v10, 100  ;;  %vm849_vm9 = vcmp.lt.s32.totalorder %v3179_v10, 126 }
  0x15   :  { %v402_v15 = vld [vmem:[#allocation2 + $0xab] ss:$8 sm:$0xf0]  ;;  %v332_v17 = vperm.slane %v3181_v11, 1  ;;  %vm664_vm10 = vcmp.lt.s32.totalorder %v3179_v10, 1  ;;  %vm773_vm11 = vcmp.lt.s32.totalorder %v3179_v10, 127 }
  0x16   :  { %vm588_vm12 = vcmp.lt.s32.totalorder %v3179_v10, 2  ;;  %vm1081_vm13 = vcmask 408576   ;;  %vm1455_vm14 = vcmask 392192   ;;  %vm2875_vm15 = vcmask 1042434  }
  0x17   :  { %vm2878_vm1 = vcmask 1044484  }
  0x86   :  { %v107_v23 = vpop.f32.mrf.mxu0 }
  0x87   :  { %v127_v24 = vpop.f32.mrf.mxu1  ;;  %v108_v25 = vadd.f32 %v107_v23, %v50_v19 }
  0x88   :  { %v128_v26 = vadd.f32 %v127_v24, %v51_v20 }
  0x89   :  { %v3083_v27 = vsel %vm246_vm2, %v108_v25, %v232_v21  ;;  %v3195_v21 = vor.u32 %v280_v13, %v279_v12 }
  0x8a   :  { %v3086_v28 = vsel %vm246_vm2, %v128_v26, %v233_v22  ;;  %254 = vrot.lane.b32.xlu2 %v3083_v27, %s3030_s18  ;;  %v3197_v22 = vor.u32 %v402_v15, %v401_v14  ;;  %v456_v15 = vperm.slane %v3176_v9, 3 }
  0x8b   :  { %256 = vrot.lane.b32.xlu1 %v3086_v28, %s3030_s18  ;;  %306 = vrot.lane.b32.xlu0 %v3086_v28, %s3031_s21 }
  0x8e   :  { %v147_v30 = vpop.f32.mrf.mxu2  ;;  %v187_v51 = vpop.f32.mrf.mxu0 }
  0x8f   :  { %v148_v31 = vadd.f32 %v147_v30, %v52_v29  ;;  %v207_v52 = vpop.f32.mrf.mxu1  ;;  %v188_v53 = vadd.f32 %v187_v51, %v54_v49  ;;  %v406_v29 = vperm.slane %v3197_v22, 1  ;;  %v358_v30 = vperm.slane %v3103_v38, 1 }
  0x90   :  { %v208_v55 = vadd.f32 %v207_v52, %v55_v50  ;;  %v454_v50 = vperm.slane %v3176_v9, 1  ;;  %v455_v51 = vperm.slane %v3176_v9, 2 }
  0x91   :  { %v3101_v35 = vsel %vm246_vm2, %v148_v31, %v234_v32  ;;  %v167_v37 = vpop.f32.mrf.mxu3  ;;  %v3131_v57 = vsel %vm246_vm2, %v188_v53, %v236_v54  ;;  %v284_v32 = vperm.slane %v3195_v21, 1 }
  0x92   :  { %380 = vrot.lane.b32.xlu2 %v3086_v28, %s3032_s2  ;;  %v168_v39 = vadd.f32 %v167_v37, %v53_v36  ;;  %v3134_v58 = vsel %vm246_vm2, %v208_v55, %v237_v56  ;;  %v372_v37 = vmul.f32 %v358_v30, %v3086_v28 }
  0x93   :  { %378 = vrot.lane.b32.xlu1 %v3083_v27, %s3032_s2  ;;  %304 = vrot.lane.b32.xlu0 %v3083_v27, %s3031_s21 }
  0x94   :  { %v3113_v46 = vsel %vm246_vm2, %v168_v39, %v235_v40  ;;  %v503_v49 = vrot.slane %v372_v37, 4 }
  0x96   :  { %v227_v42 = vpop.f32.mrf.mxu2 }
  0x97   :  { %v228_v45 = vadd.f32 %v227_v42, %v56_v41 }
  0x99   :  { %v253_v47 = vsel %vm246_vm2, %v228_v45, %v238_v43  ;;  %v713_v43 = vld [vmem:[#allocation2 + $0xe2] ss:$8 sm:$0xf] }
  0x9a   :  { %428 = vrot.lane.b32.xlu2 %v3086_v28, %s3033_s22  ;;  %v3116_v48 = vmul.f32 %v363_v44, %v253_v47  ;;  %v714_v44 = vld [vmem:[#allocation2 + $0xe2] ss:$8 sm:$0xf0] }
  0x9b   :  { %426 = vrot.lane.b32.xlu1 %v3083_v27, %s3033_s22  ;;  %308 = vrot.lane.b32.xlu0 %v3101_v35, %s3031_s21  ;;  %v3234_v28 = vor.u32 %v714_v44, %v713_v43  ;;  %v458_v43 = vperm.slane %v3176_v9, 5 }
  0x9d   :  { %v718_v53 = vperm.slane %v3234_v28, 1 }
  0xa2   :  { %258 = vrot.lane.b32.xlu2 %v3101_v35, %s3030_s18 }
  0xa3   :  { %310 = vrot.lane.b32.xlu1 %v3113_v46, %s3031_s21  ;;  %384 = vrot.lane.b32.xlu0 %v3113_v46, %s3032_s2 }
  0xaa   :  { %260 = vrot.lane.b32.xlu2 %v3113_v46, %s3030_s18 }
  0xab   :  { %432 = vrot.lane.b32.xlu1 %v3113_v46, %s3033_s22  ;;  %430 = vrot.lane.b32.xlu0 %v3101_v35, %s3033_s22 }
  0xb2   :  { %382 = vrot.lane.b32.xlu2 %v3101_v35, %s3032_s2 }
  0xb3   :  { %386 = vrot.lane.b32.xlu1 %v3131_v57, %s3032_s2  ;;  %314 = vrot.lane.b32.xlu0 %v3134_v58, %s3031_s21 }
  0xba   :  { %434 = vrot.lane.b32.xlu2 %v3131_v57, %s3033_s22 }
  0xbb   :  { %262 = vrot.lane.b32.xlu1 %v3131_v57, %s3030_s18  ;;  %264 = vrot.lane.b32.xlu0 %v3134_v58, %s3030_s18 }
  0xc2   :  { %388 = vrot.lane.b32.xlu2 %v3134_v58, %s3032_s2 }
  0xc3   :  { %316 = vrot.lane.b32.xlu1 %v253_v47, %s3031_s21  ;;  %312 = vrot.lane.b32.xlu0 %v3131_v57, %s3031_s21 }
  0xca   :  { %438 = vrot.lane.b32.xlu2 %v253_v47, %s3033_s22 }
  0xcb   :  { %390 = vrot.lane.b32.xlu1 %v253_v47, %s3032_s2  ;;  %436 = vrot.lane.b32.xlu0 %v3134_v58, %s3033_s22 }
  0xd3   :  { %266 = vrot.lane.b32.xlu0 %v253_v47, %s3030_s18 }
  0xe4   :  { %v3158_v59 = vpop.permute.xlu2 %254 }
  0xec   :  { %v3160_v60 = vpop.permute.xlu2 %380 }
  0xf4   :  { %v3162_v61 = vpop.permute.xlu2 %428 }
  0xfc   :  { %v3168_v0 = vpop.permute.xlu2 %258 }
  0xfd   :  { %v3164_v62 = vpop.permute.xlu1 %256  ;;  %v3166_v63 = vpop.permute.xlu0 %306 }
  0xfe   :  { %v276_v33 = vsel %vm270_vm5, %v3158_v59, %v3164_v62 }
  0xff   :  { %v298_v41 = vmul.f32 %v284_v32, %v276_v33 }
 0x104   :  { %v3174_v8 = vpop.permute.xlu2 %260 }
 0x105   :  { %v3170_v4 = vpop.permute.xlu1 %378  ;;  %v3172_v7 = vpop.permute.xlu0 %304 }
 0x106   :  { %v324_v18 = vsel %vm318_vm3, %v3172_v7, %v3166_v63 }
 0x107   :  { %v346_v26 = vmul.f32 %v332_v17, %v324_v18  ;;  %v459_v18 = vperm.slane %v3176_v9, 6 }
 0x109   :  { %v482_v34 = vrot.slane %v346_v26, 6 }
 0x10b   :  { %v538_v45 = vsel %vm68_vm0, %v298_v41, %v482_v34  ;;  %v457_v41 = vperm.slane %v3176_v9, 4 }
 0x10c   :  { %v3203_v24 = vpop.permute.xlu2 %382  ;;  %v546_v52 = vsel %vm544_vm7, %v538_v45, %v503_v49  ;;  %v337_v49 = vperm.slane %v3181_v11, 6 }
 0x10d   :  { %v3191_v19 = vpop.permute.xlu1 %426  ;;  %v3193_v20 = vpop.permute.xlu0 %308  ;;  %v397_v31 = vsel %vm392_vm6, %v3160_v60, %v3203_v24 }
 0x10e   :  { %v446_v23 = vsel %vm440_vm4, %v3191_v19, %v3162_v61  ;;  %v420_v36 = vmul.f32 %v406_v29, %v397_v31 }
 0x10f   :  { %v3205_v25 = vmul.f32 %v453_v16, %v446_v23 }
 0x110   :  { %v524_v47 = vrot.slane %v420_v36, 2 }
 0x111   :  { %823 = vrot.lane.b32.xlu1 %v3205_v25, %s3034_s23  ;;  %747 = vrot.lane.b32.xlu0 %v3205_v25, %s3035_s24 }
 0x112   :  { %v3241_v54 = vsel %vm552_vm8, %v546_v52, %v524_v47 }
 0x113   :  { %v3253_v13 = vmul.f32 %v718_v53, %v3241_v54 }
 0x114   :  { %v435_v42 = vpop.permute.xlu2 %434 }
 0x115   :  { %v3225_v39 = vpop.permute.xlu1 %310  ;;  %v3227_v40 = vpop.permute.xlu0 %384  ;;  %5546 = vst [vmem:[#allocation5_spill] sm:$0xff] %v3253_v13  ;;  %v5499_v16 = vrot.slane %v3253_v13, 4 }
 0x119   :  { %638 = vrot.lane.b32.xlu1 %v3205_v25, %s3036_s25  ;;  %562 = vrot.lane.b32.xlu0 %v3205_v25, %s3037_s26 }
 0x11c   :  { %v3243_v2 = vpop.permute.xlu2 %388 }
 0x11d   :  { %v433_v55 = vpop.permute.xlu1 %432  ;;  %v431_v56 = vpop.permute.xlu0 %430 }
 0x11e   :  { %v444_v3 = vsel %vm440_vm4, %v431_v56, %v433_v55  ;;  %v445_v5 = vsel %vm440_vm4, %v3162_v61, %v431_v56  ;;  %v443_v17 = vsel %vm440_vm4, %v433_v55, %v435_v42  ;;  %v334_v55 = vperm.slane %v3181_v11, 3 }
 0x11f   :  { %v468_v6 = vmul.f32 %v454_v50, %v445_v5  ;;  %v3250_v12 = vmul.f32 %v455_v51, %v444_v3  ;;  %v3274_v31 = vmul.f32 %v456_v15, %v443_v17  ;;  %v322_v56 = vsel %vm318_vm3, %v3193_v20, %v3225_v39 }
 0x120   :  { %v411_v3 = vperm.slane %v3197_v22, 6  ;;  %v348_v15 = vmul.f32 %v334_v55, %v322_v56  ;;  %v408_v17 = vperm.slane %v3197_v22, 3 }
 0x121   :  { %827 = vrot.lane.b32.xlu2 %v468_v6, %s3034_s23  ;;  %646 = vrot.lane.b32.xlu0 %v3250_v12, %s3036_s25  ;;  %v739_v14 = vmul.f32 %v718_v53, %v468_v6  ;;  %v333_v53 = vperm.slane %v3181_v11, 2 }
 0x122   :  { %831 = vrot.lane.b32.xlu1 %v3250_v12, %s3034_s23 }
 0x123   :  { %v969_v61 = vrot.slane %v739_v14, 4 }
 0x124   :  { %v439_v30 = vpop.permute.xlu2 %438 }
 0x125   :  { %v3265_v23 = vpop.permute.xlu1 %386  ;;  %v3267_v26 = vpop.permute.xlu0 %314  ;;  %v3272_v29 = vsel %vm544_vm7, %v5499_v16, %v969_v61  ;;  %v447_v32 = vsel %vm440_vm4, %v439_v30, %v3191_v19  ;;  %v407_v61 = vperm.slane %v3197_v22, 2 }
 0x126   :  { %v3279_v33 = vmul.f32 %v459_v18, %v447_v32  ;;  %v360_v18 = vperm.slane %v3103_v38, 3  ;;  %v395_v32 = vsel %vm392_vm6, %v3227_v40, %v3265_v23 }
 0x127   :  { %v422_v56 = vmul.f32 %v408_v17, %v395_v32  ;;  %v336_v32 = vperm.slane %v3181_v11, 5 }
 0x129   :  { %751 = vrot.lane.b32.xlu2 %v468_v6, %s3035_s24  ;;  %759 = vrot.lane.b32.xlu0 %v3274_v31, %s3035_s24 }
 0x12a   :  { %755 = vrot.lane.b32.xlu1 %v3250_v12, %s3035_s24 }
 0x12d   :  { %v3286_v34 = vpop.permute.xlu1 %262  ;;  %v3288_v36 = vpop.permute.xlu0 %264 }
 0x131   :  { %570 = vrot.lane.b32.xlu2 %v3250_v12, %s3037_s26 }
 0x132   :  { %642 = vrot.lane.b32.xlu1 %v468_v6, %s3036_s25 }
 0x135   :  { %v3293_v19 = vpop.permute.xlu1 %316  ;;  %v3295_v37 = vpop.permute.xlu0 %312 }
 0x136   :  { %v319_v9 = vsel %vm318_vm3, %v3267_v26, %v3293_v19 }
 0x139   :  { %835 = vrot.lane.b32.xlu2 %v3274_v31, %s3034_s23 }
 0x13a   :  { %566 = vrot.lane.b32.xlu1 %v468_v6, %s3037_s26  ;;  %v351_v6 = vmul.f32 %v337_v49, %v319_v9  ;;  %v484_v9 = vrot.slane %v348_v15, 6 }
 0x13d   :  { %v437_v44 = vpop.permute.xlu0 %436  ;;  %v3307_v50 = vpop.permute.xlu1 %390 }
 0x13e   :  { %v441_v45 = vsel %vm440_vm4, %v437_v44, %v439_v30  ;;  %v442_v47 = vsel %vm440_vm4, %v435_v42, %v437_v44  ;;  %v323_v42 = vsel %vm318_vm3, %v3166_v63, %v3193_v20  ;;  %v399_v5 = vsel %vm392_vm6, %v3307_v50, %v3170_v4 }
 0x13f   :  { %v3309_v51 = vmul.f32 %v457_v41, %v442_v47  ;;  %v3311_v52 = vmul.f32 %v458_v43, %v441_v45  ;;  %v359_v63 = vperm.slane %v3103_v38, 2  ;;  %v289_v20 = vperm.slane %v3195_v21, 6 }
 0x140   :  { %v347_v14 = vmul.f32 %v333_v53, %v323_v42  ;;  %v396_v30 = vsel %vm392_vm6, %v3203_v24, %v3227_v40  ;;  %v425_v41 = vmul.f32 %v411_v3, %v399_v5  ;;  %v508_v44 = vrot.slane %v3116_v48, 4 }
 0x141   :  { %825 = vrot.lane.b32.xlu2 %v3241_v54, %s3034_s23  ;;  %839 = vrot.lane.b32.xlu0 %v3309_v51, %s3034_s23  ;;  %v285_v45 = vperm.slane %v3195_v21, 2  ;;  %v286_v47 = vperm.slane %v3195_v21, 3  ;;  %v275_v24 = vsel %vm270_vm5, %v3164_v62, %v3168_v0  ;;  %v274_v40 = vsel %vm270_vm5, %v3168_v0, %v3174_v8 }
 0x142   :  { %763 = vrot.lane.b32.xlu1 %v3309_v51, %s3035_s24  ;;  %v487_v48 = vrot.slane %v351_v6, 6  ;;  %v483_v55 = vrot.slane %v347_v14, 6  ;;  %v421_v42 = vmul.f32 %v407_v61, %v396_v30  ;;  %v373_v3 = vmul.f32 %v359_v63, %v3101_v35 }
 0x143   :  { %v374_v5 = vmul.f32 %v360_v18, %v3113_v46  ;;  %v529_v1 = vrot.slane %v425_v41, 2  ;;  %v299_v62 = vmul.f32 %v285_v45, %v275_v24  ;;  %v300_v0 = vmul.f32 %v286_v47, %v274_v40 }
 0x144   :  { %v526_v14 = vrot.slane %v422_v56, 2  ;;  %v504_v15 = vrot.slane %v373_v3, 4  ;;  %v320_v41 = vsel %vm318_vm3, %v3295_v37, %v3267_v26  ;;  %v361_v45 = vperm.slane %v3103_v38, 4 }
 0x145   :  { %v3351_v43 = vpop.permute.xlu0 %266  ;;  %v539_v46 = vsel %vm68_vm0, %v299_v62, %v483_v55  ;;  %v540_v63 = vsel %vm68_vm0, %v300_v0, %v484_v9  ;;  %v505_v61 = vrot.slane %v374_v5, 4  ;;  %v273_v47 = vsel %vm270_vm5, %v3174_v8, %v3286_v34 }
 0x146   :  { %v271_v49 = vsel %vm270_vm5, %v3288_v36, %v3351_v43  ;;  %v547_v18 = vsel %vm544_vm7, %v539_v46, %v504_v15  ;;  %v410_v24 = vperm.slane %v3197_v22, 5  ;;  %v362_v40 = vperm.slane %v3103_v38, 5 }
 0x147   :  { %v303_v53 = vmul.f32 %v289_v20, %v271_v49  ;;  %v525_v20 = vrot.slane %v421_v42, 2  ;;  %v548_v17 = vsel %vm544_vm7, %v540_v63, %v505_v61  ;;  %v350_v49 = vmul.f32 %v336_v32, %v320_v41 }
 0x148   :  { %v3386_v30 = vsel %vm552_vm8, %v548_v17, %v526_v14  ;;  %v409_v26 = vperm.slane %v3197_v22, 4  ;;  %v394_v8 = vsel %vm392_vm6, %v3265_v23, %v3243_v2  ;;  %v288_v55 = vperm.slane %v3195_v21, 5 }
 0x149   :  { %v543_v16 = vsel %vm68_vm0, %v303_v53, %v487_v48  ;;  %564 = vrot.lane.b32.xlu2 %v3241_v54, %s3037_s26  ;;  %640 = vrot.lane.b32.xlu0 %v3241_v54, %s3036_s25  ;;  %v393_v48 = vsel %vm392_vm6, %v3243_v2, %v3307_v50  ;;  %v375_v53 = vmul.f32 %v361_v45, %v3131_v57  ;;  %v486_v56 = vrot.slane %v350_v49, 6 }
 0x14a   :  { %749 = vrot.lane.b32.xlu1 %v3241_v54, %s3035_s24  ;;  %v551_v6 = vsel %vm544_vm7, %v543_v16, %v508_v44  ;;  %v3389_v54 = vsel %vm552_vm8, %v547_v18, %v525_v20  ;;  %v321_v16 = vsel %vm318_vm3, %v3225_v39, %v3295_v37  ;;  %v287_v39 = vperm.slane %v3195_v21, 4 }
 0x14b   :  { %v3379_v35 = vsel %vm552_vm8, %v551_v6, %v529_v1  ;;  %v335_v1 = vperm.slane %v3181_v11, 4  ;;  %v272_v42 = vsel %vm270_vm5, %v3286_v34, %v3288_v36  ;;  %v424_v3 = vmul.f32 %v410_v24, %v393_v48 }
 0x14c   :  { %v301_v9 = vmul.f32 %v287_v39, %v273_v47  ;;  %v376_v57 = vmul.f32 %v362_v40, %v3134_v58  ;;  %v423_v50 = vmul.f32 %v409_v26, %v394_v8  ;;  %v506_v23 = vrot.slane %v375_v53, 4 }
 0x14d   :  { %v349_v44 = vmul.f32 %v335_v1, %v321_v16  ;;  %v302_v5 = vmul.f32 %v288_v55, %v272_v42  ;;  %v528_v36 = vrot.slane %v424_v3, 2  ;;  %v331_v63 = vperm.slane %v3181_v11, 0 }
 0x14e   :  { %v507_v0 = vrot.slane %v376_v57, 4  ;;  %v527_v6 = vrot.slane %v423_v50, 2  ;;  %v325_v14 = vsel %vm318_vm3, %v3293_v19, %v3172_v7  ;;  %v283_v15 = vperm.slane %v3195_v21, 0 }
 0x14f   :  { %v485_v37 = vrot.slane %v349_v44, 6  ;;  %v542_v34 = vsel %vm68_vm0, %v302_v5, %v486_v56  ;;  %v357_v11 = vperm.slane %v3103_v38, 0  ;;  %v277_v61 = vsel %vm270_vm5, %v3351_v43, %v3158_v59  ;;  %v866_v43 = vld [vmem:[#allocation2 + $0xe4] ss:$8 sm:$0xf0] }
 0x150   :  { %v550_v58 = vsel %vm544_vm7, %v542_v34, %v507_v0  ;;  %v345_v17 = vmul.f32 %v331_v63, %v325_v14  ;;  %v405_v18 = vperm.slane %v3197_v22, 0  ;;  %v297_v1 = vmul.f32 %v283_v15, %v277_v61 }
 0x151   :  { %757 = vrot.lane.b32.xlu2 %v3386_v30, %s3035_s24  ;;  %753 = vrot.lane.b32.xlu0 %v3389_v54, %s3035_s24  ;;  %v541_v2 = vsel %vm68_vm0, %v301_v9, %v485_v37  ;;  %v3456_v20 = vsel %vm552_vm8, %v550_v58, %v528_v36  ;;  %v371_v16 = vmul.f32 %v357_v11, %v3083_v27 }
 0x152   :  { %833 = vrot.lane.b32.xlu1 %v3386_v30, %s3034_s23  ;;  %v549_v62 = vsel %vm544_vm7, %v541_v2, %v506_v23  ;;  %v398_v7 = vsel %vm392_vm6, %v3170_v4, %v3160_v60  ;;  %v481_v19 = vrot.slane %v345_v17, 6  ;;  %v865_v4 = vld [vmem:[#allocation2 + $0xe4] ss:$8 sm:$0xf] }
 0x153   :  { %v3447_v46 = vsel %vm552_vm8, %v549_v62, %v527_v6  ;;  %v419_v38 = vmul.f32 %v405_v18, %v398_v7  ;;  %v502_v21 = vrot.slane %v371_v16, 4  ;;  %v3493_v41 = vor.u32 %v866_v43, %v865_v4  ;;  %v681_v16 = vld [vmem:[#allocation2 + $0xe1] ss:$8 sm:$0xf0] }
 0x154   :  { %v537_v59 = vsel %vm68_vm0, %v297_v1, %v481_v19  ;;  %v680_v1 = vld [vmem:[#allocation2 + $0xe1] ss:$8 sm:$0xf]  ;;  %v789_v7 = vld [vmem:[#allocation2 + $0xe3] ss:$8 sm:$0xf] }
 0x155   :  { %v545_v27 = vsel %vm544_vm7, %v537_v59, %v502_v21  ;;  %v523_v22 = vrot.slane %v419_v38, 2  ;;  %v5500_v44 = vperm.slane %v3493_v41, 0  ;;  %v5503_v37 = vperm.slane %v3493_v41, 1  ;;  %v790_v19 = vld [vmem:[#allocation2 + $0xe3] ss:$8 sm:$0xf0] }
 0x156   :  { %v5502_v48 = vperm.slane %v3493_v41, 2  ;;  %v5501_v0 = vperm.slane %v3493_v41, 3  ;;  %v3600_v38 = vor.u32 %v681_v16, %v680_v1 }
 0x157   :  { %v3489_v60 = vsel %vm552_vm8, %v545_v27, %v523_v22  ;;  %v3605_v27 = vor.u32 %v790_v19, %v789_v7 }
 0x159   :  { %644 = vrot.lane.b32.xlu2 %v3389_v54, %s3036_s25  ;;  %829 = vrot.lane.b32.xlu0 %v3389_v54, %s3034_s23 }
 0x15a   :  { %586 = vrot.lane.b32.xlu1 %v3279_v33, %s3037_s26 }
 0x161   :  { %648 = vrot.lane.b32.xlu2 %v3386_v30, %s3036_s25  ;;  %568 = vrot.lane.b32.xlu0 %v3389_v54, %s3037_s26 }
 0x162   :  { %843 = vrot.lane.b32.xlu1 %v3311_v52, %s3034_s23 }
 0x169   :  { %771 = vrot.lane.b32.xlu2 %v3279_v33, %s3035_s24  ;;  %761 = vrot.lane.b32.xlu0 %v3447_v46, %s3035_s24 }
 0x16a   :  { %656 = vrot.lane.b32.xlu1 %v3456_v20, %s3036_s25 }
 0x171   :  { %837 = vrot.lane.b32.xlu0 %v3447_v46, %s3034_s23  ;;  %658 = vrot.lane.b32.xlu2 %v3311_v52, %s3036_s25 }
 0x172   :  { %841 = vrot.lane.b32.xlu1 %v3456_v20, %s3034_s23 }
 0x179   :  { %662 = vrot.lane.b32.xlu0 %v3279_v33, %s3036_s25  ;;  %765 = vrot.lane.b32.xlu2 %v3456_v20, %s3035_s24 }
 0x17a   :  { %821 = vrot.lane.b32.xlu1 %v3489_v60, %s3034_s23 }
 0x17b   :  { %v828_v32 = vpop.permute.xlu2 %827 }
 0x181   :  { %847 = vrot.lane.b32.xlu0 %v3279_v33, %s3034_s23  ;;  %745 = vrot.lane.b32.xlu2 %v3489_v60, %s3035_s24 }
 0x182   :  { %652 = vrot.lane.b32.xlu1 %v3447_v46, %s3036_s25 }
 0x183   :  { %v3503_v45 = vpop.permute.xlu1 %823  ;;  %v3505_v39 = vpop.permute.xlu2 %751 }
 0x184   :  { %v861_v47 = vsel %vm849_vm9, %v3503_v45, %v828_v32  ;;  %v3523_v26 = vpop.permute.xlu0 %747 }
 0x185   :  { %v890_v49 = vmul.f32 %v5500_v44, %v861_v47  ;;  %v795_v47 = vperm.slane %v3605_v27, 2 }
 0x187   :  { %2908 = vmatpush.msk.msrb.mxu3 %vm68_vm0, %v890_v49 }
 0x189   :  { %767 = vrot.lane.b32.xlu0 %v3311_v52, %s3035_s24  ;;  %654 = vrot.lane.b32.xlu2 %v3309_v51, %s3036_s25 }
 0x18a   :  { %560 = vrot.lane.b32.xlu1 %v3489_v60, %s3037_s26 }
 0x18b   :  { %v3519_v24 = vpop.permute.xlu1 %638  ;;  %v3521_v40 = vpop.permute.xlu2 %570 }
 0x18c   :  { %v3541_v3 = vpop.permute.xlu0 %562 }
 0x191   :  { %636 = vrot.lane.b32.xlu0 %v3489_v60, %s3036_s25  ;;  %660 = vrot.lane.b32.xlu2 %v3379_v35, %s3036_s25 }
 0x192   :  { %769 = vrot.lane.b32.xlu1 %v3379_v35, %s3035_s24 }
 0x193   :  { %v836_v53 = vpop.permute.xlu2 %835 }
 0x194   :  { %v832_v8 = vpop.permute.xlu1 %831  ;;  %v3553_v2 = vpop.permute.xlu0 %646 }
 0x195   :  { %v857_v55 = vsel %vm849_vm9, %v832_v8, %v836_v53  ;;  %v859_v9 = vsel %vm849_vm9, %v828_v32, %v832_v8  ;;  %5547 = vst [vmem:[#allocation6_spill] sm:$0xff] %v3553_v2  ;;  %v794_v32 = vperm.slane %v3605_v27, 1 }
 0x196   :  { %v891_v42 = vmul.f32 %v5503_v37, %v859_v9  ;;  %v892_v56 = vmul.f32 %v5502_v48, %v857_v55  ;;  %v686_v55 = vperm.slane %v3600_v38, 2  ;;  %v719_v9 = vperm.slane %v3234_v28, 2 }
 0x198   :  { %2911 = vmatpush.msk.msra.mxu0 %vm68_vm0, %v891_v42  ;;  %2914 = vmatpush.msk.msra.mxu1 %vm68_vm0, %v892_v56  ;;  %v604_v56 = vld [vmem:[#allocation2 + $0xe0] ss:$8 sm:$0xf]  ;;  %v740_v16 = vmul.f32 %v719_v9, %v3250_v12  ;;  %v733_v48 = vmul.f32 %v719_v9, %v3389_v54 }
 0x199   :  { %650 = vrot.lane.b32.xlu0 %v3274_v31, %s3036_s25  ;;  %584 = vrot.lane.b32.xlu2 %v3379_v35, %s3037_s26 }
 0x19a   :  { %574 = vrot.lane.b32.xlu1 %v3274_v31, %s3037_s26  ;;  %v971_v54 = vrot.slane %v740_v16, 4 }
 0x19b   :  { %v3551_v57 = vpop.permute.xlu2 %825 }
 0x19c   :  { %v756_v50 = vpop.permute.xlu1 %755  ;;  %v3569_v34 = vpop.permute.xlu0 %759 }
 0x19d   :  { %v781_v8 = vsel %vm773_vm11, %v756_v50, %v3569_v34 }
 0x19e   :  { %v816_v19 = vmul.f32 %v795_v47, %v781_v8 }
 0x1a1   :  { %582 = vrot.lane.b32.xlu0 %v3311_v52, %s3037_s26  ;;  %845 = vrot.lane.b32.xlu2 %v3379_v35, %s3034_s23 }
 0x1a2   :  { %572 = vrot.lane.b32.xlu1 %v3386_v30, %s3037_s26 }
 0x1a3   :  { %v3561_v23 = vpop.permute.xlu2 %564 }
 0x1a4   :  { %v3563_v5 = vpop.permute.xlu1 %642 }
 0x1a5   :  { %v674_v42 = vsel %vm664_vm10, %v3563_v5, %v3553_v2 }
 0x1a9   :  { %580 = vrot.lane.b32.xlu0 %v3456_v20, %s3037_s26  ;;  %578 = vrot.lane.b32.xlu2 %v3309_v51, %s3037_s26 }
 0x1ab   :  { %v3571_v36 = vpop.permute.xlu2 %757 }
 0x1ac   :  { %v3573_v62 = vpop.permute.xlu1 %566 }
 0x1b1   :  { %576 = vrot.lane.b32.xlu2 %v3447_v46, %s3037_s26 }
 0x1b3   :  { %v645_v6 = vpop.permute.xlu2 %644  ;;  %v3578_v58 = vpop.permute.xlu0 %839 }
 0x1b4   :  { %v3580_v63 = vpop.permute.xlu1 %763  ;;  %v855_v14 = vsel %vm849_vm9, %v836_v53, %v3578_v58  ;;  %v783_v53 = vsel %vm773_vm11, %v3505_v39, %v756_v50 }
 0x1b5   :  { %v893_v15 = vmul.f32 %v5501_v0, %v855_v14  ;;  %v605_v14 = vld [vmem:[#allocation2 + $0xe0] ss:$8 sm:$0xf0]  ;;  %v815_v7 = vmul.f32 %v794_v32, %v783_v53 }
 0x1b6   :  { %v3633_v50 = vor.u32 %v605_v14, %v604_v56 }
 0x1b7   :  { %2917 = vmatpush.msk.msra.mxu2 %vm68_vm0, %v893_v15  ;;  %v1018_v8 = vrot.slane %v815_v7, 2 }
 0x1b8   :  { %v610_v56 = vperm.slane %v3633_v50, 2 }
 0x1bb   :  { %v3589_v11 = vpop.permute.xlu2 %648  ;;  %v3591_v61 = vpop.permute.xlu0 %640 }
 0x1bc   :  { %v3596_v17 = vsel %vm664_vm10, %v645_v6, %v3589_v11  ;;  %v3598_v18 = vpop.permute.xlu1 %749  ;;  %v673_v49 = vsel %vm664_vm10, %v3591_v61, %v645_v6 }
 0x1bd   :  { %v700_v1 = vmul.f32 %v686_v55, %v673_v49  ;;  %v5549_v49 = vperm.slane %v3493_v41, 2 }
 0x1c3   :  { %v3602_v59 = vpop.permute.xlu2 %771  ;;  %v754_v21 = vpop.permute.xlu0 %753 }
 0x1c4   :  { %v3607_v22 = vpop.permute.xlu1 %833  ;;  %v780_v4 = vsel %vm773_vm11, %v754_v21, %v3571_v36  ;;  %v782_v43 = vsel %vm773_vm11, %v3598_v18, %v754_v21  ;;  %v707_v21 = vmul.f32 %v686_v55, %v674_v42  ;;  %v1020_v55 = vrot.slane %v816_v19, 2 }
 0x1c5   :  { %v808_v6 = vmul.f32 %v794_v32, %v782_v43  ;;  %v809_v15 = vmul.f32 %v795_v47, %v780_v4  ;;  %v913_v43 = vrot.slane %v700_v1, 6  ;;  %v5548_v32 = vperm.slane %v3493_v41, 1 }
 0x1c6   :  { %v922_v9 = vrot.slane %v707_v21, 6  ;;  %v962_v42 = vrot.slane %v733_v48, 4 }
 0x1c7   :  { %v1010_v37 = vrot.slane %v808_v6, 2  ;;  %v1011_v13 = vrot.slane %v809_v15, 2  ;;  %v598_v6 = vsel %vm588_vm12, %v3573_v62, %v3521_v40 }
 0x1c8   :  { %v972_v15 = vsel %vm544_vm7, %v962_v42, %v971_v54  ;;  %v923_v1 = vsel %vm68_vm0, %v913_v43, %v922_v9  ;;  %v631_v21 = vmul.f32 %v610_v56, %v598_v6  ;;  %v796_v54 = vperm.slane %v3605_v27, 3 }
 0x1c9   :  { %v1021_v14 = vsel %vm552_vm8, %v1011_v13, %v1020_v55  ;;  %v1059_v48 = vsel %vm552_vm8, %v3272_v29, %v1010_v37  ;;  %v1060_v16 = vsel %vm552_vm8, %v972_v15, %v1011_v13  ;;  %v5550_v15 = vperm.slane %v3493_v41, 3 }
 0x1ca   :  { %v1046_v29 = vsel %vm68_vm0, %v631_v21, %v913_v43  ;;  %v779_v43 = vsel %vm773_vm11, %v3569_v34, %v3580_v63 }
 0x1cb   :  { %v3635_v44 = vpop.permute.xlu2 %658  ;;  %v830_v0 = vpop.permute.xlu0 %829 }
 0x1cc   :  { %v3638_v2 = vpop.permute.xlu1 %586  ;;  %v856_v4 = vsel %vm849_vm9, %v830_v0, %v3607_v22  ;;  %v858_v12 = vsel %vm849_vm9, %v3551_v57, %v830_v0  ;;  %v1019_v0 = vsel %vm552_vm8, %v1010_v37, %v1018_v8  ;;  %v720_v8 = vperm.slane %v3234_v28, 3 }
 0x1cd   :  { %v884_v47 = vmul.f32 %v5548_v32, %v858_v12  ;;  %v885_v53 = vmul.f32 %v5549_v49, %v856_v4  ;;  %v1053_v32 = vsel %vm544_vm7, %v923_v1, %v962_v42  ;;  %v817_v42 = vmul.f32 %v796_v54, %v779_v43 }
 0x1ce   :  { %v3692_v9 = vmul.f32 %v720_v8, %v3386_v30 }
 0x1cf   :  { %1142 = vmatpush.msra.mxu0 %v884_v47  ;;  %1165 = vmatpush.msra.mxu1 %v885_v53 }
 0x1d0   :  { %v5507_v30 = vrot.slane %v3692_v9, 4 }
 0x1d1   :  { %1143 = vmatpush.msra.mxu0 %v1019_v0  ;;  %1166 = vmatpush.msra.mxu1 %v1021_v14 }
 0x1d3   :  { %v3663_v7 = vpop.permute.xlu2 %765  ;;  %1144 = vmatpush.msra.mxu0 %v1059_v48  ;;  %1167 = vmatpush.msra.mxu1 %v1060_v16  ;;  %v3665_v19 = vpop.permute.xlu0 %568  ;;  %v1022_v48 = vrot.slane %v817_v42, 2 }
 0x1d4   :  { %v3667_v4 = vpop.permute.xlu1 %843  ;;  %v597_v12 = vsel %vm588_vm12, %v3561_v23, %v3665_v19 }
 0x1d5   :  { %1168 = vmatpush.msra.mxu1 %v1053_v32  ;;  %v624_v13 = vmul.f32 %v610_v56, %v597_v12  ;;  %v717_v32 = vperm.slane %v3234_v28, 0 }
 0x1d7   :  { %1169 = vmatpush.msra.mxu1 %v1046_v29 }
 0x1d9   :  { %1170 = vmatpush.msra.mxu1 %v624_v13 }
 0x1db   :  { %v3675_v37 = vpop.permute.xlu0 %761  ;;  %v3677_v47 = vpop.permute.xlu2 %745 }
 0x1dc   :  { %v3679_v49 = vpop.permute.xlu1 %656  ;;  %v778_v53 = vsel %vm773_vm11, %v3571_v36, %v3675_v37  ;;  %v741_v36 = vmul.f32 %v720_v8, %v3274_v31  ;;  %v784_v16 = vsel %vm773_vm11, %v3677_v47, %v3598_v18  ;;  %v793_v31 = vperm.slane %v3605_v27, 0 }
 0x1dd   :  { %v810_v55 = vmul.f32 %v796_v54, %v778_v53  ;;  %v3724_v53 = vmul.f32 %v717_v32, %v3489_v60 }
 0x1de   :  { %v973_v21 = vrot.slane %v741_v36, 4  ;;  %v807_v29 = vmul.f32 %v793_v31, %v784_v16 }
 0x1df   :  { %v1012_v14 = vrot.slane %v810_v55, 2  ;;  %v738_v55 = vmul.f32 %v717_v32, %v3205_v25  ;;  %v5508_v60 = vrot.slane %v3724_v53, 4 }
 0x1e0   :  { %v974_v13 = vsel %vm544_vm7, %v5507_v30, %v973_v21  ;;  %v1009_v42 = vrot.slane %v807_v29, 2 }
 0x1e1   :  { %v1023_v12 = vsel %vm552_vm8, %v1012_v14, %v1022_v48  ;;  %v1061_v18 = vsel %vm552_vm8, %v974_v13, %v1012_v14  ;;  %v689_v48 = vperm.slane %v3600_v38, 5  ;;  %v967_v16 = vrot.slane %v738_v55, 4 }
 0x1e2   :  { %v723_v13 = vperm.slane %v3234_v28, 6 }
 0x1e3   :  { %v3694_v56 = vpop.permute.xlu0 %837  ;;  %v3696_v0 = vpop.permute.xlu2 %654  ;;  %v968_v21 = vsel %vm544_vm7, %v5508_v60, %v967_v16 }
 0x1e4   :  { %v3699_v6 = vpop.permute.xlu1 %841  ;;  %v854_v34 = vsel %vm849_vm9, %v3607_v22, %v3694_v56  ;;  %v785_v22 = vsel %vm773_vm11, %v3523_v26, %v3505_v39  ;;  %v668_v25 = vsel %vm664_vm10, %v3696_v0, %v3635_v44  ;;  %v1058_v29 = vsel %vm552_vm8, %v968_v21, %v1009_v42 }
 0x1e5   :  { %v886_v1 = vmul.f32 %v5550_v15, %v854_v34  ;;  %v814_v54 = vmul.f32 %v793_v31, %v785_v22  ;;  %v5551_v34 = vperm.slane %v3493_v41, 0  ;;  %v875_v31 = vperm.slane %v3493_v41, 6 }
 0x1e6   :  { %v722_v22 = vperm.slane %v3234_v28, 5  ;;  %v3786_v21 = vmul.f32 %v723_v13, %v3379_v35 }
 0x1e7   :  { %1188 = vmatpush.msra.mxu2 %v886_v1  ;;  %v1016_v15 = vrot.slane %v814_v54, 2  ;;  %v3737_v1 = vld [vmem:[#allocation2 + $0x2a0] sm:$0xff]  ;;  %v710_v54 = vmul.f32 %v689_v48, %v668_v25 }
 0x1e8   :  { %2915 = vmatmul.msk.f32.vlgmr.msra.gmra.mxu1 %vm1081_vm13, %v3737_v1 }
 0x1e9   :  { %1189 = vmatpush.msra.mxu2 %v1023_v12  ;;  %v928_v25 = vrot.slane %v710_v54, 6 }
 0x1eb   :  { %1190 = vmatpush.msra.mxu2 %v1061_v18  ;;  %v3726_v43 = vpop.permute.xlu0 %662  ;;  %v3728_v39 = vpop.permute.xlu2 %660  ;;  %v721_v18 = vperm.slane %v3234_v28, 4  ;;  %v3774_v28 = vld [vmem:[#allocation2 + $0x2d8] sm:$0xff] }
 0x1ec   :  { %v822_v8 = vpop.permute.xlu1 %821  ;;  %v666_v35 = vsel %vm664_vm10, %v3635_v44, %v3726_v43  ;;  %v3819_v44 = vmul.f32 %v722_v22, %v3311_v52 }
 0x1ed   :  { %v860_v36 = vsel %vm849_vm9, %v822_v8, %v3551_v57  ;;  %v1017_v57 = vsel %vm552_vm8, %v1009_v42, %v1016_v15  ;;  %v3779_v16 = vmul.f32 %v721_v18, %v3447_v46  ;;  %v799_v46 = vperm.slane %v3605_v27, 6 }
 0x1ee   :  { %v883_v14 = vmul.f32 %v5551_v34, %v860_v36  ;;  %v3766_v34 = vmul.f32 %v722_v22, %v3456_v20  ;;  %v3782_v20 = vmul.f32 %v721_v18, %v3309_v51  ;;  %v690_v51 = vperm.slane %v3600_v38, 6 }
 0x1ef   :  { %v676_v18 = vsel %vm664_vm10, %v3519_v24, %v3563_v5 }
 0x1f0   :  { %1119 = vmatpush.msrb.mxu3 %v883_v14  ;;  %2916 = vmatmul.msk.f32.gmra.mxu1 %vm1081_vm13, %v3774_v28 }
 0x1f2   :  { %1120 = vmatpush.msrb.mxu3 %v1017_v57 }
 0x1f3   :  { %v3752_v12 = vpop.permute.xlu0 %847  ;;  %v3754_v32 = vpop.permute.xlu2 %584 }
 0x1f4   :  { %v863_v55 = vsel %vm849_vm9, %v3752_v12, %v3503_v45  ;;  %v3763_v36 = vpop.permute.xlu1 %652  ;;  %1121 = vmatpush.msrb.mxu3 %v1058_v29  ;;  %v744_v45 = vmul.f32 %v723_v13, %v3279_v33  ;;  %v685_v29 = vperm.slane %v3600_v38, 1  ;;  %v665_v13 = vsel %vm664_vm10, %v3679_v49, %v3728_v39 }
 0x1f5   :  { %v896_v14 = vmul.f32 %v875_v31, %v863_v55  ;;  %v667_v42 = vsel %vm664_vm10, %v3763_v36, %v3679_v49  ;;  %v787_v55 = vsel %vm773_vm11, %v3602_v59, %v3523_v26  ;;  %v966_v26 = vrot.slane %v3786_v21, 4 }
 0x1f6   :  { %v3772_v15 = vmul.f32 %v689_v48, %v667_v42  ;;  %v5509_v48 = vrot.slane %v3766_v34, 4  ;;  %v706_v60 = vmul.f32 %v685_v29, %v676_v18  ;;  %v711_v33 = vmul.f32 %v690_v51, %v666_v35 }
 0x1f7   :  { %2926 = vmatpush.msk.msrb.mxu1 %vm68_vm0, %v896_v14  ;;  %v3833_v52 = vmul.f32 %v690_v51, %v665_v13  ;;  %v608_v21 = vperm.slane %v3633_v50, 0  ;;  %v684_v51 = vperm.slane %v3600_v38, 0  ;;  %v602_v35 = vsel %vm588_vm12, %v3638_v2, %v3541_v3 }
 0x1f8   :  { %5552 = vst [vmem:[#allocation7_spill] sm:$0xff] %v3772_v15  ;;  %v5506_v57 = vrot.slane %v3772_v15, 6  ;;  %v853_v13 = vsel %vm849_vm9, %v3578_v58, %v3667_v4 }
 0x1fa   :  { %v929_v54 = vsel %vm68_vm0, %v5506_v57, %v928_v25  ;;  %v979_v57 = vrot.slane %v744_v45, 4  ;;  %v600_v45 = vsel %vm588_vm12, %v3541_v3, %v3573_v62 }
 0x1fb   :  { %v3814_v5 = vpop.permute.xlu0 %767  ;;  %v3816_v14 = vpop.permute.xlu2 %845  ;;  %v3824_v49 = vsel %vm544_vm7, %v929_v54, %v5509_v48  ;;  %v609_v54 = vperm.slane %v3633_v50, 1  ;;  %v5554_v48 = vperm.slane %v3600_v38, 3 }
 0x1fc   :  { %5553 = vst [vmem:[#allocation8_spill] sm:$0xff] %v3824_v49  ;;  %v3826_v42 = vpop.permute.xlu1 %560  ;;  %v862_v25 = vsel %vm849_vm9, %v3816_v14, %v822_v8  ;;  %v820_v49 = vmul.f32 %v799_v46, %v787_v55  ;;  %v980_v62 = vsel %vm544_vm7, %v966_v26, %v979_v57  ;;  %v930_v55 = vrot.slane %v711_v33, 6 }
 0x1fd   :  { %v3840_v15 = vmul.f32 %v5554_v48, %v3596_v17  ;;  %v889_v8 = vmul.f32 %v875_v31, %v862_v25  ;;  %v873_v17 = vperm.slane %v3493_v41, 4  ;;  %v678_v31 = vsel %vm664_vm10, %v3726_v43, %v3519_v24 }
 0x1fe   :  { %v920_v48 = vrot.slane %v706_v60, 6  ;;  %v917_v25 = vrot.slane %v3833_v52, 6  ;;  %v630_v3 = vmul.f32 %v609_v54, %v600_v45  ;;  %v1028_v22 = vrot.slane %v820_v49, 2 }
 0x1ff   :  { %1257 = vmatpush.msrb.mxu1 %v889_v8  ;;  %v797_v24 = vperm.slane %v3605_v27, 4  ;;  %v629_v43 = vmul.f32 %v608_v21, %v602_v35  ;;  %v776_v60 = vsel %vm773_vm11, %v3675_v37, %v3663_v7  ;;  %v705_v58 = vmul.f32 %v684_v51, %v678_v31  ;;  %v5571_v52 = vld [vmem:[#allocation7_spill] sm:$0xff] }
 0x200   :  { %v3877_v8 = vmul.f32 %v873_v17, %v853_v13  ;;  %v688_v49 = vperm.slane %v3600_v38, 4  ;;  %v931_v13 = vsel %vm68_vm0, %v917_v25, %v930_v55  ;;  %v851_v55 = vsel %vm849_vm9, %v3667_v4, %v3752_v12  ;;  %v5555_v12 = vld [vmem:[#allocation5_spill] sm:$0xff] }
 0x201   :  { %v3892_v57 = vmul.f32 %v797_v24, %v776_v60  ;;  %v775_v4 = vsel %vm773_vm11, %v3814_v5, %v3602_v59  ;;  %v601_v59 = vsel %vm588_vm12, %v3754_v32, %v3826_v42 }
 0x203   :  { %v637_v33 = vpop.permute.xlu0 %636 }
 0x204   :  { %v675_v45 = vsel %vm664_vm10, %v637_v33, %v3591_v61  ;;  %v677_v35 = vsel %vm664_vm10, %v3728_v39, %v637_v33  ;;  %v770_v30 = vpop.permute.xlu1 %769  ;;  %v669_v61 = vsel %vm664_vm10, %v3589_v11, %v3763_v36  ;;  %v798_v39 = vperm.slane %v3605_v27, 5 }
 0x205   :  { %v698_v37 = vmul.f32 %v684_v51, %v677_v35  ;;  %v699_v31 = vmul.f32 %v685_v29, %v675_v45  ;;  %v786_v18 = vsel %vm773_vm11, %v770_v30, %v3677_v47  ;;  %v852_v29 = vsel %vm849_vm9, %v3694_v56, %v3699_v6 }
 0x206   :  { %v813_v33 = vmul.f32 %v799_v46, %v786_v18  ;;  %v918_v47 = vrot.slane %v705_v58, 6  ;;  %v777_v11 = vsel %vm773_vm11, %v3580_v63, %v3814_v5  ;;  %v1057_v36 = vsel %vm544_vm7, %v931_v13, %v966_v26 }
 0x207   :  { %v911_v51 = vrot.slane %v698_v37, 6  ;;  %v912_v45 = vrot.slane %v699_v31, 6  ;;  %v3912_v46 = vmul.f32 %v688_v49, %v669_v61  ;;  %v774_v56 = vsel %vm773_vm11, %v3663_v7, %v770_v30 }
 0x208   :  { %v1015_v27 = vrot.slane %v813_v33, 2  ;;  %v5556_v58 = vrot.slane %v5555_v12, 4  ;;  %v5557_v35 = vrot.slane %v3724_v53, 4  ;;  %v818_v7 = vmul.f32 %v797_v24, %v777_v11  ;;  %v5558_v24 = vld [vmem:[#allocation6_spill] sm:$0xff] }
 0x209   :  { %v921_v18 = vsel %vm68_vm0, %v912_v45, %v920_v48  ;;  %v919_v60 = vsel %vm68_vm0, %v911_v51, %v918_v47  ;;  %v599_v30 = vsel %vm588_vm12, %v3826_v42, %v3561_v23  ;;  %v3939_v48 = vmul.f32 %v798_v39, %v774_v56 }
 0x20a   :  { %v1029_v63 = vsel %vm552_vm8, %v1015_v27, %v1028_v22  ;;  %v1052_v26 = vsel %vm544_vm7, %v921_v18, %v5556_v58  ;;  %v1051_v37 = vsel %vm544_vm7, %v919_v60, %v5557_v35  ;;  %v611_v22 = vperm.slane %v3633_v50, 3  ;;  %v579_v18 = vpop.permute.xlu2 %578 }
 0x20b   :  { %1258 = vmatpush.msrb.mxu1 %v1029_v63  ;;  %1145 = vmatpush.msra.mxu0 %v1052_v26  ;;  %v651_v5 = vpop.permute.xlu0 %650  ;;  %v1064_v13 = vsel %vm552_vm8, %v980_v62, %v1015_v27  ;;  %v5559_v42 = vperm.slane %v3600_v38, 3  ;;  %v1044_v47 = vsel %vm68_vm0, %v629_v43, %v911_v51  ;;  %v1045_v11 = vsel %vm68_vm0, %v630_v3, %v912_v45 }
 0x20c   :  { %v670_v53 = vsel %vm664_vm10, %v651_v5, %v3696_v0  ;;  %v672_v23 = vsel %vm664_vm10, %v5558_v24, %v651_v5  ;;  %v575_v31 = vpop.permute.xlu1 %574  ;;  %1122 = vmatpush.msrb.mxu3 %v1051_v37  ;;  %v915_v56 = vrot.slane %v3912_v46, 6  ;;  %v623_v0 = vmul.f32 %v609_v54, %v599_v30 }
 0x20d   :  { %v708_v61 = vmul.f32 %v5559_v42, %v672_v23  ;;  %v709_v33 = vmul.f32 %v688_v49, %v670_v53  ;;  %1259 = vmatpush.msrb.mxu1 %v1064_v13  ;;  %v596_v60 = vsel %vm588_vm12, %v3521_v40, %v575_v31  ;;  %1146 = vmatpush.msra.mxu0 %v1045_v11  ;;  %v5560_v51 = vperm.slane %v3493_v41, 5 }
 0x20e   :  { %1123 = vmatpush.msrb.mxu3 %v1044_v47  ;;  %v622_v38 = vmul.f32 %v608_v21, %v601_v59  ;;  %v819_v62 = vmul.f32 %v798_v39, %v775_v4  ;;  %v850_v3 = vsel %vm849_vm9, %v3699_v6, %v3816_v14  ;;  %v887_v54 = vmul.f32 %v873_v17, %v852_v29 }
 0x20f   :  { %v924_v43 = vrot.slane %v708_v61, 6  ;;  %v926_v49 = vrot.slane %v709_v33, 6  ;;  %1260 = vmatpush.msrb.mxu1 %v1057_v36  ;;  %v895_v40 = vmul.f32 %v5560_v51, %v851_v55  ;;  %v1024_v45 = vrot.slane %v818_v7, 2  ;;  %1147 = vmatpush.msra.mxu0 %v623_v0 }
 0x210   :  { %1124 = vmatpush.msrb.mxu3 %v622_v38  ;;  %v614_v21 = vperm.slane %v3633_v50, 6  ;;  %v1014_v39 = vrot.slane %v3939_v48, 2  ;;  %v632_v27 = vmul.f32 %v611_v22, %v596_v60  ;;  %2912 = vmatmul.msk.f32.vlgmr.msra.gmra.mxu0 %vm1081_vm13, %v3737_v1  ;;  %v5561_v6 = vrot.slane %v3840_v15, 6 }
 0x211   :  { %v927_v17 = vsel %vm68_vm0, %v915_v56, %v926_v49  ;;  %v1013_v29 = vrot.slane %v3892_v57, 2  ;;  %v5562_v55 = vmov %v5560_v51  ;;  %2923 = vmatpush.msk.msrb.mxu0 %vm68_vm0, %v895_v40  ;;  %v5563_v4 = vrot.slane %v3692_v9, 4  ;;  %2909 = vmatmul.msk.f32.vlgmr.msrb.gmra.mxu3 %vm1081_vm13, %v3737_v1 }
 0x212   :  { %2920 = vmatpush.msk.msra.mxu3 %vm68_vm0, %v3877_v8  ;;  %v925_v14 = vsel %vm68_vm0, %v5561_v6, %v924_v43  ;;  %v888_v36 = vmul.f32 %v5562_v55, %v850_v3  ;;  %v5564_v8 = vrot.slane %v3779_v16, 4  ;;  %v1026_v58 = vrot.slane %v819_v62, 2  ;;  %v577_v47 = vpop.permute.xlu2 %576  ;;  %v1076_v43 = vld [vmem:[#allocation2 + $0x1d0] sm:$0xff] }
 0x213   :  { %v1054_v63 = vsel %vm544_vm7, %v925_v14, %v5563_v4  ;;  %v612_v26 = vperm.slane %v3633_v50, 4  ;;  %v613_v41 = vperm.slane %v3633_v50, 5  ;;  %v583_v57 = vpop.permute.xlu0 %582  ;;  %v5565_v35 = vrot.slane %v3782_v20, 4  ;;  %v1070_v14 = vld [vmem:[#allocation2 + $0x1a0] sm:$0xff] }
 0x214   :  { %v1055_v12 = vsel %vm544_vm7, %v927_v17, %v5564_v8  ;;  %1211 = vmatpush.msra.mxu3 %v887_v54  ;;  %1191 = vmatpush.msra.mxu2 %v1054_v63  ;;  %v5566_v9 = vmov %v5564_v8  ;;  %v594_v7 = vsel %vm588_vm12, %v575_v31, %v579_v18  ;;  %v590_v30 = vsel %vm588_vm12, %v583_v57, %v3638_v2  ;;  %v573_v5 = vpop.permute.xlu1 %572  ;;  %v1073_v17 = vld [vmem:[#allocation2 + $0x1b8] sm:$0xff] }
 0x215   :  { %v976_v37 = vsel %vm544_vm7, %v5566_v9, %v5565_v35  ;;  %1234 = vmatpush.msrb.mxu0 %v888_v36  ;;  %v592_v59 = vsel %vm588_vm12, %v579_v18, %v583_v57  ;;  %v1025_v50 = vsel %vm552_vm8, %v1013_v29, %v1024_v45  ;;  %v635_v48 = vmul.f32 %v614_v21, %v590_v30  ;;  %v1075_v45 = vld [vmem:[#allocation2 + $0x1c8] sm:$0xff]  ;;  %v1077_v63 = vld [vmem:[#allocation2 + $0x1d8] sm:$0xff]  ;;  %v1072_v57 = vld [vmem:[#allocation2 + $0x1b0] sm:$0xff] }
 0x216   :  { %v595_v16 = vsel %vm588_vm12, %v3665_v19, %v573_v5  ;;  %1212 = vmatpush.msra.mxu3 %v1025_v50  ;;  %v1027_v20 = vsel %vm552_vm8, %v1014_v39, %v1026_v58  ;;  %v5567_v53 = vmov %v5561_v6  ;;  %v1062_v2 = vsel %vm552_vm8, %v976_v37, %v1013_v29  ;;  %v1074_v30 = vld [vmem:[#allocation2 + $0x1c0] sm:$0xff] }
 0x217   :  { %v1047_v24 = vsel %vm68_vm0, %v632_v27, %v5567_v53  ;;  %v625_v23 = vmul.f32 %v611_v22, %v595_v16  ;;  %1235 = vmatpush.msrb.mxu0 %v1027_v20  ;;  %v5568_v31 = vrot.slane %v3819_v44, 4  ;;  %v5569_v13 = vrot.slane %v3766_v34, 4  ;;  %v5570_v34 = vld [vmem:[#allocation8_spill] sm:$0xff]  ;;  %v1078_v50 = vld [vmem:[#allocation2 + $0x1e0] sm:$0xff]  ;;  %v1079_v16 = vld [vmem:[#allocation2 + $0x1e8] sm:$0xff] }
 0x218   :  { %1192 = vmatpush.msra.mxu2 %v1047_v24  ;;  %v633_v61 = vmul.f32 %v612_v26, %v594_v7  ;;  %v634_v19 = vmul.f32 %v613_v41, %v592_v59  ;;  %1213 = vmatpush.msra.mxu3 %v1062_v2  ;;  %v1050_v15 = vsel %vm68_vm0, %v635_v48, %v917_v25  ;;  %v5572_v11 = vrot.slane %v5571_v52, 6 }
 0x219   :  { %v978_v42 = vsel %vm544_vm7, %v5569_v13, %v5568_v31  ;;  %v593_v22 = vsel %vm588_vm12, %v573_v5, %v577_v47  ;;  %2913 = vmatmul.msk.f32.gmra.mxu0 %vm1081_vm13, %v3774_v28  ;;  %1261 = vmatpush.msrb.mxu1 %v1050_v15  ;;  %v1071_v5 = vld [vmem:[#allocation2 + $0x1a8] sm:$0xff] }
 0x21a   :  { %v1063_v33 = vsel %vm552_vm8, %v978_v42, %v1014_v39  ;;  %1193 = vmatpush.msra.mxu2 %v625_v23  ;;  %1214 = vmatpush.msra.mxu3 %v1055_v12  ;;  %v1048_v44 = vsel %vm68_vm0, %v633_v61, %v915_v56  ;;  %v1049_v25 = vsel %vm68_vm0, %v634_v19, %v5572_v11  ;;  %v1421_v42 = vld [vmem:[#allocation2 + $0x11a] ss:$8 sm:$0xf] }
 0x21b   :  { %1236 = vmatpush.msrb.mxu0 %v1063_v33  ;;  %2918 = vmatmul.msk.f32.vlgmr.msra.gmra.mxu2 %vm1081_vm13, %v3737_v1  ;;  %v581_v0 = vpop.permute.xlu0 %580  ;;  %v626_v18 = vmul.f32 %v612_v26, %v593_v22  ;;  %v1080_v26 = vld [vmem:[#allocation2 + $0x1f0] sm:$0xff] }
 0x21c   :  { %2910 = vmatmul.msk.f32.gmra.mxu3 %vm1081_vm13, %v3774_v28  ;;  %v589_v60 = vsel %vm588_vm12, %v581_v0, %v3754_v32  ;;  %v591_v46 = vsel %vm588_vm12, %v577_v47, %v581_v0  ;;  %v1069_v32 = vld [vmem:[#allocation2 + $0x198] sm:$0xff] }
 0x21d   :  { %1237 = vmatpush.msrb.mxu0 %v5570_v34  ;;  %1215 = vmatpush.msra.mxu3 %v1048_v44  ;;  %v627_v38 = vmul.f32 %v613_v41, %v591_v46  ;;  %v628_v56 = vmul.f32 %v614_v21, %v589_v60  ;;  %v1422_v61 = vld [vmem:[#allocation2 + $0x11a] ss:$8 sm:$0xf0]  ;;  %v1346_v34 = vld [vmem:[#allocation2 + $0x119] ss:$8 sm:$0xf] }
 0x21e   :  { %v4144_v19 = vor.u32 %v1422_v61, %v1421_v42  ;;  %v1347_v44 = vld [vmem:[#allocation2 + $0x119] ss:$8 sm:$0xf0] }
 0x21f   :  { %1238 = vmatpush.msrb.mxu0 %v1049_v25  ;;  %1216 = vmatpush.msra.mxu3 %v626_v18  ;;  %v4161_v0 = vor.u32 %v1347_v44, %v1346_v34  ;;  %v4281_v34 = vld [vmem:[#allocation2 + $0x310] sm:$0xff] }
 0x220   :  { %1262 = vmatpush.msrb.mxu1 %v628_v56  ;;  %v4147_v33 = vperm.slane %v4144_v19, 2  ;;  %v4159_v11 = vperm.slane %v4144_v19, 1  ;;  %v4289_v44 = vperm.slane %v4144_v19, 3 }
 0x221   :  { %1239 = vmatpush.msrb.mxu0 %v627_v38  ;;  %2927 = vmatmul.msk.f32.vlgmr.msrb.gmra.mxu1 %vm1081_vm13, %v3737_v1  ;;  %v4175_v56 = vperm.slane %v4161_v0, 1 }
 0x222   :  { %2924 = vmatmul.msk.f32.vlgmr.msrb.gmra.mxu0 %vm1081_vm13, %v3737_v1  ;;  %5576 = vst [vmem:[#allocation7_spill] sm:$0xff] %v4289_v44 }
 0x223   :  { %2919 = vmatmul.msk.f32.gmra.mxu2 %vm1081_vm13, %v3774_v28 }
 0x224   :  { %2921 = vmatmul.msk.f32.vlgmr.msra.gmra.mxu3 %vm1081_vm13, %v3737_v1  ;;  %v1068_v1 = vld [vmem:[#allocation2 + $0x190] sm:$0xff] }
 0x229   :  { %2928 = vmatmul.msk.f32.gmra.mxu1 %vm1081_vm13, %v3774_v28 }
 0x22a   :  { %2925 = vmatmul.msk.f32.gmra.mxu0 %vm1081_vm13, %v3774_v28 }
 0x22c   :  { %2922 = vmatmul.msk.f32.gmra.mxu3 %vm1081_vm13, %v3774_v28  ;;  %v1067_v28 = vld [vmem:[#allocation2 + $0x188] sm:$0xff] }
 0x265   :  { %v1172_v62 = vpop.f32.mrf.mxu1 }
 0x266   :  { %v4058_v3 = vadd.f32 %v1172_v62, %v1069_v32 }
 0x268   :  { %1386 = vrot.lane.b32.xlu2 %v4058_v3, %s3032_s2 }
 0x26d   :  { %v1175_v49 = vpop.f32.mrf.mxu1 }
 0x26e   :  { %v4062_v54 = vadd.f32 %v1175_v49, %v1076_v43 }
 0x270   :  { %1388 = vrot.lane.b32.xlu2 %v4062_v54, %s3032_s2 }
 0x28d   :  { %v1149_v51 = vpop.f32.mrf.mxu0 }
 0x28e   :  { %v4066_v40 = vadd.f32 %v1149_v51, %v1068_v1 }
 0x290   :  { %1382 = vrot.lane.b32.xlu0 %v4066_v40, %s3032_s2  ;;  %v4192_v51 = vmul.f32 %v4175_v56, %v4066_v40 }
 0x294   :  { %v1126_v21 = vpop.f32.mrf.mxu3 }
 0x295   :  { %v4070_v27 = vadd.f32 %v1126_v21, %v1067_v28  ;;  %v4195_v28 = vperm.slane %v4161_v0, 2 }
 0x296   :  { %v1152_v39 = vpop.f32.mrf.mxu0 }
 0x297   :  { %v4072_v6 = vadd.f32 %v1152_v39, %v1075_v45  ;;  %1378 = vrot.lane.b32.xlu2 %v4070_v27, %s3032_s2  ;;  %v4201_v45 = vmul.f32 %v4195_v28, %v4062_v54  ;;  %v4206_v21 = vmul.f32 %v4195_v28, %v4058_v3 }
 0x299   :  { %1384 = vrot.lane.b32.xlu1 %v4072_v6, %s3032_s2  ;;  %v4180_v62 = vmul.f32 %v4175_v56, %v4072_v6 }
 0x29e   :  { %v1195_v29 = vpop.f32.mrf.mxu2  ;;  %v1264_v36 = vpop.f32.mrf.mxu1 }
 0x29f   :  { %v4078_v55 = vadd.f32 %v1195_v29, %v1070_v14  ;;  %v4080_v4 = vadd.f32 %v1264_v36, %v1073_v17  ;;  %v1129_v12 = vpop.f32.mrf.mxu3  ;;  %v1241_v35 = vpop.f32.mrf.mxu0  ;;  %v1313_v29 = vld [vmem:[#allocation2 + $0x118] ss:$8 sm:$0xf] }
 0x2a0   :  { %v4096_v37 = vadd.f32 %v1241_v35, %v1072_v57  ;;  %v4104_v59 = vadd.f32 %v1129_v12, %v1074_v30 }
 0x2a1   :  { %1390 = vrot.lane.b32.xlu0 %v4078_v55, %s3032_s2  ;;  %1294 = vrot.lane.b32.xlu1 %v4080_v4, %s3031_s21 }
 0x2a6   :  { %v1198_v8 = vpop.f32.mrf.mxu2  ;;  %v1267_v41 = vpop.f32.mrf.mxu1 }
 0x2a7   :  { %v4086_v58 = vadd.f32 %v1198_v8, %v1077_v63  ;;  %v4094_v9 = vadd.f32 %v1267_v41, %v1080_v26  ;;  %v1218_v7 = vpop.f32.mrf.mxu3  ;;  %v1244_v20 = vpop.f32.mrf.mxu0  ;;  %v4220_v63 = vperm.slane %v4144_v19, 0 }
 0x2a8   :  { %v4112_v53 = vadd.f32 %v1218_v7, %v1071_v5  ;;  %v4116_v23 = vadd.f32 %v1244_v20, %v1079_v16  ;;  %v4247_v5 = vperm.slane %v4161_v0, 0 }
 0x2a9   :  { %1276 = vrot.lane.b32.xlu0 %v4072_v6, %s3031_s21  ;;  %1392 = vrot.lane.b32.xlu2 %v4086_v58, %s3032_s2 }
 0x2aa   :  { %1284 = vrot.lane.b32.xlu1 %v4086_v58, %s3031_s21  ;;  %5574 = vst [vmem:[#allocation6_spill] sm:$0xff] %v4247_v5 }
 0x2af   :  { %v1221_v48 = vpop.f32.mrf.mxu3 }
 0x2b0   :  { %v4114_v24 = vadd.f32 %v1221_v48, %v1078_v50  ;;  %v4255_v48 = vmul.f32 %v4247_v5, %v4104_v59 }
 0x2b1   :  { %1270 = vrot.lane.b32.xlu0 %v4070_v27, %s3031_s21  ;;  %1296 = vrot.lane.b32.xlu2 %v4094_v9, %s3031_s21 }
 0x2b2   :  { %1398 = vrot.lane.b32.xlu1 %v4096_v37, %s3032_s2 }
 0x2b9   :  { %1380 = vrot.lane.b32.xlu0 %v4104_v59, %s3032_s2  ;;  %1282 = vrot.lane.b32.xlu2 %v4078_v55, %s3031_s21 }
 0x2ba   :  { %1272 = vrot.lane.b32.xlu1 %v4104_v59, %s3031_s21 }
 0x2c1   :  { %1394 = vrot.lane.b32.xlu0 %v4112_v53, %s3032_s2  ;;  %1288 = vrot.lane.b32.xlu2 %v4114_v24, %s3031_s21 }
 0x2c2   :  { %1400 = vrot.lane.b32.xlu1 %v4116_v23, %s3032_s2  ;;  %v1387_v2 = vpop.permute.xlu2 %1386 }
 0x2c9   :  { %1396 = vrot.lane.b32.xlu0 %v4114_v24, %s3032_s2  ;;  %1278 = vrot.lane.b32.xlu2 %v4058_v3, %s3031_s21 }
 0x2ca   :  { %1274 = vrot.lane.b32.xlu1 %v4066_v40, %s3031_s21  ;;  %v1389_v31 = vpop.permute.xlu2 %1388 }
 0x2d1   :  { %1286 = vrot.lane.b32.xlu0 %v4112_v53, %s3031_s21  ;;  %1292 = vrot.lane.b32.xlu2 %v4116_v23, %s3031_s21 }
 0x2d2   :  { %1280 = vrot.lane.b32.xlu1 %v4062_v54, %s3031_s21  ;;  %v1314_v54 = vld [vmem:[#allocation2 + $0x118] ss:$8 sm:$0xf0] }
 0x2d3   :  { %v4217_v36 = vor.u32 %v1314_v54, %v1313_v29 }
 0x2d5   :  { %v4225_v8 = vperm.slane %v4217_v36, 1  ;;  %v4261_v20 = vperm.slane %v4217_v36, 0 }
 0x2d7   :  { %5573 = vst [vmem:[#allocation5_spill] sm:$0xff] %v4225_v8 }
 0x2d8   :  { %5575 = vst [vmem:[#allocation8_spill] sm:$0xff] %v4261_v20 }
 0x2d9   :  { %1404 = vrot.lane.b32.xlu0 %v4094_v9, %s3032_s2 }
 0x2da   :  { %1402 = vrot.lane.b32.xlu1 %v4080_v4, %s3032_s2 }
 0x2e1   :  { %1290 = vrot.lane.b32.xlu0 %v4096_v37, %s3031_s21 }
 0x2f1   :  { %v4142_v13 = vpop.permute.xlu2 %1378 }
 0x302   :  { %v1383_v52 = vpop.permute.xlu0 %1382 }
 0x303   :  { %v4149_v47 = vpop.permute.xlu2 %1392  ;;  %v1414_v18 = vsel %vm392_vm6, %v1383_v52, %v1387_v2  ;;  %v1416_v12 = vsel %vm392_vm6, %v4142_v13, %v1383_v52  ;;  %v4292_v52 = vperm.slane %v4144_v19, 4 }
 0x304   :  { %v1413_v15 = vsel %vm392_vm6, %v1389_v31, %v4149_v47  ;;  %v4171_v38 = vmul.f32 %v4159_v11, %v1414_v18  ;;  %v4240_v7 = vmul.f32 %v4220_v63, %v1416_v12 }
 0x305   :  { %v4155_v22 = vmul.f32 %v4147_v33, %v1413_v15  ;;  %5577 = vst [vmem:[#allocation9_spill] sm:$0xff] %v4292_v52 }
 0x307   :  { %1518 = vmatpush.msra.mxu0 %v4155_v22 }
 0x30b   :  { %v1385_v25 = vpop.permute.xlu1 %1384  ;;  %v4215_v17 = vpop.permute.xlu2 %1296 }
 0x30c   :  { %v1415_v60 = vsel %vm392_vm6, %v1385_v25, %v1389_v31  ;;  %v4266_v31 = vmul.f32 %v4247_v5, %v4070_v27 }
 0x30d   :  { %v4168_v46 = vmul.f32 %v4159_v11, %v1415_v60 }
 0x30f   :  { %1495 = vmatpush.msrb.mxu3 %v4168_v46 }
 0x311   :  { %1496 = vmatpush.msrb.mxu3 %v4171_v38 }
 0x313   :  { %v1391_v32 = vpop.permute.xlu0 %1390  ;;  %v4187_v1 = vpop.permute.xlu1 %1294  ;;  %1497 = vmatpush.msrb.mxu3 %v4180_v62 }
 0x314   :  { %v1412_v43 = vsel %vm392_vm6, %v1387_v2, %v1391_v32  ;;  %v4249_v50 = vpop.permute.xlu2 %1282 }
 0x315   :  { %v4185_v49 = vmul.f32 %v4147_v33, %v1412_v43  ;;  %1498 = vmatpush.msrb.mxu3 %v4192_v51 }
 0x317   :  { %1519 = vmatpush.msra.mxu0 %v4185_v49 }
 0x319   :  { %1520 = vmatpush.msra.mxu0 %v4201_v45 }
 0x31b   :  { %v4208_v39 = vpop.permute.xlu0 %1276  ;;  %1521 = vmatpush.msra.mxu0 %v4206_v21 }
 0x31c   :  { %v4211_v40 = vpop.permute.xlu1 %1284  ;;  %v4284_v27 = vpop.permute.xlu2 %1288 }
 0x323   :  { %v1271_v6 = vpop.permute.xlu0 %1270 }
 0x324   :  { %v4213_v14 = vpop.permute.xlu1 %1398  ;;  %v1310_v42 = vsel %vm318_vm3, %v4187_v1, %v1271_v6 }
 0x325   :  { %v4278_v15 = vmul.f32 %v4261_v20, %v1310_v42 }
 0x32b   :  { %v4222_v3 = vpop.permute.xlu0 %1380 }
 0x32c   :  { %v1417_v26 = vsel %vm392_vm6, %v4222_v3, %v1385_v25  ;;  %v1273_v57 = vpop.permute.xlu1 %1272 }
 0x32d   :  { %v4234_v41 = vmul.f32 %v4220_v63, %v1417_v26  ;;  %v1309_v35 = vsel %vm318_vm3, %v1273_v57, %v4208_v39  ;;  %v1311_v16 = vsel %vm318_vm3, %v4215_v17, %v1273_v57 }
 0x32e   :  { %v4243_v30 = vmul.f32 %v4225_v8, %v1309_v35  ;;  %v4272_v59 = vmul.f32 %v4261_v20, %v1311_v16 }
 0x32f   :  { %1472 = vmatpush.msrb.mxu2 %v4234_v41 }
 0x330   :  { %1499 = vmatpush.msrb.mxu3 %v4243_v30 }
 0x331   :  { %1473 = vmatpush.msrb.mxu2 %v4240_v7 }
 0x333   :  { %v1395_v2 = vpop.permute.xlu0 %1394  ;;  %1474 = vmatpush.msrb.mxu2 %v4255_v48 }
 0x334   :  { %v4274_v61 = vpop.permute.xlu1 %1400  ;;  %v1410_v18 = vsel %vm392_vm6, %v1391_v32, %v1395_v2  ;;  %v1408_v29 = vsel %vm392_vm6, %v1395_v2, %v4213_v14  ;;  %v4327_v2 = vld [vmem:[#allocation2 + $0x348] sm:$0xff] }
 0x335   :  { %1475 = vmatpush.msrb.mxu2 %v4266_v31  ;;  %v4314_v57 = vmul.f32 %v4289_v44, %v1410_v18  ;;  %v4325_v16 = vmul.f32 %v4292_v52, %v1408_v29 }
 0x337   :  { %1476 = vmatpush.msrb.mxu2 %v4272_v59 }
 0x339   :  { %1477 = vmatpush.msrb.mxu2 %v4278_v15 }
 0x33a   :  { %2929 = vmatmul.msk.f32.vlgmr.msrb.gmra.mxu2 %vm1455_vm14, %v4281_v34 }
 0x33b   :  { %v1397_v25 = vpop.permute.xlu0 %1396 }
 0x33c   :  { %v1409_v60 = vsel %vm392_vm6, %v1397_v25, %v4274_v61  ;;  %v1411_v43 = vsel %vm392_vm6, %v4149_v47, %v1397_v25  ;;  %v1275_v26 = vpop.permute.xlu1 %1274  ;;  %v4322_v47 = vperm.slane %v4161_v0, 3  ;;  %v4339_v25 = vperm.slane %v4217_v36, 4 }
 0x33d   :  { %v4306_v54 = vmul.f32 %v4289_v44, %v1411_v43  ;;  %v4309_v12 = vmul.f32 %v4292_v52, %v1409_v60  ;;  %v1308_v32 = vsel %vm318_vm3, %v1271_v6, %v1275_v26  ;;  %v4330_v6 = vperm.slane %v4161_v0, 4 }
 0x33e   :  { %v4317_v35 = vmul.f32 %v4225_v8, %v1308_v32  ;;  %5578 = vst [vmem:[#allocation10_spill] sm:$0xff] %v4322_v47  ;;  %v4336_v42 = vmul.f32 %v4322_v47, %v4086_v58  ;;  %v1303_v60 = vsel %vm318_vm3, %v4211_v40, %v4284_v27  ;;  %v4359_v43 = vmul.f32 %v4322_v47, %v4078_v55 }
 0x33f   :  { %1541 = vmatpush.msra.mxu1 %v4306_v54  ;;  %1564 = vmatpush.msra.mxu2 %v4309_v12  ;;  %5579 = vst [vmem:[#allocation11_spill] sm:$0xff] %v4330_v6  ;;  %v4344_v18 = vmul.f32 %v4330_v6, %v4114_v24  ;;  %v1279_v24 = vpop.permute.xlu2 %1278  ;;  %v4364_v29 = vmul.f32 %v4330_v6, %v4112_v53  ;;  %v4367_v32 = vperm.slane %v4217_v36, 3  ;;  %v4370_v8 = vperm.slane %v4217_v36, 2 }
 0x340   :  { %1500 = vmatpush.msrb.mxu3 %v4317_v35  ;;  %v4378_v47 = vmul.f32 %v4339_v25, %v1303_v60  ;;  %v1306_v53 = vsel %vm318_vm3, %v1275_v26, %v1279_v24  ;;  %v1304_v20 = vsel %vm318_vm3, %v1279_v24, %v4249_v50 }
 0x341   :  { %1542 = vmatpush.msra.mxu1 %v4314_v57  ;;  %1565 = vmatpush.msra.mxu2 %v4325_v16 }
 0x342   :  { %2931 = vmatmul.msk.f32.vlgmr.msrb.gmra.mxu3 %vm1455_vm14, %v4281_v34  ;;  %2930 = vmatmul.msk.f32.gmra.mxu2 %vm1455_vm14, %v4327_v2 }
 0x343   :  { %v4354_v58 = vpop.permute.xlu0 %1286  ;;  %1543 = vmatpush.msra.mxu1 %v4336_v42  ;;  %1566 = vmatpush.msra.mxu2 %v4344_v18 }
 0x344   :  { %v1302_v52 = vsel %vm318_vm3, %v4249_v50, %v4354_v58  ;;  %v1281_v55 = vpop.permute.xlu1 %1280  ;;  %v4411_v50 = vperm.slane %v4144_v19, 6 }
 0x345   :  { %1544 = vmatpush.msra.mxu1 %v4359_v43  ;;  %v1305_v6 = vsel %vm318_vm3, %v1281_v55, %v4211_v40  ;;  %v1307_v44 = vsel %vm318_vm3, %v4208_v39, %v1281_v55  ;;  %1567 = vmatpush.msra.mxu2 %v4364_v29  ;;  %v4399_v26 = vmul.f32 %v4339_v25, %v1302_v52  ;;  %v4408_v39 = vperm.slane %v4144_v19, 5 }
 0x346   :  { %v4393_v60 = vmul.f32 %v4370_v8, %v1307_v44  ;;  %v4396_v5 = vmul.f32 %v4367_v32, %v1305_v6  ;;  %v4403_v40 = vmul.f32 %v4370_v8, %v1306_v53  ;;  %5580 = vst [vmem:[#allocation12_spill] sm:$0xff] %v4411_v50  ;;  %v4414_v44 = vmul.f32 %v4367_v32, %v1304_v20 }
 0x347   :  { %1568 = vmatpush.msra.mxu2 %v4378_v47 }
 0x348   :  { %1522 = vmatpush.msra.mxu0 %v4393_v60  ;;  %1545 = vmatpush.msra.mxu1 %v4396_v5 }
 0x349   :  { %1569 = vmatpush.msra.mxu2 %v4399_v26 }
 0x34a   :  { %2932 = vmatmul.msk.f32.gmra.mxu3 %vm1455_vm14, %v4327_v2  ;;  %2937 = vmatmul.msk.f32.vlgmr.msra.gmra.mxu2 %vm1455_vm14, %v4281_v34 }
 0x34b   :  { %v1405_v52 = vpop.permute.xlu0 %1404  ;;  %1523 = vmatpush.msra.mxu0 %v4403_v40  ;;  %1739 = vmatpush.msrb.mxu2 %v4168_v46 }
 0x34c   :  { %v1407_v19 = vsel %vm392_vm6, %v4274_v61, %v1405_v52  ;;  %v1419_v20 = vsel %vm392_vm6, %v1405_v52, %v4222_v3  ;;  %1546 = vmatpush.msra.mxu1 %v4414_v44  ;;  %2933 = vmatmul.msk.f32.vlgmr.msra.gmra.mxu0 %vm1455_vm14, %v4281_v34  ;;  %v1403_v55 = vpop.permute.xlu1 %1402 }
 0x34d   :  { %v4431_v6 = vmul.f32 %v4408_v39, %v1407_v19  ;;  %v4434_v24 = vmul.f32 %v4411_v50, %v1419_v20  ;;  %1740 = vmatpush.msrb.mxu2 %v4171_v38  ;;  %v1406_v3 = vsel %vm392_vm6, %v4213_v14, %v1403_v55  ;;  %v1418_v61 = vsel %vm392_vm6, %v1403_v55, %v4142_v13  ;;  %v1293_v13 = vpop.permute.xlu2 %1292 }
 0x34e   :  { %1716 = vmatpush.msrb.mxu1 %v4234_v41  ;;  %v4449_v53 = vmul.f32 %v4408_v39, %v1406_v3  ;;  %v4452_v52 = vmul.f32 %v4411_v50, %v1418_v61  ;;  %v4459_v14 = vperm.slane %v4161_v0, 5  ;;  %v4464_v19 = vperm.slane %v4161_v0, 6 }
 0x34f   :  { %2935 = vmatmul.msk.f32.vlgmr.msra.gmra.mxu1 %vm1455_vm14, %v4281_v34  ;;  %1587 = vmatpush.msra.mxu3 %v4431_v6  ;;  %v4473_v55 = vperm.slane %v4217_v36, 5  ;;  %v4483_v61 = vperm.slane %v4217_v36, 6  ;;  %v1299_v50 = vsel %vm318_vm3, %v1293_v13, %v4215_v17 }
 0x350   :  { %1717 = vmatpush.msrb.mxu1 %v4240_v7  ;;  %1741 = vmatpush.msrb.mxu2 %v4180_v62  ;;  %v4470_v20 = vmul.f32 %v4459_v14, %v4116_v23  ;;  %v4480_v0 = vmul.f32 %v4464_v19, %v4094_v9  ;;  %v1301_v23 = vsel %vm318_vm3, %v4284_v27, %v1293_v13 }
 0x351   :  { %1610 = vmatpush.msrb.mxu0 %v4434_v24  ;;  %1588 = vmatpush.msra.mxu3 %v4449_v53  ;;  %v4497_v9 = vmul.f32 %v4459_v14, %v4096_v37  ;;  %v4507_v17 = vmul.f32 %v4464_v19, %v4080_v4  ;;  %v4510_v27 = vmul.f32 %v4473_v55, %v1301_v23 }
 0x352   :  { %1718 = vmatpush.msrb.mxu1 %v4255_v48  ;;  %1742 = vmatpush.msrb.mxu2 %v4192_v51 }
 0x353   :  { %1611 = vmatpush.msrb.mxu0 %v4452_v52  ;;  %2938 = vmatmul.msk.f32.gmra.mxu2 %vm1455_vm14, %v4327_v2  ;;  %v1291_v3 = vpop.permute.xlu0 %1290 }
 0x354   :  { %1719 = vmatpush.msrb.mxu1 %v4266_v31  ;;  %1743 = vmatpush.msrb.mxu2 %v4243_v30  ;;  %v1300_v36 = vsel %vm318_vm3, %v4354_v58, %v1291_v3  ;;  %v1298_v37 = vsel %vm318_vm3, %v1291_v3, %v4187_v1  ;;  %v4519_v58 = vmul.f32 %v4483_v61, %v1299_v50  ;;  %v4535_v50 = vld [vmem:[#allocation2 + $0x380] sm:$0xff] }
 0x355   :  { %1589 = vmatpush.msra.mxu3 %v4470_v20  ;;  %1612 = vmatpush.msrb.mxu0 %v4480_v0  ;;  %v4524_v4 = vmul.f32 %v4473_v55, %v1300_v36  ;;  %v4529_v1 = vmul.f32 %v4483_v61, %v1298_v37  ;;  %v1868_v36 = vld [vmem:[#allocation2 + $0x151] ss:$8 sm:$0xf]  ;;  %v1667_v37 = vld [vmem:[#allocation2 + $0x150] ss:$8 sm:$0xf0] }
 0x356   :  { %1720 = vmatpush.msrb.mxu1 %v4272_v59  ;;  %2934 = vmatmul.msk.f32.gmra.mxu0 %vm1455_vm14, %v4327_v2 }
 0x357   :  { %1744 = vmatpush.msrb.mxu2 %v4317_v35  ;;  %2936 = vmatmul.msk.f32.gmra.mxu1 %vm1455_vm14, %v4327_v2 }
 0x358   :  { %1590 = vmatpush.msra.mxu3 %v4497_v9  ;;  %1613 = vmatpush.msrb.mxu0 %v4507_v17 }
 0x359   :  { %1831 = vmatpush.msra.mxu2 %v4431_v6  ;;  %1721 = vmatpush.msrb.mxu1 %v4278_v15 }
 0x35a   :  { %1591 = vmatpush.msra.mxu3 %v4510_v27  ;;  %1614 = vmatpush.msrb.mxu0 %v4519_v58 }
 0x35b   :  { %1808 = vmatpush.msra.mxu1 %v4309_v12  ;;  %1832 = vmatpush.msra.mxu2 %v4449_v53 }
 0x35c   :  { %1592 = vmatpush.msra.mxu3 %v4524_v4  ;;  %1615 = vmatpush.msrb.mxu0 %v4529_v1 }
 0x35d   :  { %1809 = vmatpush.msra.mxu1 %v4325_v16  ;;  %1833 = vmatpush.msra.mxu2 %v4470_v20 }
 0x35e   :  { %2939 = vmatmul.msk.f32.vlgmr.msra.gmra.mxu3 %vm1455_vm14, %v4281_v34  ;;  %2945 = vmatmul.msk.f32.vlgmr.msrb.gmra.mxu2 %vm1455_vm14, %v4535_v50 }
 0x35f   :  { %1762 = vmatpush.msrb.mxu3 %v4155_v22  ;;  %1785 = vmatpush.msra.mxu0 %v4306_v54 }
 0x360   :  { %1810 = vmatpush.msra.mxu1 %v4344_v18  ;;  %1834 = vmatpush.msra.mxu2 %v4497_v9 }
 0x361   :  { %2941 = vmatmul.msk.f32.vlgmr.msrb.gmra.mxu0 %vm1455_vm14, %v4281_v34  ;;  %1763 = vmatpush.msrb.mxu3 %v4185_v49  ;;  %v4561_v34 = vld [vmem:[#allocation2 + $0x3b8] sm:$0xff] }
 0x362   :  { %1786 = vmatpush.msra.mxu0 %v4314_v57  ;;  %2943 = vmatmul.msk.f32.vlgmr.msrb.gmra.mxu1 %vm1455_vm14, %v4535_v50 }
 0x363   :  { %1835 = vmatpush.msra.mxu2 %v4510_v27  ;;  %1811 = vmatpush.msra.mxu1 %v4364_v29 }
 0x364   :  { %1764 = vmatpush.msrb.mxu3 %v4201_v45  ;;  %1787 = vmatpush.msra.mxu0 %v4336_v42 }
 0x365   :  { %1836 = vmatpush.msra.mxu2 %v4524_v4  ;;  %1812 = vmatpush.msra.mxu1 %v4378_v47 }
 0x366   :  { %1765 = vmatpush.msrb.mxu3 %v4206_v21  ;;  %1788 = vmatpush.msra.mxu0 %v4359_v43 }
 0x367   :  { %1978 = vmatpush.msrb.mxu2 %v4155_v22  ;;  %1813 = vmatpush.msra.mxu1 %v4399_v26  ;;  %v1914_v22 = vld [vmem:[#allocation2 + $0x3f0] sm:$0xff] }
 0x368   :  { %2940 = vmatmul.msk.f32.gmra.mxu3 %vm1455_vm14, %v4327_v2  ;;  %2946 = vmatmul.msk.f32.gmra.mxu2 %vm1455_vm14, %v4561_v34 }
 0x369   :  { %1766 = vmatpush.msrb.mxu3 %v4393_v60  ;;  %1789 = vmatpush.msra.mxu0 %v4396_v5 }
 0x36a   :  { %1955 = vmatpush.msrb.mxu1 %v4168_v46  ;;  %1979 = vmatpush.msrb.mxu2 %v4185_v49  ;;  %v1915_v46 = vld [vmem:[#allocation2 + $0x428] sm:$0xff] }
 0x36b   :  { %2942 = vmatmul.msk.f32.gmra.mxu0 %vm1455_vm14, %v4327_v2  ;;  %1767 = vmatpush.msrb.mxu3 %v4403_v40 }
 0x36c   :  { %1790 = vmatpush.msra.mxu0 %v4414_v44  ;;  %1956 = vmatpush.msrb.mxu1 %v4171_v38 }
 0x36d   :  { %1980 = vmatpush.msrb.mxu2 %v4201_v45  ;;  %2944 = vmatmul.msk.f32.gmra.mxu1 %vm1455_vm14, %v4561_v34 }
 0x36e   :  { %1854 = vmatpush.msra.mxu3 %v4434_v24  ;;  %1932 = vmatpush.msrb.mxu0 %v4234_v41 }
 0x36f   :  { %1957 = vmatpush.msrb.mxu1 %v4180_v62  ;;  %1981 = vmatpush.msrb.mxu2 %v4206_v21 }
 0x370   :  { %1855 = vmatpush.msra.mxu3 %v4452_v52  ;;  %1933 = vmatpush.msrb.mxu0 %v4240_v7 }
 0x371   :  { %1958 = vmatpush.msrb.mxu1 %v4192_v51  ;;  %1982 = vmatpush.msrb.mxu2 %v4393_v60 }
 0x372   :  { %1856 = vmatpush.msra.mxu3 %v4480_v0  ;;  %1934 = vmatpush.msrb.mxu0 %v4255_v48 }
 0x373   :  { %2947 = vmatmul.msk.f32.vlgmr.msrb.gmra.mxu3 %vm1455_vm14, %v4535_v50  ;;  %2953 = vmatmul.msk.f32.vlgmr.msra.gmra.mxu2 %vm1455_vm14, %v4535_v50 }
 0x374   :  { %1959 = vmatpush.msrb.mxu1 %v4243_v30  ;;  %1983 = vmatpush.msrb.mxu2 %v4403_v40 }
 0x375   :  { %1857 = vmatpush.msra.mxu3 %v4507_v17  ;;  %1935 = vmatpush.msrb.mxu0 %v4266_v31 }
 0x376   :  { %2070 = vmatpush.msra.mxu2 %v4434_v24  ;;  %2949 = vmatmul.msk.f32.vlgmr.msra.gmra.mxu0 %vm1455_vm14, %v4535_v50 }
 0x377   :  { %1960 = vmatpush.msrb.mxu1 %v4317_v35  ;;  %1858 = vmatpush.msra.mxu3 %v4519_v58 }
 0x378   :  { %2951 = vmatmul.msk.f32.vlgmr.msra.gmra.mxu1 %vm1455_vm14, %v4535_v50  ;;  %1936 = vmatpush.msrb.mxu0 %v4272_v59 }
 0x379   :  { %2047 = vmatpush.msra.mxu1 %v4431_v6  ;;  %2071 = vmatpush.msra.mxu2 %v4452_v52 }
 0x37a   :  { %1859 = vmatpush.msra.mxu3 %v4529_v1  ;;  %1937 = vmatpush.msrb.mxu0 %v4278_v15 }
 0x37b   :  { %2048 = vmatpush.msra.mxu1 %v4449_v53  ;;  %2072 = vmatpush.msra.mxu2 %v4480_v0 }
 0x37c   :  { %2001 = vmatpush.msrb.mxu3 %v4306_v54  ;;  %2024 = vmatpush.msra.mxu0 %v4309_v12 }
 0x37d   :  { %2049 = vmatpush.msra.mxu1 %v4470_v20  ;;  %2073 = vmatpush.msra.mxu2 %v4507_v17  ;;  %v1869_v17 = vld [vmem:[#allocation2 + $0x151] ss:$8 sm:$0xf0] }
 0x37e   :  { %2948 = vmatmul.msk.f32.gmra.mxu3 %vm1455_vm14, %v4561_v34  ;;  %2954 = vmatmul.msk.f32.gmra.mxu2 %vm1455_vm14, %v4561_v34 }
 0x37f   :  { %2002 = vmatpush.msrb.mxu3 %v4314_v57  ;;  %2025 = vmatpush.msra.mxu0 %v4325_v16 }
 0x380   :  { %2050 = vmatpush.msra.mxu1 %v4497_v9  ;;  %2074 = vmatpush.msra.mxu2 %v4519_v58 }
 0x381   :  { %2950 = vmatmul.msk.f32.gmra.mxu0 %vm1455_vm14, %v4561_v34  ;;  %2003 = vmatpush.msrb.mxu3 %v4336_v42 }
 0x382   :  { %2026 = vmatpush.msra.mxu0 %v4344_v18  ;;  %2051 = vmatpush.msra.mxu1 %v4510_v27  ;;  %v1666_v27 = vld [vmem:[#allocation2 + $0x150] ss:$8 sm:$0xf] }
 0x383   :  { %2075 = vmatpush.msra.mxu2 %v4529_v1  ;;  %2004 = vmatpush.msrb.mxu3 %v4359_v43 }
 0x384   :  { %2027 = vmatpush.msra.mxu0 %v4364_v29  ;;  %2052 = vmatpush.msra.mxu1 %v4524_v4  ;;  %v1870_v4 = vor.u32 %v1869_v17, %v1868_v36 }
 0x385   :  { %2005 = vmatpush.msrb.mxu3 %v4396_v5  ;;  %2952 = vmatmul.msk.f32.gmra.mxu1 %vm1455_vm14, %v4561_v34 }
 0x386   :  { %2028 = vmatpush.msra.mxu0 %v4378_v47  ;;  %2955 = vmatmul.msk.f32.vlgmr.msra.gmra.mxu3 %vm1455_vm14, %v4535_v50  ;;  %v4702_v50 = vor.u32 %v1667_v37, %v1666_v27  ;;  %v4754_v36 = vperm.slane %v1870_v4, 1 }
 0x387   :  { %2961 = vmatmul.msk.f32.vlgmr.msrb.gmra.mxu2 %vm1455_vm14, %v1914_v22  ;;  %2006 = vmatpush.msrb.mxu3 %v4414_v44 }
 0x388   :  { %2029 = vmatpush.msra.mxu0 %v4399_v26  ;;  %5585 = vst [vmem:[#allocation17_spill] sm:$0xff] %v4754_v36  ;;  %v4757_v17 = vperm.slane %v4702_v50, 1 }
 0x389   :  { %2957 = vmatmul.msk.f32.vlgmr.msrb.gmra.mxu0 %vm1455_vm14, %v1914_v22 }
 0x38a   :  { %5586 = vst [vmem:[#allocation18_spill] sm:$0xff] %v4757_v17 }
 0x38d   :  { %2959 = vmatmul.msk.f32.vlgmr.msrb.gmra.mxu1 %vm1455_vm14, %v1914_v22 }
 0x38e   :  { %2956 = vmatmul.msk.f32.gmra.mxu3 %vm1455_vm14, %v4561_v34  ;;  %v4706_v34 = vperm.slane %v1870_v4, 2 }
 0x38f   :  { %2962 = vmatmul.msk.f32.gmra.mxu2 %vm1455_vm14, %v1915_v46 }
 0x390   :  { %5581 = vst [vmem:[#allocation13_spill] sm:$0xff] %v4706_v34 }
 0x391   :  { %2958 = vmatmul.msk.f32.gmra.mxu0 %vm1455_vm14, %v1915_v46 }
 0x395   :  { %2960 = vmatmul.msk.f32.gmra.mxu1 %vm1455_vm14, %v1915_v46 }
 0x396   :  { %2963 = vmatmul.msk.f32.vlgmr.msrb.gmra.mxu3 %vm1455_vm14, %v1914_v22 }
 0x397   :  { %2969 = vmatmul.msk.f32.vlgmr.msra.gmra.mxu2 %vm1455_vm14, %v1914_v22 }
 0x399   :  { %2965 = vmatmul.msk.f32.vlgmr.msra.gmra.mxu0 %vm1455_vm14, %v1914_v22 }
 0x39d   :  { %2967 = vmatmul.msk.f32.vlgmr.msra.gmra.mxu1 %vm1455_vm14, %v1914_v22  ;;  %v4709_v22 = vperm.slane %v4702_v50, 2 }
 0x39e   :  { %2964 = vmatmul.msk.f32.gmra.mxu3 %vm1455_vm14, %v1915_v46 }
 0x39f   :  { %2970 = vmatmul.msk.f32.gmra.mxu2 %vm1455_vm14, %v1915_v46 }
 0x3a1   :  { %2966 = vmatmul.msk.f32.gmra.mxu0 %vm1455_vm14, %v1915_v46 }
 0x3a5   :  { %2968 = vmatmul.msk.f32.gmra.mxu1 %vm1455_vm14, %v1915_v46 }
 0x3bd   :  { %v1479_v38 = vpop.f32.mrf.mxu2 }
 0x3c5   :  { %v1482_v62 = vpop.f32.mrf.mxu2  ;;  %v1502_v51 = vpop.f32.mrf.mxu3 }
 0x3c9   :  { %v1525_v49 = vpop.f32.mrf.mxu0 }
 0x3ca   :  { %1631 = vrot.lane.b32.xlu2 %v1525_v49, %s3036_s25 }
 0x3cc   :  { %v1548_v41 = vpop.f32.mrf.mxu1 }
 0x3cd   :  { %v1571_v45 = vpop.f32.mrf.mxu2  ;;  %v1505_v7 = vpop.f32.mrf.mxu3 }
 0x3d2   :  { %1627 = vrot.lane.b32.xlu2 %v1502_v51, %s3036_s25 }
 0x3d3   :  { %v1528_v21 = vpop.f32.mrf.mxu0 }
 0x3d4   :  { %1633 = vrot.lane.b32.xlu1 %v1528_v21, %s3036_s25  ;;  %v1551_v48 = vpop.f32.mrf.mxu1 }
 0x3d6   :  { %v1574_v30 = vpop.f32.mrf.mxu2 }
 0x3da   :  { %1629 = vrot.lane.b32.xlu2 %v1505_v7, %s3036_s25 }
 0x3dc   :  { %1623 = vrot.lane.b32.xlu1 %v1479_v38, %s3036_s25 }
 0x3de   :  { %v1617_v5 = vpop.f32.mrf.mxu0 }
 0x3df   :  { %1647 = vrot.lane.b32.xlu0 %v1617_v5, %s3036_s25  ;;  %v4670_v15 = vpop.f32.mrf.mxu1 }
 0x3e1   :  { %v1594_v31 = vpop.f32.mrf.mxu3  ;;  %v4665_v59 = vpop.f32.mrf.mxu2 }
 0x3e2   :  { %1643 = vrot.lane.b32.xlu2 %v1594_v31, %s3036_s25 }
 0x3e4   :  { %1625 = vrot.lane.b32.xlu1 %v1482_v62, %s3036_s25 }
 0x3e7   :  { %1635 = vrot.lane.b32.xlu0 %v1548_v41, %s3036_s25 }
 0x3e8   :  { %v1620_v54 = vpop.f32.mrf.mxu0 }
 0x3ea   :  { %1637 = vrot.lane.b32.xlu2 %v1551_v48, %s3036_s25  ;;  %v4677_v35 = vpop.f32.mrf.mxu1  ;;  %v4728_v48 = vperm.slane %v1870_v4, 3 }
 0x3eb   :  { %v1597_v12 = vpop.f32.mrf.mxu3  ;;  %v4674_v57 = vpop.f32.mrf.mxu2 }
 0x3ec   :  { %1645 = vrot.lane.b32.xlu1 %v1597_v12, %s3036_s25  ;;  %5582 = vst [vmem:[#allocation14_spill] sm:$0xff] %v4728_v48 }
 0x3ef   :  { %1649 = vrot.lane.b32.xlu0 %v1620_v54, %s3036_s25 }
 0x3f3   :  { %v4679_v47 = vpop.f32.mrf.mxu0 }
 0x3f4   :  { %1639 = vrot.lane.b32.xlu1 %v1571_v45, %s3036_s25 }
 0x3f5   :  { %v4685_v42 = vpop.f32.mrf.mxu1 }
 0x3f6   :  { %v1769_v16 = vpop.f32.mrf.mxu3  ;;  %v4683_v2 = vpop.f32.mrf.mxu2 }
 0x3f7   :  { %1641 = vrot.lane.b32.xlu0 %v1574_v30, %s3036_s25  ;;  %v1888_v49 = vmul.f32 %v4706_v34, %v1769_v16  ;;  %v4724_v30 = vperm.slane %v4702_v50, 3 }
 0x3fe   :  { %v1795_v18 = vpop.f32.mrf.mxu0 }
 0x3ff   :  { %v1896_v16 = vmul.f32 %v4728_v48, %v1795_v18 }
 0x401   :  { %v1772_v43 = vpop.f32.mrf.mxu3  ;;  %v4687_v29 = vpop.f32.mrf.mxu2 }
 0x402   :  { %v4689_v26 = vpop.f32.mrf.mxu1 }
 0x406   :  { %v1939_v60 = vpop.f32.mrf.mxu0 }
 0x407   :  { %2083 = vrot.lane.b32.xlu1 %v1939_v60, %s3035_s24  ;;  %v1895_v60 = vmul.f32 %v4706_v34, %v1772_v43 }
 0x409   :  { %v1861_v40 = vpop.f32.mrf.mxu3 }
 0x40a   :  { %v1985_v44 = vpop.f32.mrf.mxu2  ;;  %v1962_v24 = vpop.f32.mrf.mxu1 }
 0x40b   :  { %2091 = vrot.lane.b32.xlu0 %v1985_v44, %s3035_s24 }
 0x40e   :  { %v1942_v6 = vpop.f32.mrf.mxu0 }
 0x40f   :  { %2085 = vrot.lane.b32.xlu1 %v1942_v6, %s3035_s24 }
 0x411   :  { %v4694_v53 = vpop.f32.mrf.mxu3 }
 0x412   :  { %v1965_v20 = vpop.f32.mrf.mxu1  ;;  %v1988_v3 = vpop.f32.mrf.mxu2 }
 0x416   :  { %v2031_v52 = vpop.f32.mrf.mxu0 }
 0x417   :  { %2099 = vrot.lane.b32.xlu2 %v2031_v52, %s3035_s24 }
 0x419   :  { %v2008_v13 = vpop.f32.mrf.mxu3 }
 0x41a   :  { %2095 = vrot.lane.b32.xlu1 %v2008_v13, %s3035_s24  ;;  %v2054_v9 = vpop.f32.mrf.mxu1  ;;  %v2077_v1 = vpop.f32.mrf.mxu2  ;;  %v4743_v13 = vperm.slane %v1870_v4, 6 }
 0x41c   :  { %5583 = vst [vmem:[#allocation15_spill] sm:$0xff] %v4743_v13  ;;  %v1892_v43 = vmul.f32 %v4743_v13, %v1861_v40 }
 0x41e   :  { %v2034_v0 = vpop.f32.mrf.mxu0 }
 0x41f   :  { %2087 = vrot.lane.b32.xlu2 %v1962_v24, %s3035_s24 }
 0x421   :  { %v2011_v23 = vpop.f32.mrf.mxu3 }
 0x422   :  { %2101 = vrot.lane.b32.xlu1 %v2034_v0, %s3035_s24  ;;  %2097 = vrot.lane.b32.xlu0 %v2011_v23, %s3035_s24  ;;  %v2057_v46 = vpop.f32.mrf.mxu1  ;;  %v2080_v41 = vpop.f32.mrf.mxu2 }
 0x424   :  { %v1632_v58 = vpop.permute.xlu2 %1631 }
 0x427   :  { %2089 = vrot.lane.b32.xlu2 %v1965_v20, %s3035_s24  ;;  %v4746_v20 = vperm.slane %v4702_v50, 6 }
 0x429   :  { %5584 = vst [vmem:[#allocation16_spill] sm:$0xff] %v4746_v20 }
 0x42a   :  { %2093 = vrot.lane.b32.xlu0 %v1988_v3, %s3035_s24  ;;  %2107 = vrot.lane.b32.xlu1 %v2077_v1, %s3035_s24  ;;  %v1894_v1 = vmul.f32 %v4754_v36, %v4674_v57  ;;  %v4776_v57 = vperm.slane %v4702_v50, 0 }
 0x42c   :  { %v4711_v38 = vpop.permute.xlu2 %1627  ;;  %5588 = vst [vmem:[#allocation20_spill] sm:$0xff] %v4776_v57 }
 0x42d   :  { %v1659_v62 = vsel %vm664_vm10, %v4711_v38, %v1632_v58 }
 0x42e   :  { %v1686_v51 = vmul.f32 %v4709_v22, %v1659_v62 }
 0x42f   :  { %2105 = vrot.lane.b32.xlu2 %v2057_v46, %s3035_s24 }
 0x430   :  { %v4719_v45 = vadd.f32 %v1888_v49, %v1686_v51  ;;  %v1889_v49 = vmul.f32 %v4728_v48, %v4679_v47 }
 0x432   :  { %2103 = vrot.lane.b32.xlu0 %v2054_v9, %s3035_s24 }
 0x434   :  { %v1630_v21 = vpop.permute.xlu2 %1629 }
 0x43a   :  { %2109 = vrot.lane.b32.xlu0 %v2080_v41, %s3035_s24 }
 0x43c   :  { %v1644_v7 = vpop.permute.xlu2 %1643 }
 0x444   :  { %v4726_v5 = vpop.permute.xlu2 %1637 }
 0x446   :  { %v1634_v31 = vpop.permute.xlu1 %1633 }
 0x447   :  { %v1660_v54 = vsel %vm664_vm10, %v1630_v21, %v1634_v31  ;;  %v1658_v12 = vsel %vm664_vm10, %v1634_v31, %v4726_v5 }
 0x448   :  { %v1693_v44 = vmul.f32 %v4709_v22, %v1660_v54  ;;  %v1694_v6 = vmul.f32 %v4724_v30, %v1658_v12 }
 0x44a   :  { %v4739_v24 = vadd.f32 %v1895_v60, %v1693_v44  ;;  %v4741_v52 = vadd.f32 %v1896_v16, %v1694_v6  ;;  %v1899_v60 = vmul.f32 %v4743_v13, %v4694_v53 }
 0x44e   :  { %v1624_v3 = vpop.permute.xlu1 %1623 }
 0x451   :  { %v1648_v0 = vpop.permute.xlu0 %1647 }
 0x452   :  { %v1651_v18 = vsel %vm664_vm10, %v1644_v7, %v1648_v0 }
 0x453   :  { %v1690_v23 = vmul.f32 %v4746_v20, %v1651_v18  ;;  %v4788_v18 = vperm.slane %v1870_v4, 5 }
 0x455   :  { %v4752_v9 = vadd.f32 %v1892_v43, %v1690_v23  ;;  %5589 = vst [vmem:[#allocation21_spill] sm:$0xff] %v4788_v18  ;;  %v4790_v43 = vperm.slane %v1870_v4, 4 }
 0x456   :  { %v1626_v27 = vpop.permute.xlu1 %1625 }
 0x457   :  { %v1662_v37 = vsel %vm664_vm10, %v1626_v27, %v1630_v21  ;;  %v4773_v21 = vperm.slane %v1870_v4, 0  ;;  %5590 = vst [vmem:[#allocation22_spill] sm:$0xff] %v4790_v43  ;;  %v1891_v4 = vmul.f32 %v4788_v18, %v4683_v2 }
 0x458   :  { %v1692_v62 = vmul.f32 %v4757_v17, %v1662_v37  ;;  %v4797_v37 = vperm.slane %v4702_v50, 4 }
 0x459   :  { %v1636_v46 = vpop.permute.xlu0 %1635  ;;  %5587 = vst [vmem:[#allocation19_spill] sm:$0xff] %v4773_v21  ;;  %v1893_v47 = vmul.f32 %v4773_v21, %v4677_v35  ;;  %v4800_v35 = vperm.slane %v4702_v50, 5 }
 0x45a   :  { %v1657_v40 = vsel %vm664_vm10, %v1632_v58, %v1636_v46  ;;  %v4769_v41 = vadd.f32 %v1894_v1, %v1692_v62  ;;  %5591 = vst [vmem:[#allocation23_spill] sm:$0xff] %v4797_v37 }
 0x45b   :  { %v1687_v51 = vmul.f32 %v4724_v30, %v1657_v40  ;;  %5592 = vst [vmem:[#allocation24_spill] sm:$0xff] %v4800_v35  ;;  %v1890_v40 = vmul.f32 %v4790_v43, %v4685_v42  ;;  %v2126_v42 = vld [vmem:[#allocation2 + $0x152] ss:$8 sm:$0xf] }
 0x45d   :  { %v4771_v31 = vadd.f32 %v1889_v49, %v1687_v51 }
 0x45e   :  { %v1646_v54 = vpop.permute.xlu1 %1645 }
 0x461   :  { %v1650_v12 = vpop.permute.xlu0 %1649 }
 0x462   :  { %v1664_v16 = vsel %vm664_vm10, %v1650_v12, %v1626_v27  ;;  %v1652_v58 = vsel %vm664_vm10, %v1646_v54, %v1650_v12 }
 0x463   :  { %v1691_v44 = vmul.f32 %v4776_v57, %v1664_v16  ;;  %v1697_v6 = vmul.f32 %v4746_v20, %v1652_v58  ;;  %v5602_v20 = vld [vmem:[#allocation7_spill] sm:$0xff] }
 0x465   :  { %v4792_v23 = vadd.f32 %v1893_v47, %v1691_v44  ;;  %v4794_v27 = vadd.f32 %v1899_v60, %v1697_v6  ;;  %v2127_v47 = vld [vmem:[#allocation2 + $0x152] ss:$8 sm:$0xf0] }
 0x466   :  { %v1640_v1 = vpop.permute.xlu1 %1639  ;;  %v4825_v44 = vor.u32 %v2127_v47, %v2126_v42 }
 0x467   :  { %v1653_v53 = vsel %vm664_vm10, %v1640_v1, %v1644_v7  ;;  %v1655_v62 = vsel %vm664_vm10, %v1636_v46, %v1640_v1  ;;  %v1898_v7 = vmul.f32 %v4788_v18, %v4687_v29  ;;  %v1886_v1 = vmul.f32 %v4773_v21, %v4670_v15 }
 0x468   :  { %v1688_v49 = vmul.f32 %v4797_v37, %v1655_v62  ;;  %v1689_v51 = vmul.f32 %v4800_v35, %v1653_v53  ;;  %v4831_v29 = vperm.slane %v4825_v44, 0 }
 0x469   :  { %v1642_v12 = vpop.permute.xlu0 %1641 }
 0x46a   :  { %v1654_v50 = vsel %vm664_vm10, %v1642_v12, %v1646_v54  ;;  %v4816_v16 = vadd.f32 %v1890_v40, %v1688_v49  ;;  %v4818_v46 = vadd.f32 %v1891_v4, %v1689_v51  ;;  %v1663_v54 = vsel %vm664_vm10, %v1648_v0, %v1624_v3  ;;  %5593 = vst [vmem:[#allocation25_spill] sm:$0xff] %v4831_v29 }
 0x46b   :  { %v1696_v2 = vmul.f32 %v4800_v35, %v1654_v50  ;;  %v1684_v6 = vmul.f32 %v4776_v57, %v1663_v54  ;;  %v1661_v4 = vsel %vm664_vm10, %v1624_v3, %v4711_v38  ;;  %v4845_v51 = vperm.slane %v4825_v44, 1  ;;  %v2172_v50 = vld [vmem:[#allocation2 + $0x1f8] sm:$0xff] }
 0x46c   :  { %v1685_v15 = vmul.f32 %v4757_v17, %v1661_v4  ;;  %v1887_v38 = vmul.f32 %v4754_v36, %v4665_v59  ;;  %v5603_v35 = vld [vmem:[#allocation9_spill] sm:$0xff] }
 0x46d   :  { %v4821_v58 = vadd.f32 %v1898_v7, %v1696_v2  ;;  %v1900_v0 = vadd.f32 %v1886_v1, %v1684_v6  ;;  %5594 = vst [vmem:[#allocation26_spill] sm:$0xff] %v4845_v51  ;;  %v2173_v1 = vld [vmem:[#allocation2 + $0x200] sm:$0xff]  ;;  %v5606_v36 = vld [vmem:[#allocation5_spill] sm:$0xff] }
 0x46e   :  { %v1901_v54 = vadd.f32 %v1887_v38, %v1685_v15 }
 0x471   :  { %v4823_v60 = vpop.permute.xlu2 %2099 }
 0x479   :  { %v2088_v53 = vpop.permute.xlu2 %2087  ;;  %v4835_v62 = vpop.permute.xlu1 %2083 }
 0x47a   :  { %v2121_v40 = vsel %vm773_vm11, %v4835_v62, %v2088_v53 }
 0x47b   :  { %v2144_v49 = vmul.f32 %v4831_v29, %v2121_v40 }
 0x47d   :  { %v2158_v7 = vadd.f32 %v2144_v49, %v1900_v0  ;;  %v2092_v2 = vpop.permute.xlu0 %2091 }
 0x47e   :  { %v2119_v42 = vsel %vm773_vm11, %v2088_v53, %v2092_v2  ;;  %v4864_v53 = vperm.slane %v4825_v44, 3 }
 0x47f   :  { %v2145_v3 = vmul.f32 %v4845_v51, %v2119_v42  ;;  %v4853_v47 = vadd.f32 %v2172_v50, %v2158_v7  ;;  %v2175_v50 = vld [vmem:[#allocation2 + $0x210] sm:$0xff] }
 0x480   :  { %5595 = vst [vmem:[#allocation27_spill] sm:$0xff] %v4864_v53 }
 0x481   :  { %2200 = vrot.lane.b32.xlu2 %v4853_v47, %s3031_s21  ;;  %v2159_v6 = vadd.f32 %v2145_v3, %v1901_v54  ;;  %v4857_v40 = vpop.permute.xlu1 %2085  ;;  %v2090_v42 = vpop.permute.xlu2 %2089 }
 0x483   :  { %v4859_v4 = vadd.f32 %v2173_v1, %v2159_v6  ;;  %v4878_v6 = vperm.slane %v4825_v44, 2 }
 0x485   :  { %5596 = vst [vmem:[#allocation28_spill] sm:$0xff] %v4878_v6 }
 0x489   :  { %2274 = vrot.lane.b32.xlu2 %v4859_v4, %s3032_s2  ;;  %v2106_v13 = vpop.permute.xlu2 %2105 }
 0x48c   :  { %v2096_v59 = vpop.permute.xlu1 %2095 }
 0x48d   :  { %v2115_v0 = vsel %vm773_vm11, %v2096_v59, %v4823_v60 }
 0x48e   :  { %v2147_v49 = vmul.f32 %v4864_v53, %v2115_v0  ;;  %v2117_v0 = vsel %vm773_vm11, %v2092_v2, %v2096_v59  ;;  %v4900_v59 = vperm.slane %v4825_v44, 4 }
 0x490   :  { %v2161_v15 = vadd.f32 %v2147_v49, %v4771_v31  ;;  %v2182_v31 = vld [vmem:[#allocation2 + $0x248] sm:$0xff]  ;;  %5597 = vst [vmem:[#allocation29_spill] sm:$0xff] %v4900_v59 }
 0x492   :  { %v4871_v7 = vadd.f32 %v2175_v50, %v2161_v15  ;;  %v2146_v50 = vmul.f32 %v4878_v6, %v2117_v0  ;;  %v2122_v0 = vsel %vm773_vm11, %v4857_v40, %v2090_v42 }
 0x494   :  { %v2102_v38 = vpop.permute.xlu1 %2101  ;;  %v2098_v3 = vpop.permute.xlu0 %2097  ;;  %2282 = vrot.lane.b32.xlu1 %v4871_v7, %s3032_s2 }
 0x495   :  { %v2116_v54 = vsel %vm773_vm11, %v2098_v3, %v2102_v38 }
 0x496   :  { %v2154_v1 = vmul.f32 %v4864_v53, %v2116_v54  ;;  %v1656_v54 = vsel %vm664_vm10, %v4726_v5, %v1642_v12  ;;  %v2114_v5 = vsel %vm773_vm11, %v2102_v38, %v2106_v13  ;;  %v2181_v12 = vld [vmem:[#allocation2 + $0x240] sm:$0xff] }
 0x498   :  { %v2168_v49 = vadd.f32 %v2154_v1, %v4741_v52  ;;  %v2160_v52 = vadd.f32 %v2146_v50, %v4719_v45  ;;  %v1897_v45 = vmul.f32 %v4790_v43, %v4689_v26  ;;  %v2151_v50 = vmul.f32 %v4831_v29, %v2122_v0  ;;  %v2183_v0 = vld [vmem:[#allocation2 + $0x250] sm:$0xff] }
 0x49a   :  { %v4885_v15 = vadd.f32 %v2182_v31, %v2168_v49  ;;  %v2174_v31 = vld [vmem:[#allocation2 + $0x208] sm:$0xff] }
 0x49b   :  { %v4913_v21 = vadd.f32 %v2174_v31, %v2160_v52 }
 0x49c   :  { %2284 = vrot.lane.b32.xlu2 %v4885_v15, %s3032_s2  ;;  %v2094_v18 = vpop.permute.xlu0 %2093  ;;  %2270 = vrot.lane.b32.xlu1 %v4853_v47, %s3032_s2 }
 0x49d   :  { %v2118_v2 = vsel %vm773_vm11, %v2094_v18, %v2098_v3  ;;  %2214 = vrot.lane.b32.xlu0 %v4885_v15, %s3031_s21  ;;  %v1695_v3 = vmul.f32 %v4797_v37, %v1656_v54  ;;  %v2120_v31 = vsel %vm773_vm11, %v2090_v42, %v2094_v18 }
 0x49e   :  { %v2153_v1 = vmul.f32 %v4878_v6, %v2118_v2  ;;  %v2155_v2 = vmul.f32 %v4900_v59, %v2114_v5 }
 0x49f   :  { %v1911_v6 = vadd.f32 %v1897_v45, %v1695_v3  ;;  %v2185_v45 = vld [vmem:[#allocation2 + $0x260] sm:$0xff] }
 0x4a0   :  { %v2167_v49 = vadd.f32 %v2153_v1, %v4739_v24  ;;  %v2165_v24 = vadd.f32 %v2151_v50, %v4792_v23  ;;  %v2179_v1 = vld [vmem:[#allocation2 + $0x230] sm:$0xff] }
 0x4a1   :  { %v2169_v54 = vadd.f32 %v2155_v2, %v1911_v6  ;;  %v2108_v6 = vpop.permute.xlu1 %2107  ;;  %v2180_v2 = vld [vmem:[#allocation2 + $0x238] sm:$0xff] }
 0x4a2   :  { %v4916_v53 = vadd.f32 %v2181_v12, %v2167_v49  ;;  %v4932_v12 = vadd.f32 %v2179_v1, %v2165_v24  ;;  %v4938_v49 = vperm.slane %v4825_v44, 6  ;;  %v4957_v24 = vperm.slane %v4825_v44, 5  ;;  %v2176_v44 = vld [vmem:[#allocation2 + $0x218] sm:$0xff] }
 0x4a3   :  { %v4934_v3 = vadd.f32 %v2183_v0, %v2169_v54  ;;  %v2178_v0 = vld [vmem:[#allocation2 + $0x228] sm:$0xff] }
 0x4a4   :  { %2278 = vrot.lane.b32.xlu2 %v4913_v21, %s3032_s2  ;;  %v2104_v38 = vpop.permute.xlu0 %2103  ;;  %2280 = vrot.lane.b32.xlu1 %v4916_v53, %s3032_s2  ;;  %5598 = vst [vmem:[#allocation30_spill] sm:$0xff] %v4938_v49 }
 0x4a5   :  { %v2113_v26 = vsel %vm773_vm11, %v4823_v60, %v2104_v38  ;;  %2208 = vrot.lane.b32.xlu0 %v4913_v21, %s3031_s21  ;;  %v2152_v60 = vmul.f32 %v4845_v51, %v2120_v31  ;;  %5599 = vst [vmem:[#allocation31_spill] sm:$0xff] %v4957_v24  ;;  %v2111_v31 = vsel %vm773_vm11, %v2104_v38, %v2108_v6 }
 0x4a6   :  { %v2148_v52 = vmul.f32 %v4900_v59, %v2113_v26  ;;  %v2123_v26 = vsel %vm773_vm11, %v2108_v6, %v4835_v62  ;;  %v2184_v62 = vld [vmem:[#allocation2 + $0x258] sm:$0xff] }
 0x4a7   :  { %v2166_v42 = vadd.f32 %v2152_v60, %v4769_v41  ;;  %v2150_v41 = vmul.f32 %v4938_v49, %v2123_v26 }
 0x4a8   :  { %v2162_v5 = vadd.f32 %v2148_v52, %v4816_v16 }
 0x4a9   :  { %v4963_v1 = vadd.f32 %v2180_v2, %v2166_v42 }
 0x4aa   :  { %v4976_v60 = vadd.f32 %v2176_v44, %v2162_v5 }
 0x4ac   :  { %2272 = vrot.lane.b32.xlu2 %v4932_v12, %s3032_s2  ;;  %2218 = vrot.lane.b32.xlu1 %v4934_v3, %s3031_s21  ;;  %v2110_v23 = vpop.permute.xlu0 %2109 }
 0x4ad   :  { %2202 = vrot.lane.b32.xlu0 %v4932_v12, %s3031_s21  ;;  %v2124_v18 = vsel %vm773_vm11, %v2110_v23, %v4857_v40  ;;  %v2112_v50 = vsel %vm773_vm11, %v2106_v13, %v2110_v23 }
 0x4ae   :  { %v2157_v16 = vmul.f32 %v4938_v49, %v2124_v18  ;;  %v2156_v40 = vmul.f32 %v4957_v24, %v2112_v50 }
 0x4b0   :  { %v2171_v54 = vadd.f32 %v2157_v16, %v4794_v27  ;;  %v2170_v13 = vadd.f32 %v2156_v40, %v4821_v58  ;;  %v2164_v27 = vadd.f32 %v2150_v41, %v4752_v9  ;;  %v2149_v16 = vmul.f32 %v4957_v24, %v2111_v31  ;;  %v2177_v58 = vld [vmem:[#allocation2 + $0x220] sm:$0xff] }
 0x4b2   :  { %v4961_v52 = vadd.f32 %v2185_v45, %v2171_v54  ;;  %v4978_v23 = vadd.f32 %v2184_v62, %v2170_v13  ;;  %v4980_v18 = vadd.f32 %v2178_v0, %v2164_v27  ;;  %v2163_v9 = vadd.f32 %v2149_v16, %v4818_v46 }
 0x4b3   :  { %v5036_v62 = vmul.f32 %v4916_v53, %v4195_v28  ;;  %v5041_v0 = vmul.f32 %v4913_v21, %v4195_v28 }
 0x4b4   :  { %2210 = vrot.lane.b32.xlu2 %v4916_v53, %s3031_s21  ;;  %2226 = vrot.lane.b32.xlu1 %v4961_v52, %s3031_s21  ;;  %v4990_v38 = vadd.f32 %v2177_v58, %v2163_v9 }
 0x4b5   :  { %2276 = vrot.lane.b32.xlu0 %v4963_v1, %s3032_s2 }
 0x4bc   :  { %2286 = vrot.lane.b32.xlu2 %v4976_v60, %s3032_s2  ;;  %2292 = vrot.lane.b32.xlu1 %v4978_v23, %s3032_s2 }
 0x4bd   :  { %2224 = vrot.lane.b32.xlu0 %v4980_v18, %s3031_s21 }
 0x4c4   :  { %2216 = vrot.lane.b32.xlu2 %v4976_v60, %s3031_s21  ;;  %2212 = vrot.lane.b32.xlu1 %v4871_v7, %s3031_s21 }
 0x4c5   :  { %2290 = vrot.lane.b32.xlu0 %v4990_v38, %s3032_s2 }
 0x4cc   :  { %2204 = vrot.lane.b32.xlu2 %v4859_v4, %s3031_s21  ;;  %2296 = vrot.lane.b32.xlu1 %v4961_v52, %s3032_s2 }
 0x4cd   :  { %2288 = vrot.lane.b32.xlu0 %v4934_v3, %s3032_s2 }
 0x4d4   :  { %2220 = vrot.lane.b32.xlu2 %v4990_v38, %s3031_s21  ;;  %2222 = vrot.lane.b32.xlu1 %v4978_v23, %s3031_s21 }
 0x4d5   :  { %2206 = vrot.lane.b32.xlu0 %v4963_v1, %s3031_s21 }
 0x4db   :  { %v5012_v46 = vpop.permute.xlu2 %2200 }
 0x4dd   :  { %2294 = vrot.lane.b32.xlu0 %v4980_v18, %s3032_s2 }
 0x4e3   :  { %v2275_v5 = vpop.permute.xlu2 %2274 }
 0x4f6   :  { %v2285_v42 = vpop.permute.xlu2 %2284 }
 0x4fe   :  { %v2279_v2 = vpop.permute.xlu2 %2278 }
 0x4ff   :  { %v2306_v58 = vsel %vm392_vm6, %v2275_v5, %v2279_v2 }
 0x506   :  { %v2283_v6 = vpop.permute.xlu1 %2282  ;;  %v5031_v44 = vpop.permute.xlu2 %2272 }
 0x507   :  { %v2304_v54 = vsel %vm392_vm6, %v2279_v2, %v2283_v6  ;;  %v5069_v2 = vmul.f32 %v2306_v58, %v4159_v11  ;;  %v5095_v58 = vmul.f32 %v4859_v4, %v4175_v56 }
 0x508   :  { %v5028_v27 = vmul.f32 %v2304_v54, %v4147_v33 }
 0x50e   :  { %v5014_v45 = vpop.permute.xlu1 %2270  ;;  %v5048_v16 = vpop.permute.xlu2 %2210 }
 0x50f   :  { %v5016_v50 = vpop.permute.xlu0 %2214  ;;  %v2308_v28 = vsel %vm392_vm6, %v5014_v45, %v2275_v5  ;;  %v5079_v5 = vmul.f32 %v4963_v1, %v4175_v56 }
 0x516   :  { %v2281_v26 = vpop.permute.xlu1 %2280  ;;  %v2287_v1 = vpop.permute.xlu2 %2286 }
 0x517   :  { %v2305_v40 = vsel %vm392_vm6, %v2281_v26, %v2285_v42  ;;  %v5022_v41 = vpop.permute.xlu0 %2208  ;;  %v2302_v43 = vsel %vm392_vm6, %v2283_v6, %v2287_v1 }
 0x518   :  { %v5025_v13 = vmul.f32 %v2305_v40, %v4147_v33  ;;  %v5137_v17 = vmul.f32 %v2302_v43, %v5602_v20 }
 0x51a   :  { %2380 = vmatpush.msrb.mxu1 %v5025_v13 }
 0x51c   :  { %2381 = vmatpush.msrb.mxu1 %v5028_v27 }
 0x51e   :  { %2382 = vmatpush.msrb.mxu1 %v5036_v62  ;;  %v5045_v33 = vpop.permute.xlu1 %2218  ;;  %v5120_v29 = vpop.permute.xlu2 %2216 }
 0x51f   :  { %v5043_v31 = vpop.permute.xlu0 %2202 }
 0x520   :  { %2383 = vmatpush.msrb.mxu1 %v5041_v0 }
 0x526   :  { %v5063_v40 = vpop.permute.xlu1 %2226 }
 0x527   :  { %v2277_v9 = vpop.permute.xlu0 %2276 }
 0x528   :  { %v2307_v53 = vsel %vm392_vm6, %v2277_v9, %v2281_v26  ;;  %v2309_v21 = vsel %vm392_vm6, %v5031_v44, %v2277_v9  ;;  %v5073_v26 = vmul.f32 %v2308_v28, %v4220_v63  ;;  %v5600_v9 = vld [vmem:[#allocation6_spill] sm:$0xff] }
 0x529   :  { %v5061_v54 = vmul.f32 %v2307_v53, %v4159_v11  ;;  %v5066_v49 = vmul.f32 %v2309_v21, %v4220_v63  ;;  %v5084_v53 = vmul.f32 %v4932_v12, %v5600_v9  ;;  %v2241_v11 = vsel %vm318_vm3, %v5063_v40, %v5043_v31  ;;  %v5601_v21 = vld [vmem:[#allocation8_spill] sm:$0xff] }
 0x52a   :  { %v5100_v12 = vmul.f32 %v4853_v47, %v5600_v9  ;;  %v5108_v24 = vmul.f32 %v2241_v11, %v5601_v21  ;;  %v5115_v47 = vld [vmem:[#allocation2 + $0x460] ss:$0 sm:$0xff] }
 0x52b   :  { %2360 = vmatpush.msrb.mxu0 %v5061_v54  ;;  %2340 = vmatpush.msra.mxu3 %v5066_v49 }
 0x52d   :  { %2361 = vmatpush.msrb.mxu0 %v5069_v2  ;;  %2341 = vmatpush.msra.mxu3 %v5073_v26 }
 0x52e   :  { %v2293_v4 = vpop.permute.xlu1 %2292 }
 0x52f   :  { %2362 = vmatpush.msrb.mxu0 %v5079_v5  ;;  %v5091_v63 = vpop.permute.xlu0 %2224  ;;  %2342 = vmatpush.msra.mxu3 %v5084_v53 }
 0x530   :  { %v2240_v28 = vsel %vm318_vm3, %v5091_v63, %v5012_v46 }
 0x531   :  { %2363 = vmatpush.msrb.mxu0 %v5095_v58  ;;  %2343 = vmatpush.msra.mxu3 %v5100_v12  ;;  %v5112_v56 = vmul.f32 %v2240_v28, %v5601_v21 }
 0x533   :  { %2344 = vmatpush.msra.mxu3 %v5108_v24 }
 0x535   :  { %2345 = vmatpush.msra.mxu3 %v5112_v56 }
 0x536   :  { %2971 = vmatmul.msk.f32.vlgmr.msra.gmra.mxu3 %vm1455_vm14, %v5115_v47  ;;  %v2213_v11 = vpop.permute.xlu1 %2212 }
 0x537   :  { %v2291_v9 = vpop.permute.xlu0 %2290 }
 0x538   :  { %v2300_v28 = vsel %vm392_vm6, %v2287_v1, %v2291_v9  ;;  %v2205_v1 = vpop.permute.xlu2 %2204 }
 0x539   :  { %v5140_v6 = vmul.f32 %v2300_v28, %v5603_v35  ;;  %v2235_v28 = vsel %vm318_vm3, %v5048_v16, %v5016_v50 }
 0x53f   :  { %v2289_v59 = vpop.permute.xlu0 %2288 }
 0x540   :  { %v2301_v21 = vsel %vm392_vm6, %v2289_v59, %v2293_v4  ;;  %v2303_v51 = vsel %vm392_vm6, %v2285_v42, %v2289_v59  ;;  %v5605_v42 = vld [vmem:[#allocation11_spill] sm:$0xff] }
 0x541   :  { %v5131_v57 = vmul.f32 %v2303_v51, %v5602_v20  ;;  %v5134_v37 = vmul.f32 %v2301_v21, %v5603_v35  ;;  %v5604_v51 = vld [vmem:[#allocation10_spill] sm:$0xff]  ;;  %v5152_v20 = vmul.f32 %v4934_v3, %v5605_v42  ;;  %v5160_v35 = vmul.f32 %v4976_v60, %v5605_v42 }
 0x542   :  { %v5148_v59 = vmul.f32 %v4885_v15, %v5604_v51  ;;  %v5156_v43 = vmul.f32 %v4871_v7, %v5604_v51  ;;  %v2233_v15 = vsel %vm318_vm3, %v5016_v50, %v5045_v33  ;;  %v2238_v3 = vsel %vm318_vm3, %v5012_v46, %v2205_v1  ;;  %v2297_v51 = vpop.permute.xlu1 %2296 }
 0x543   :  { %2400 = vmatpush.msrb.mxu2 %v5131_v57  ;;  %2420 = vmatpush.msrb.mxu3 %v5134_v37  ;;  %v2236_v60 = vsel %vm318_vm3, %v2205_v1, %v5022_v41  ;;  %v2232_v21 = vsel %vm318_vm3, %v2213_v11, %v5120_v29  ;;  %v2234_v42 = vsel %vm318_vm3, %v5022_v41, %v2213_v11 }
 0x544   :  { %v5202_v34 = vmul.f32 %v2233_v15, %v4339_v25  ;;  %v5208_v41 = vmul.f32 %v2236_v60, %v4370_v8  ;;  %v2299_v11 = vsel %vm392_vm6, %v2293_v4, %v2297_v51 }
 0x545   :  { %2401 = vmatpush.msrb.mxu2 %v5137_v17  ;;  %2421 = vmatpush.msrb.mxu3 %v5140_v6 }
 0x547   :  { %2402 = vmatpush.msrb.mxu2 %v5148_v59  ;;  %v2207_v7 = vpop.permute.xlu0 %2206  ;;  %2422 = vmatpush.msrb.mxu3 %v5152_v20 }
 0x548   :  { %v2237_v50 = vsel %vm318_vm3, %v2207_v7, %v5048_v16  ;;  %v2239_v46 = vsel %vm318_vm3, %v5043_v31, %v2207_v7  ;;  %v5199_v16 = vmul.f32 %v2235_v28, %v4367_v32  ;;  %v5205_v31 = vmul.f32 %v2238_v3, %v5606_v36 }
 0x549   :  { %v5191_v48 = vmul.f32 %v2239_v46, %v5606_v36  ;;  %v5194_v1 = vmul.f32 %v2237_v50, %v4370_v8  ;;  %2403 = vmatpush.msrb.mxu2 %v5156_v43  ;;  %2423 = vmatpush.msrb.mxu3 %v5160_v35  ;;  %v2311_v7 = vsel %vm392_vm6, %v2297_v51, %v5031_v44  ;;  %v5607_v44 = vld [vmem:[#allocation12_spill] sm:$0xff] }
 0x54a   :  { %v5218_v28 = vmul.f32 %v2234_v42, %v4367_v32  ;;  %v5221_v36 = vmul.f32 %v2232_v21, %v4339_v25  ;;  %v5228_v8 = vmul.f32 %v2299_v11, %v4408_v39  ;;  %v5231_v4 = vmul.f32 %v2311_v7, %v5607_v44  ;;  %v2223_v21 = vpop.permute.xlu1 %2222  ;;  %v5608_v7 = vld [vmem:[#allocation13_spill] sm:$0xff] }
 0x54b   :  { %2364 = vmatpush.msrb.mxu0 %v5191_v48  ;;  %2384 = vmatpush.msrb.mxu1 %v5194_v1  ;;  %v2229_v51 = vsel %vm318_vm3, %v2223_v21, %v5063_v40  ;;  %v2231_v50 = vsel %vm318_vm3, %v5045_v33, %v2223_v21 }
 0x54c   :  { %2404 = vmatpush.msrb.mxu2 %v5199_v16  ;;  %2424 = vmatpush.msrb.mxu3 %v5202_v34  ;;  %v5297_v46 = vmul.f32 %v2231_v50, %v4473_v55 }
 0x54d   :  { %2365 = vmatpush.msrb.mxu0 %v5205_v31  ;;  %2385 = vmatpush.msrb.mxu1 %v5208_v41 }
 0x54e   :  { %2405 = vmatpush.msrb.mxu2 %v5218_v28  ;;  %2425 = vmatpush.msrb.mxu3 %v5221_v36 }
 0x54f   :  { %2972 = vmatmul.msk.f32.vlgmr.msrb.gmra.mxu0 %vm1455_vm14, %v5115_v47  ;;  %2974 = vmatmul.msk.f32.vlgmr.msrb.gmra.mxu2 %vm1455_vm14, %v5115_v47  ;;  %v2295_v25 = vpop.permute.xlu0 %2294 }
 0x550   :  { %2440 = vmatpush.msra.mxu0 %v5228_v8  ;;  %2460 = vmatpush.msra.mxu1 %v5231_v4  ;;  %v2298_v32 = vsel %vm392_vm6, %v2291_v9, %v2295_v25  ;;  %v2310_v15 = vsel %vm392_vm6, %v2295_v25, %v5014_v45  ;;  %v2221_v45 = vpop.permute.xlu2 %2220  ;;  %v5268_v9 = vmul.f32 %v4961_v52, %v4464_v19  ;;  %v2837_v25 = vld [vmem:[#allocation2 + $0x268] ss:$8 sm:$0xf0] }
 0x551   :  { %2512 = vmatpush.msra.mxu2 %v5066_v49  ;;  %2532 = vmatpush.msra.mxu3 %v5061_v54  ;;  %v5249_v3 = vmul.f32 %v2298_v32, %v4408_v39  ;;  %v5252_v60 = vmul.f32 %v2310_v15, %v5607_v44  ;;  %v5264_v39 = vmul.f32 %v4978_v23, %v4459_v14 }
 0x552   :  { %2975 = vmatmul.msk.f32.vlgmr.msrb.gmra.mxu3 %vm1455_vm14, %v5115_v47  ;;  %2973 = vmatmul.msk.f32.vlgmr.msrb.gmra.mxu1 %vm1455_vm14, %v5115_v47  ;;  %v5282_v52 = vmul.f32 %v4990_v38, %v4459_v14  ;;  %v5286_v23 = vmul.f32 %v4980_v18, %v4464_v19  ;;  %v2230_v33 = vsel %vm318_vm3, %v5120_v29, %v2221_v45 }
 0x553   :  { %2513 = vmatpush.msra.mxu2 %v5073_v26  ;;  %2533 = vmatpush.msra.mxu3 %v5069_v2  ;;  %v2228_v40 = vsel %vm318_vm3, %v2221_v45, %v5091_v63  ;;  %v5300_v14 = vmul.f32 %v2229_v51, %v4483_v61  ;;  %v5309_v19 = vmul.f32 %v2230_v33, %v4473_v55  ;;  %v5325_v55 = vld [vmem:[#allocation2 + $0x461] ss:$0 sm:$0xff]  ;;  %vm2880_vm3 = vcmask 1045508  }
 0x554   :  { %2441 = vmatpush.msra.mxu0 %v5249_v3  ;;  %2461 = vmatpush.msra.mxu1 %v5252_v60  ;;  %v5312_v29 = vmul.f32 %v2228_v40, %v4483_v61  ;;  %v2656_v61 = vld [vmem:[#allocation2 + $0x462] ss:$0 sm:$0xff]  ;;  %v5613_v40 = vld [vmem:[#allocation24_spill] sm:$0xff] }
 0x555   :  { %2514 = vmatpush.msra.mxu2 %v5084_v53  ;;  %2534 = vmatpush.msra.mxu3 %v5079_v5 }
 0x556   :  { %2442 = vmatpush.msra.mxu0 %v5264_v39  ;;  %2462 = vmatpush.msra.mxu1 %v5268_v9 }
 0x557   :  { %2515 = vmatpush.msra.mxu2 %v5100_v12  ;;  %2535 = vmatpush.msra.mxu3 %v5095_v58 }
 0x558   :  { %2443 = vmatpush.msra.mxu0 %v5282_v52  ;;  %2463 = vmatpush.msra.mxu1 %v5286_v23 }
 0x559   :  { %2516 = vmatpush.msra.mxu2 %v5108_v24  ;;  %2536 = vmatpush.msra.mxu3 %v5191_v48 }
 0x55a   :  { %2444 = vmatpush.msra.mxu0 %v5297_v46  ;;  %2464 = vmatpush.msra.mxu1 %v5300_v14 }
 0x55b   :  { %2517 = vmatpush.msra.mxu2 %v5112_v56  ;;  %2537 = vmatpush.msra.mxu3 %v5205_v31 }
 0x55c   :  { %2445 = vmatpush.msra.mxu0 %v5309_v19  ;;  %2465 = vmatpush.msra.mxu1 %v5312_v29 }
 0x55d   :  { %2592 = vmatpush.msrb.mxu2 %v5134_v37  ;;  %2612 = vmatpush.msrb.mxu3 %v5228_v8 }
 0x55e   :  { %2977 = vmatmul.msk.f32.vlgmr.msra.gmra.mxu1 %vm1455_vm14, %v5115_v47  ;;  %2552 = vmatpush.msrb.mxu0 %v5025_v13 }
 0x55f   :  { %2593 = vmatpush.msrb.mxu2 %v5140_v6  ;;  %2613 = vmatpush.msrb.mxu3 %v5249_v3 }
 0x560   :  { %2572 = vmatpush.msrb.mxu1 %v5131_v57  ;;  %2553 = vmatpush.msrb.mxu0 %v5028_v27 }
 0x561   :  { %2594 = vmatpush.msrb.mxu2 %v5152_v20  ;;  %2614 = vmatpush.msrb.mxu3 %v5264_v39 }
 0x562   :  { %2573 = vmatpush.msrb.mxu1 %v5137_v17  ;;  %2978 = vmatmul.msk.f32.vlgmr.msra.gmra.mxu2 %vm1455_vm14, %v5325_v55 }
 0x563   :  { %2595 = vmatpush.msrb.mxu2 %v5160_v35  ;;  %2615 = vmatpush.msrb.mxu3 %v5282_v52 }
 0x564   :  { %2554 = vmatpush.msrb.mxu0 %v5036_v62  ;;  %2574 = vmatpush.msrb.mxu1 %v5148_v59 }
 0x565   :  { %2596 = vmatpush.msrb.mxu2 %v5202_v34  ;;  %2616 = vmatpush.msrb.mxu3 %v5297_v46 }
 0x566   :  { %2555 = vmatpush.msrb.mxu0 %v5041_v0  ;;  %2575 = vmatpush.msrb.mxu1 %v5156_v43 }
 0x567   :  { %2597 = vmatpush.msrb.mxu2 %v5221_v36  ;;  %2617 = vmatpush.msrb.mxu3 %v5309_v19 }
 0x568   :  { %2979 = vmatmul.msk.f32.vlgmr.msra.gmra.mxu3 %vm1455_vm14, %v5325_v55  ;;  %2556 = vmatpush.msrb.mxu0 %v5194_v1 }
 0x569   :  { %2576 = vmatpush.msrb.mxu1 %v5199_v16  ;;  %2690 = vmatpush.msra.mxu2 %v5061_v54 }
 0x56a   :  { %2710 = vmatpush.msra.mxu3 %v5025_v13  ;;  %2976 = vmatmul.msk.f32.vlgmr.msra.gmra.mxu0 %vm1455_vm14, %v5115_v47 }
 0x56b   :  { %2557 = vmatpush.msrb.mxu0 %v5208_v41  ;;  %2577 = vmatpush.msrb.mxu1 %v5218_v28 }
 0x56c   :  { %2691 = vmatpush.msra.mxu2 %v5069_v2  ;;  %2711 = vmatpush.msra.mxu3 %v5028_v27 }
 0x56d   :  { %2982 = vmatmul.msk.f32.vlgmr.msrb.gmra.mxu2 %vm1455_vm14, %v5325_v55  ;;  %2632 = vmatpush.msra.mxu0 %v5231_v4 }
 0x56e   :  { %2670 = vmatpush.msra.mxu1 %v5066_v49  ;;  %2692 = vmatpush.msra.mxu2 %v5079_v5 }
 0x56f   :  { %2712 = vmatpush.msra.mxu3 %v5036_v62  ;;  %2633 = vmatpush.msra.mxu0 %v5252_v60 }
 0x570   :  { %2671 = vmatpush.msra.mxu1 %v5073_v26  ;;  %2693 = vmatpush.msra.mxu2 %v5095_v58 }
 0x571   :  { %2713 = vmatpush.msra.mxu3 %v5041_v0  ;;  %2634 = vmatpush.msra.mxu0 %v5268_v9 }
 0x572   :  { %2672 = vmatpush.msra.mxu1 %v5084_v53  ;;  %2694 = vmatpush.msra.mxu2 %v5191_v48 }
 0x573   :  { %2714 = vmatpush.msra.mxu3 %v5194_v1  ;;  %2980 = vmatmul.msk.f32.vlgmr.msrb.gmra.mxu0 %vm1455_vm14, %v5325_v55 }
 0x574   :  { %2981 = vmatmul.msk.f32.vlgmr.msrb.gmra.mxu1 %vm1455_vm14, %v5325_v55  ;;  %2635 = vmatpush.msra.mxu0 %v5286_v23 }
 0x575   :  { %2673 = vmatpush.msra.mxu1 %v5100_v12  ;;  %2695 = vmatpush.msra.mxu2 %v5205_v31 }
 0x576   :  { %2715 = vmatpush.msra.mxu3 %v5208_v41  ;;  %2636 = vmatpush.msra.mxu0 %v5300_v14 }
 0x577   :  { %2983 = vmatmul.msk.f32.vlgmr.msrb.gmra.mxu3 %vm1455_vm14, %v5325_v55  ;;  %2674 = vmatpush.msra.mxu1 %v5108_v24 }
 0x578   :  { %2986 = vmatmul.msk.f32.vlgmr.msra.gmra.mxu2 %vm1455_vm14, %v2656_v61  ;;  %2790 = vmatpush.msrb.mxu3 %v5231_v4  ;;  %v2836_v4 = vld [vmem:[#allocation2 + $0x268] ss:$8 sm:$0xf] }
 0x579   :  { %2770 = vmatpush.msrb.mxu2 %v5228_v8  ;;  %2637 = vmatpush.msra.mxu0 %v5312_v29 }
 0x57a   :  { %2675 = vmatpush.msra.mxu1 %v5112_v56  ;;  %2791 = vmatpush.msrb.mxu3 %v5252_v60 }
 0x57b   :  { %2771 = vmatpush.msrb.mxu2 %v5249_v3  ;;  %2730 = vmatpush.msrb.mxu0 %v5131_v57  ;;  %v5610_v3 = vld [vmem:[#allocation17_spill] sm:$0xff] }
 0x57c   :  { %2750 = vmatpush.msrb.mxu1 %v5134_v37  ;;  %2792 = vmatpush.msrb.mxu3 %v5268_v9 }
 0x57d   :  { %2772 = vmatpush.msrb.mxu2 %v5264_v39  ;;  %2731 = vmatpush.msrb.mxu0 %v5137_v17  ;;  %v5611_v39 = vld [vmem:[#allocation18_spill] sm:$0xff] }
 0x57e   :  { %2751 = vmatpush.msrb.mxu1 %v5140_v6  ;;  %2984 = vmatmul.msk.f32.vlgmr.msra.gmra.mxu0 %vm1455_vm14, %v5325_v55 }
 0x57f   :  { %2985 = vmatmul.msk.f32.vlgmr.msra.gmra.mxu1 %vm1455_vm14, %v2656_v61  ;;  %2773 = vmatpush.msrb.mxu2 %v5282_v52  ;;  %v2838_v52 = vor.u32 %v2837_v25, %v2836_v4 }
 0x580   :  { %2793 = vmatpush.msrb.mxu3 %v5286_v23  ;;  %2732 = vmatpush.msrb.mxu0 %v5148_v59  ;;  %v5612_v23 = vld [vmem:[#allocation23_spill] sm:$0xff] }
 0x581   :  { %2752 = vmatpush.msrb.mxu1 %v5152_v20  ;;  %2987 = vmatmul.msk.f32.vlgmr.msra.gmra.mxu3 %vm1455_vm14, %v2656_v61 }
 0x582   :  { %2774 = vmatpush.msrb.mxu2 %v5297_v46  ;;  %2794 = vmatpush.msrb.mxu3 %v5300_v14  ;;  %v5614_v14 = vld [vmem:[#allocation20_spill] sm:$0xff] }
 0x583   :  { %2733 = vmatpush.msrb.mxu0 %v5156_v43  ;;  %2753 = vmatpush.msrb.mxu1 %v5160_v35 }
 0x584   :  { %2775 = vmatpush.msrb.mxu2 %v5309_v19  ;;  %2795 = vmatpush.msrb.mxu3 %v5312_v29  ;;  %v5615_v29 = vld [vmem:[#allocation16_spill] sm:$0xff] }
 0x585   :  { %2734 = vmatpush.msrb.mxu0 %v5199_v16  ;;  %2754 = vmatpush.msrb.mxu1 %v5202_v34 }
 0x586   :  { %2990 = vmatmul.msk.f32.vlgmr.msrb.gmra.mxu2 %vm1455_vm14, %v2656_v61 }
 0x587   :  { %2735 = vmatpush.msrb.mxu0 %v5218_v28  ;;  %2755 = vmatpush.msrb.mxu1 %v5221_v36  ;;  %v5609_v36 = vld [vmem:[#allocation14_spill] sm:$0xff] }
 0x588   :  { %2988 = vmatmul.msk.f32.vlgmr.msrb.gmra.mxu0 %vm1455_vm14, %v2656_v61  ;;  %2989 = vmatmul.msk.f32.vlgmr.msrb.gmra.mxu1 %vm1455_vm14, %v2656_v61 }
 0x589   :  { %2991 = vmatmul.msk.f32.vlgmr.msrb.gmra.mxu3 %vm1455_vm14, %v2656_v61 }
 0x5b9   :  { %v2347_v48 = vpop.f32.mrf.mxu3 }
 0x5ba   :  { %2470 = vrot.lane.b32.xlu0 %v2347_v48, %s3036_s25 }
 0x5cc   :  { %v2367_v17 = vpop.f32.mrf.mxu0 }
 0x5cd   :  { %2472 = vrot.lane.b32.xlu1 %v2367_v17, %s3036_s25  ;;  %v5616_v17 = vld [vmem:[#allocation26_spill] sm:$0xff] }
 0x5cf   :  { %v2387_v57 = vpop.f32.mrf.mxu1 }
 0x5d0   :  { %2474 = vrot.lane.b32.xlu2 %v2387_v57, %s3036_s25 }
 0x5d2   :  { %v2407_v34 = vpop.f32.mrf.mxu2 }
 0x5d3   :  { %2476 = vrot.lane.b32.xlu0 %v2407_v34, %s3036_s25 }
 0x5d5   :  { %v2427_v37 = vpop.f32.mrf.mxu3 }
 0x5d6   :  { %2478 = vrot.lane.b32.xlu1 %v2427_v37, %s3036_s25 }
 0x5db   :  { %v2467_v49 = vpop.f32.mrf.mxu1 }
 0x5dc   :  { %2482 = vrot.lane.b32.xlu0 %v2467_v49, %s3036_s25 }
 0x5e5   :  { %v5423_v18 = vpop.f32.mrf.mxu2 }
 0x5e7   :  { %v2447_v24 = vpop.f32.mrf.mxu0 }
 0x5e8   :  { %2480 = vrot.lane.b32.xlu2 %v2447_v24, %s3036_s25  ;;  %v2842_v24 = vperm.slane %v2838_v52, 2 }
 0x5eb   :  { %v2539_v38 = vpop.f32.mrf.mxu3 }
 0x5ec   :  { %v2643_v60 = vmul.f32 %v2539_v38, %v5610_v3  ;;  %v2843_v38 = vperm.slane %v2838_v52, 3 }
 0x5f0   :  { %v2559_v13 = vpop.f32.mrf.mxu0  ;;  %v2599_v27 = vpop.f32.mrf.mxu2 }
 0x5f1   :  { %v2579_v62 = vpop.f32.mrf.mxu1  ;;  %v2644_v28 = vmul.f32 %v2559_v13, %v5608_v7  ;;  %v5617_v13 = vld [vmem:[#allocation28_spill] sm:$0xff] }
 0x5f2   :  { %v2645_v8 = vmul.f32 %v2579_v62, %v5609_v36 }
 0x5fa   :  { %v2619_v0 = vpop.f32.mrf.mxu3 }
 0x5fb   :  { %v2639_v54 = vpop.f32.mrf.mxu0  ;;  %v2697_v2 = vpop.f32.mrf.mxu2 }
 0x5fc   :  { %v2677_v26 = vpop.f32.mrf.mxu1  ;;  %2802 = vrot.lane.b32.xlu1 %v2697_v2, %s3035_s24  ;;  %v5618_v2 = vld [vmem:[#allocation27_spill] sm:$0xff] }
 0x604   :  { %v2717_v5 = vpop.f32.mrf.mxu3 }
 0x605   :  { %v2737_v53 = vpop.f32.mrf.mxu0  ;;  %v2757_v63 = vpop.f32.mrf.mxu1  ;;  %2804 = vrot.lane.b32.xlu2 %v2717_v5, %s3035_s24  ;;  %v5619_v5 = vld [vmem:[#allocation19_spill] sm:$0xff] }
 0x606   :  { %2808 = vrot.lane.b32.xlu1 %v2757_v63, %s3035_s24  ;;  %2806 = vrot.lane.b32.xlu0 %v2737_v53, %s3035_s24  ;;  %v2642_v53 = vmul.f32 %v5423_v18, %v5619_v5  ;;  %v5620_v63 = vld [vmem:[#allocation22_spill] sm:$0xff]  ;;  %v2844_v18 = vperm.slane %v2838_v52, 4 }
 0x609   :  { %v2777_v58 = vpop.f32.mrf.mxu2 }
 0x60c   :  { %v2797_v12 = vpop.f32.mrf.mxu3 }
 0x60d   :  { %2810 = vrot.lane.b32.xlu2 %v2777_v58, %s3035_s24  ;;  %v2646_v58 = vmul.f32 %v2599_v27, %v5620_v63  ;;  %v2840_v27 = vperm.slane %v2838_v52, 0 }
 0x60e   :  { %2800 = vrot.lane.b32.xlu1 %v2677_v26, %s3035_s24  ;;  %2812 = vrot.lane.b32.xlu0 %v2797_v12, %s3035_s24  ;;  %v5621_v12 = vld [vmem:[#allocation21_spill] sm:$0xff] }
 0x62a   :  { %v2475_v56 = vpop.permute.xlu2 %2474 }
 0x62c   :  { %v2471_v47 = vpop.permute.xlu0 %2470 }
 0x63f   :  { %v2473_v6 = vpop.permute.xlu1 %2472 }
 0x640   :  { %v2488_v1 = vsel %vm664_vm10, %v2473_v6, %v2475_v56  ;;  %v2489_v44 = vsel %vm664_vm10, %v2471_v47, %v2473_v6  ;;  %v5622_v6 = vld [vmem:[#allocation15_spill] sm:$0xff] }
 0x641   :  { %v2493_v41 = vmul.f32 %v2488_v1, %v4709_v22  ;;  %v2492_v9 = vmul.f32 %v2489_v44, %v5611_v39  ;;  %v2845_v44 = vperm.slane %v2838_v52, 5  ;;  %v5624_v39 = vld [vmem:[#allocation25_spill] sm:$0xff] }
 0x642   :  { %v2481_v59 = vpop.permute.xlu2 %2480 }
 0x643   :  { %v2651_v51 = vadd.f32 %v2644_v28, %v2493_v41  ;;  %v2841_v41 = vperm.slane %v2838_v52, 1 }
 0x645   :  { %v2477_v20 = vpop.permute.xlu0 %2476 }
 0x646   :  { %v2487_v16 = vsel %vm664_vm10, %v2475_v56, %v2477_v20  ;;  %v2647_v56 = vmul.f32 %v2619_v0, %v5621_v12 }
 0x647   :  { %v2494_v11 = vmul.f32 %v2487_v16, %v4724_v30 }
 0x648   :  { %v2479_v43 = vpop.permute.xlu1 %2478 }
 0x649   :  { %v2485_v32 = vsel %vm664_vm10, %v2479_v43, %v2481_v59  ;;  %v2486_v15 = vsel %vm664_vm10, %v2477_v20, %v2479_v43  ;;  %v2652_v50 = vadd.f32 %v2645_v8, %v2494_v11  ;;  %v5623_v20 = vld [vmem:[#allocation29_spill] sm:$0xff] }
 0x64a   :  { %v2495_v33 = vmul.f32 %v2486_v15, %v5612_v23  ;;  %v2496_v46 = vmul.f32 %v2485_v32, %v5613_v40  ;;  %v2846_v32 = vperm.slane %v2838_v52, 6  ;;  %v5626_v23 = vld [vmem:[#allocation30_spill] sm:$0xff] }
 0x64c   :  { %v2653_v16 = vadd.f32 %v2646_v58, %v2495_v33 }
 0x64e   :  { %v2483_v31 = vpop.permute.xlu0 %2482 }
 0x64f   :  { %v2484_v22 = vsel %vm664_vm10, %v2481_v59, %v2483_v31  ;;  %v2490_v30 = vsel %vm664_vm10, %v2483_v31, %v2471_v47  ;;  %v2650_v47 = vadd.f32 %v2643_v60, %v2492_v9  ;;  %v2648_v59 = vmul.f32 %v2639_v54, %v5622_v6 }
 0x650   :  { %v2491_v19 = vmul.f32 %v2490_v30, %v5614_v14  ;;  %v2497_v55 = vmul.f32 %v2484_v22, %v5615_v29  ;;  %v2654_v31 = vadd.f32 %v2647_v56, %v2496_v46 }
 0x652   :  { %v2649_v7 = vadd.f32 %v2642_v53, %v2491_v19  ;;  %v2655_v28 = vadd.f32 %v2648_v59, %v2497_v55 }
 0x65f   :  { %v2805_v35 = vpop.permute.xlu2 %2804 }
 0x667   :  { %v2811_v45 = vpop.permute.xlu2 %2810 }
 0x66e   :  { %v5433_v42 = vpop.permute.xlu1 %2802 }
 0x66f   :  { %v2818_v21 = vsel %vm773_vm11, %v5433_v42, %v2805_v35 }
 0x670   :  { %v2822_v57 = vmul.f32 %v2818_v21, %v5616_v17 }
 0x672   :  { %v2829_v11 = vadd.f32 %v2822_v57, %v2650_v47  ;;  %v5627_v57 = vlaneseq }
 0x674   :  { %v2855_v22 = vadd.f32 %v2841_v41, %v2829_v11  ;;  %vm2886_vm4 = vcmp.lt.s32.totalorder %v5627_v57, 896 }
 0x676   :  { %v2868_v19 = vrot.slane %v2855_v22, 7 }
 0x678   :  { %v2809_v61 = vpop.permute.xlu1 %2808  ;;  %v2807_v48 = vpop.permute.xlu0 %2806 }
 0x679   :  { %v2815_v34 = vsel %vm773_vm11, %v2809_v61, %v2811_v45  ;;  %v2816_v37 = vsel %vm773_vm11, %v2807_v48, %v2809_v61  ;;  %v2817_v49 = vsel %vm773_vm11, %v2805_v35, %v2807_v48 }
 0x67a   :  { %v2823_v62 = vmul.f32 %v2817_v49, %v5617_v13  ;;  %v2824_v26 = vmul.f32 %v2816_v37, %v5618_v2  ;;  %v2825_v43 = vmul.f32 %v2815_v34, %v5623_v20 }
 0x67c   :  { %v2830_v1 = vadd.f32 %v2823_v62, %v2651_v51  ;;  %v2831_v35 = vadd.f32 %v2824_v26, %v2652_v50  ;;  %v2832_v0 = vadd.f32 %v2825_v43, %v2653_v16  ;;  %v5625_v51 = vld [vmem:[#allocation31_spill] sm:$0xff] }
 0x67e   :  { %v2856_v36 = vadd.f32 %v2842_v24, %v2830_v1  ;;  %v2857_v8 = vadd.f32 %v2843_v38, %v2831_v35  ;;  %v2858_v52 = vadd.f32 %v2844_v18, %v2832_v0 }
 0x680   :  { %v2869_v4 = vrot.slane %v2856_v36, 6  ;;  %v2870_v25 = vrot.slane %v2857_v8, 5  ;;  %v2801_v54 = vpop.permute.xlu1 %2800  ;;  %v2813_v15 = vpop.permute.xlu0 %2812 }
 0x681   :  { %v2819_v30 = vsel %vm773_vm11, %v2801_v54, %v5433_v42  ;;  %v2814_v3 = vsel %vm773_vm11, %v2811_v45, %v2813_v15  ;;  %v2820_v60 = vsel %vm773_vm11, %v2813_v15, %v2801_v54  ;;  %v2871_v45 = vrot.slane %v2858_v52, 4 }
 0x682   :  { %v2876_v21 = vsel %vm2875_vm15, %v2869_v4, %v2870_v25  ;;  %v2821_v9 = vmul.f32 %v2819_v30, %v5624_v39  ;;  %v2826_v50 = vmul.f32 %v2814_v3, %v5625_v51  ;;  %v2827_v33 = vmul.f32 %v2820_v60, %v5626_v23 }
 0x684   :  { %v2828_v40 = vadd.f32 %v2821_v9, %v2649_v7  ;;  %v2833_v46 = vadd.f32 %v2826_v50, %v2654_v31  ;;  %v2834_v14 = vadd.f32 %v2827_v33, %v2655_v28 }
 0x686   :  { %v2854_v29 = vadd.f32 %v2840_v27, %v2828_v40  ;;  %v2859_v42 = vadd.f32 %v2845_v44, %v2833_v46  ;;  %v2860_v55 = vadd.f32 %v2846_v32, %v2834_v14 }
 0x688   :  { %v2874_v10 = vsel %vm246_vm2, %v2854_v29, %v2868_v19  ;;  %v2872_v61 = vrot.slane %v2859_v42, 3  ;;  %v2873_v48 = vrot.slane %v2860_v55, 2 }
 0x689   :  { %v2877_v17 = vsel %vm68_vm0, %v2874_v10, %v2876_v21 }
 0x68a   :  { %v2879_v34 = vsel %vm2878_vm1, %v2871_v45, %v2872_v61 }
 0x68b   :  { %v2881_v37 = vsel %vm2880_vm3, %v2879_v34, %v2873_v48 }
 0x68c   :  { %v2882_v49 = vsel %vm544_vm7, %v2877_v17, %v2881_v37 }
 0x68d   :  { %2888 = vst.msk [vmem:[%s5497_s3] sm:$0x7f] %vm2886_vm4, %v2882_v49 }
 0x68e   :  { %2893 = vsyncpa [#allocation3], 1 }

</bundles_post_ra>
